<compile_context>
chip_gen: v5e
topology: v5e:2x2
jax: 0.10.0
libtpu: 0.0.40
codegen_flags: <defaults>
</compile_context>

<pallas_src>
import functools
import math

import jax
import jax.numpy as jnp
from jax.experimental import pallas as pl
from jax.experimental.pallas import tpu as pltpu


# ----------------------------------------------------------------------------
# Pallas kernels
# ----------------------------------------------------------------------------
def _mm_fused_kernel(a_ref, b_ref, bias_ref, o_ref, *, norm, act):
    """Grid = (m_tiles, n_tiles, k_tiles).  Accumulates A@B into the resident
    f32 output block; bias (+ InstanceNorm + activation) on the last K step."""
    k = pl.program_id(2)

    @pl.when(k == 0)
    def _():
        o_ref[...] = jnp.zeros_like(o_ref)

    o_ref[...] += jnp.dot(a_ref[...], b_ref[...],
                          preferred_element_type=jnp.float32)

    @pl.when(k == pl.num_programs(2) - 1)
    def _():
        y = o_ref[...] + bias_ref[...]
        if norm:
            # InstanceNorm3d: per-channel (column) over spatial (rows), biased
            # variance, eps=1e-5.  Valid because norm layers are never M-tiled
            # (full M lives in this block); exact per N tile.
            mu = jnp.mean(y, axis=0, keepdims=True)
            var = jnp.mean((y - mu) * (y - mu), axis=0, keepdims=True)
            y = (y - mu) * jax.lax.rsqrt(var + 1e-5)
        if act == "relu":
            y = jnp.maximum(y, 0.0)
        elif act == "tanh":
            y = jnp.tanh(y)
        o_ref[...] = y


def matmul_prepared(cols, lw, *, norm=False, act="none"):
    """cols: (M, Kp) bf16 (already K-padded); lw: prepared layer dict with
    wmat (Kp, Np) bf16 and bias (1, Np) f32.  Returns (M, Np) f32."""
    M, Kp = cols.shape
    assert Kp == lw["Kp"]
    Np, TK = lw["Np"], lw["TK"]
    nk = Kp // TK

    # M tiling only for layers without the full-M InstanceNorm epilogue.
    if (not norm) and (M % 1024 == 0) and (M >= 2048):
        TM = 1024
    else:
        TM = M
    nm = M // TM
    assert not (norm and nm != 1)

    # N tiling for the deep 512-wide layers (small M, weights dominate): gives
    # both v7x TensorCores work; exact because norm/act are per-column.
    if Np >= 512 and M <= 128:
        TN = 256
    else:
        TN = Np
    nn = Np // TN

    kern = functools.partial(_mm_fused_kernel, norm=norm, act=act)
    return pl.pallas_call(
        kern,
        out_shape=jax.ShapeDtypeStruct((M, Np), jnp.float32),
        grid_spec=pltpu.PrefetchScalarGridSpec(
            num_scalar_prefetch=0,
            grid=(nm, nn, nk),
            in_specs=[
                pl.BlockSpec((TM, TK), lambda m, n, k: (m, k)),
                pl.BlockSpec((TK, TN), lambda m, n, k: (k, n)),
                pl.BlockSpec((1, TN), lambda m, n, k: (0, n)),
            ],
            out_specs=pl.BlockSpec((TM, TN), lambda m, n, k: (m, n)),
        ),
        compiler_params=pltpu.CompilerParams(
            dimension_semantics=("parallel", "parallel", "arbitrary"),
            vmem_limit_bytes=48 * 1024 * 1024),
    )(cols, lw["wmat"], lw["bias"])


def _bmm_kernel(a_ref, b_ref, o_ref):
    o_ref[...] = jnp.dot(a_ref[...], b_ref[...],
                         preferred_element_type=jnp.float32)


def bmm(a, b):
    """Batched matmul (G, M, K) @ (G, K, N) -> (G, M, N), f32 (VAE covariance)."""
    G, M, K = a.shape
    _, _, N = b.shape
    return pl.pallas_call(
        _bmm_kernel,
        out_shape=jax.ShapeDtypeStruct((G, M, N), jnp.float32),
        grid_spec=pltpu.PrefetchScalarGridSpec(
            num_scalar_prefetch=0,
            grid=(G,),
            in_specs=[
                pl.BlockSpec((None, M, K), lambda g: (g, 0, 0)),
                pl.BlockSpec((None, K, N), lambda g: (g, 0, 0)),
            ],
            out_specs=pl.BlockSpec((None, M, N), lambda g: (g, 0, 0)),
        ),
        compiler_params=pltpu.CompilerParams(
            dimension_semantics=("parallel",),
            vmem_limit_bytes=48 * 1024 * 1024),
    )(a.astype(jnp.float32), b.astype(jnp.float32))


# ----------------------------------------------------------------------------
# Weight preparation (once, outside the per-call path)
# ----------------------------------------------------------------------------
def _choose_k_tile(K, Np):
    """K tile (multiple of 128) and padded K: minimize grid k-steps while
    bounding zero-pad waste (<= ~15% of chunks, or 1 chunk)."""
    chunks = -(-K // 128)
    dmax = 16 if Np >= 512 else 8
    d = 1
    for cand in (16, 8, 4, 2):
        if cand > dmax or cand > chunks:
            continue
        padded = -(-chunks // cand) * cand
        if padded - chunks <= max(int(round(0.15 * chunks)), 1):
            d = cand
            break
    padded = -(-chunks // d) * d
    return 128 * d, 128 * padded


def prep_conv(w, b):
    """w: (Cout, Cin, kd, kh, kw) f32 -> pre-laid-out, pre-padded bf16 matrix."""
    Cout, Cin, kd, kh, kw = w.shape
    K = Cin * kd * kh * kw
    Np = -(-Cout // 128) * 128
    TK, Kp = _choose_k_tile(K, Np)
    wmat = jnp.transpose(w, (2, 3, 4, 1, 0)).reshape(K, Cout)
    wmat = jnp.pad(wmat, ((0, Kp - K), (0, Np - Cout))).astype(jnp.bfloat16)
    bias = jnp.pad(b, (0, Np - Cout)).reshape(1, Np).astype(jnp.float32)
    return {"wmat": wmat, "bias": bias, "Cout": Cout, "Np": Np,
            "K": K, "Kp": Kp, "TK": TK, "ksize": (kd, kh, kw)}


# ----------------------------------------------------------------------------
# Conv / pooling / upsampling glue (activations channels-last: N, D, H, W, C)
# ----------------------------------------------------------------------------
def _im2col3d(x, ksize, stride, padding):
    """x: (D, H, W, C) -> (Do*Ho*Wo, kd*kh*kw*C) in x.dtype (no transpose)."""
    kd, kh, kw = ksize
    sd, sh, sw = stride
    pd, ph, pw = padding
    D, H, W, C = x.shape
    xp = jnp.pad(x, ((pd, pd), (ph, ph), (pw, pw), (0, 0)))
    Do = (D + 2 * pd - kd) // sd + 1
    Ho = (H + 2 * ph - kh) // sh + 1
    Wo = (W + 2 * pw - kw) // sw + 1
    patches = []
    for dz in range(kd):
        for dy in range(kh):
            for dx in range(kw):
                patches.append(
                    xp[dz:dz + sd * Do:sd,
                       dy:dy + sh * Ho:sh,
                       dx:dx + sw * Wo:sw, :])
    cols = jnp.stack(patches, axis=3)                 # (Do, Ho, Wo, taps, C)
    cols = cols.reshape(Do * Ho * Wo, kd * kh * kw * C)
    return cols, (Do, Ho, Wo)


def _cols_for(x_n, lw, stride, padding):
    cols, sp = _im2col3d(x_n.astype(jnp.bfloat16), lw["ksize"], stride, padding)
    if lw["Kp"] != lw["K"]:
        cols = jnp.pad(cols, ((0, 0), (0, lw["Kp"] - lw["K"])))
    return cols, sp


def conv3d_p(x, lw, stride=(1, 1, 1), padding=(1, 1, 1), norm=False, act="none"):
    """x: (N, D, H, W, Cin) channels-last; lw: prepared conv layer."""
    N = x.shape[0]
    Cout = lw["Cout"]
    outs = []
    # TODO(synk): per-sample loop (no-op at N==1) keeps InstanceNorm per-sample.
    for n in range(N):
        cols, (Do, Ho, Wo) = _cols_for(x[n], lw, stride, padding)
        y = matmul_prepared(cols, lw, norm=norm, act=act)
        if lw["Np"] != Cout:
            y = y[:, :Cout]
        outs.append(y.reshape(Do, Ho, Wo, Cout))
    return jnp.stack(outs, axis=0)


def conv_block_pair(x, lw, split):
    """Fused conv0_x / conv0_0: one shared im2col + one Pallas matmul (Np=128
    fully dense), both branches norm+relu; split channels afterwards."""
    N = x.shape[0]
    outs_a, outs_b = [], []
    for n in range(N):
        cols, (Do, Ho, Wo) = _cols_for(x[n], lw, (1, 1, 1), (1, 1, 1))
        y = matmul_prepared(cols, lw, norm=True, act="relu")
        outs_a.append(y[:, :split].reshape(Do, Ho, Wo, split))
        outs_b.append(y[:, split:lw["Cout"]].reshape(Do, Ho, Wo,
                                                     lw["Cout"] - split))
    return jnp.stack(outs_a, axis=0), jnp.stack(outs_b, axis=0)


def conv_transpose3d(x, lw, stride, padding, out_spatial):
    """ConvTranspose3d as dilate+pad + stride-1 conv with the pre-flipped
    weight (prepared in `prepare_params`).  out_spatial = target (Do,Ho,Wo)."""
    N, D, H, W, Cin = x.shape
    kd, kh, kw = lw["ksize"]
    s, p = stride, padding
    in_sp, k = (D, H, W), (kd, kh, kw)
    base = tuple((in_sp[i] - 1) * s[i] - 2 * p[i] + k[i] for i in range(3))
    op = tuple(out_spatial[i] - base[i] for i in range(3))   # output_padding
    assert all(o >= 0 for o in op), "invalid output_size for conv_transpose3d"
    xd = jnp.zeros((N,
                    (D - 1) * s[0] + 1,
                    (H - 1) * s[1] + 1,
                    (W - 1) * s[2] + 1, Cin), x.dtype)
    xd = xd.at[:, ::s[0], ::s[1], ::s[2], :].set(x)
    pads = [(0, 0)]
    for i in range(3):
        pads.append((k[i] - 1 - p[i], k[i] - 1 - p[i] + op[i]))
    pads.append((0, 0))
    xp = jnp.pad(xd, pads)
    return conv3d_p(xp, lw, stride=(1, 1, 1), padding=(0, 0, 0))


def maxpool_122(x):
    N, D, H, W, C = x.shape
    return x.reshape(N, D, H // 2, 2, W // 2, 2, C).max(axis=(3, 5))


def upsample_hw2(x):
    """Trilinear upsample, scale (1,2,2), align_corners=True (depth identity)."""
    def lerp(x, axis):
        n = x.shape[axis]
        out = 2 * n
        pos = jnp.arange(out, dtype=jnp.float32) * (n - 1) / (out - 1)
        lo = jnp.floor(pos).astype(jnp.int32)
        hi = jnp.minimum(lo + 1, n - 1)
        frac = pos - lo.astype(jnp.float32)
        shp = [1] * x.ndim
        shp[axis] = out
        frac = frac.reshape(shp)
        return jnp.take(x, lo, axis=axis) * (1.0 - frac) + \
               jnp.take(x, hi, axis=axis) * frac
    return lerp(lerp(x, 2), 3)


def linear(x, p):
    # Tiny matmuls (M = B*depth = 2): plain XLA, f32 — a dedicated pallas_call
    # would cost more in launch/DMA setup than the compute.
    return x @ p["w"].T + p["b"]


# ----------------------------------------------------------------------------
# Parameter init (deterministic, xavier-normal weights, zero biases)
# ----------------------------------------------------------------------------
def _xavier(key, shape):
    if len(shape) == 5:
        rf = shape[2] * shape[3] * shape[4]
        fan_in, fan_out = shape[1] * rf, shape[0] * rf
    else:
        fan_in, fan_out = shape[1], shape[0]
    std = math.sqrt(2.0 / (fan_in + fan_out))
    return std * jax.random.normal(key, shape, jnp.float32)


def init_params(key, num_classes, input_channels=3):
    nb = [64, 128, 256, 512, 512]
    keys = iter(jax.random.split(key, 64))

    def conv(cout, cin, k):
        return {"w": _xavier(next(keys), (cout, cin) + k),
                "b": jnp.zeros((cout,), jnp.float32)}

    def convt(cin, cout, k):  # ConvTranspose3d layout (Cin, Cout, ...)
        return {"w": _xavier(next(keys), (cin, cout) + k),
                "b": jnp.zeros((cout,), jnp.float32)}

    def lin(cout, cin):
        return {"w": _xavier(next(keys), (cout, cin)),
                "b": jnp.zeros((cout,), jnp.float32)}

    lat = nb[3] // 2          # 256
    flat = nb[4] * 1 * 1      # 512 * (resize_w/32) * (resize_h/32), resize=32

    p = {}
    # VAE branch encoder
    p["conv0_x"] = conv(nb[0], input_channels, (3, 3, 3))
    p["conv1_x"] = conv(nb[1], nb[0], (3, 3, 3))
    p["conv2_x"] = conv(nb[2], nb[1], (3, 3, 3))
    p["conv3_x"] = conv(nb[3], nb[2], (3, 3, 3))
    p["conv4_x"] = conv(nb[4], nb[3], (3, 3, 3))
    p["conv_down"] = conv(nb[4], nb[4], (1, 3, 3))
    p["conv_down_"] = conv(nb[4], nb[4], (1, 3, 3))
    p["mean_vec"] = lin(lat, flat)
    p["covar_half"] = lin(lat, flat)
    p["x_ori_vec"] = lin(lat, flat)
    p["transform"] = lin(flat, lat)
    p["transform_"] = lin(flat, lat)
    p["conv_up"] = convt(nb[4], nb[4], (1, 3, 3))
    p["conv_up_"] = convt(nb[4], nb[4], (1, 3, 3))
    # VAE branch decoder
    p["conv3_1_x"] = conv(nb[3], nb[3] + nb[4], (3, 3, 3))
    p["conv2_2_x"] = conv(nb[2], nb[2] + nb[3], (3, 3, 3))
    p["conv1_3_x"] = conv(nb[1], nb[1] + nb[2], (3, 3, 3))
    p["conv0_4_x"] = conv(nb[0], nb[0] + nb[1], (3, 3, 3))
    p["conv00"] = conv(input_channels, nb[0], (3, 3, 3))
    # Segmentation branch
    p["conv0_0"] = conv(nb[0], input_channels, (3, 3, 3))
    p["conv1_0"] = conv(nb[1], nb[0], (3, 3, 3))
    p["conv2_0"] = conv(nb[1], nb[1], (3, 3, 3))
    # TODO(synk): reference declares conv3_0 with 256 in-channels but it receives 128.
    p["conv3_0"] = conv(nb[3], nb[1], (3, 3, 3))
    p["conv4_0"] = conv(nb[4], nb[3], (3, 3, 3))
    # TODO(synk): reference declares conv3_1 with 1024 in-channels but it receives 1536.
    p["conv3_1"] = conv(nb[3], nb[3] + 2 * nb[4], (3, 3, 3))
    # TODO(synk): reference declares conv2_2 with 768 in-channels but it receives 640.
    p["conv2_2"] = conv(nb[2], nb[1] + nb[3], (3, 3, 3))
    p["conv1_3"] = conv(nb[1], nb[1] + nb[2], (3, 3, 3))
    p["conv0_4"] = conv(nb[0], nb[0] + nb[1], (3, 3, 3))
    p["final"] = conv(num_classes, nb[0], (1, 1, 1))
    return p


def prepare_params(rp):
    """Pre-layout / pre-pad / pre-cast every conv weight once (bf16)."""
    pp = {}
    conv_names = ["conv1_x", "conv2_x", "conv3_x", "conv4_x",
                  "conv_down", "conv_down_",
                  "conv3_1_x", "conv2_2_x", "conv1_3_x", "conv0_4_x", "conv00",
                  "conv1_0", "conv2_0", "conv3_0", "conv4_0",
                  "conv3_1", "conv2_2", "conv1_3", "conv0_4", "final"]
    for name in conv_names:
        pp[name] = prep_conv(rp[name]["w"], rp[name]["b"])
    # ConvTranspose3d: flip taps + swap channels once -> ordinary stride-1 conv.
    for name in ("conv_up", "conv_up_"):
        w = rp[name]["w"]
        wf = jnp.transpose(w[:, :, ::-1, ::-1, ::-1], (1, 0, 2, 3, 4))
        pp[name] = prep_conv(wf, rp[name]["b"])
    # Merged first conv: conv0_x ++ conv0_0 along Cout (shared input x).
    wm = jnp.concatenate([rp["conv0_x"]["w"], rp["conv0_0"]["w"]], axis=0)
    bm = jnp.concatenate([rp["conv0_x"]["b"], rp["conv0_0"]["b"]])
    pp["conv0_merged"] = prep_conv(wm, bm)
    pp["conv0_split"] = int(rp["conv0_x"]["w"].shape[0])
    # Tiny linears stay raw f32.
    for name in ("mean_vec", "covar_half", "x_ori_vec", "transform", "transform_"):
        pp[name] = rp[name]
    return pp


# ----------------------------------------------------------------------------
# Forward pass (input / outputs in PyTorch NCDHW layout; internals channels-last)
# ----------------------------------------------------------------------------
def _to_cl(x):     # NCDHW -> NDHWC
    return jnp.transpose(x, (0, 2, 3, 4, 1))


def _to_ncdhw(x):  # NDHWC -> NCDHW
    return jnp.transpose(x, (0, 4, 1, 2, 3))


def lrl_forward(p, x_ncdhw, eps_key, M=1):
    assert M == 1  # TODO(synk): only the M==1 reparameterize path is implemented
    pool, up = maxpool_122, upsample_hw2
    cb = lambda t, name: conv3d_p(t, p[name], norm=True, act="relu")
    rep = lambda t: jnp.tile(t, (M, 1, 1, 1, 1))
    cat = lambda ts: jnp.concatenate(ts, axis=-1)

    x = _to_cl(x_ncdhw)

    # ---- shared entry conv (conv0_x and conv0_0 fused into one matmul) ----
    x0_x, x0_0 = conv_block_pair(x, p["conv0_merged"], p["conv0_split"])

    # ---- VAE branch encoder ----
    x1_x = cb(pool(x0_x), "conv1_x")
    x2_x = cb(pool(x1_x), "conv2_x")
    x3_x = cb(pool(x2_x), "conv3_x")
    x4_x = cb(pool(x3_x), "conv4_x")
    x4_ = conv3d_p(x4_x, p["conv_down"], stride=(1, 2, 2), padding=(0, 1, 1))
    B, D4, H4, W4, C4 = x4_.shape
    depth = D4
    # torch: x4_d = transpose(x4_, 1, 2).flatten(2) -> (B, D, C*H*W)
    x4_d = jnp.transpose(x4_, (0, 1, 4, 2, 3)).reshape(B, depth, C4 * H4 * W4)

    mean = linear(x4_d, p["mean_vec"])                 # (B, depth, Dlat)
    Dlat = mean.shape[-1]
    chv = linear(x4_d, p["covar_half"]).reshape(B * depth, Dlat)

    identity = jnp.eye(Dlat, dtype=jnp.float32)[None] * 10.0
    covar_half = chv[:, :, None] * chv[:, None, :] + identity   # outer product
    covar = bmm(covar_half, covar_half)

    # reparameterize (M == 1): (1, Dlat) row-vector @ covar_half per group
    eps = jax.random.normal(eps_key, (B, depth, Dlat), jnp.float32)
    eps_ = jnp.einsum("gd,gde->ge", eps.reshape(B * depth, Dlat), covar_half)
    Z = eps_.reshape(B, depth, Dlat) + mean

    # torch: Z_ = transform(Z).view(B*M, C4, D4, H4, W4)  (raw flat reinterpret)
    Z_nchw = linear(Z, p["transform"]).reshape(B * M, C4, D4, H4, W4)
    Z_ = jnp.transpose(Z_nchw, (0, 2, 3, 4, 1))
    x4_0_v = conv_transpose3d(Z_, p["conv_up"], stride=(1, 2, 2),
                              padding=(0, 1, 1), out_spatial=x4_x.shape[1:4])

    x3_1x = cb(cat([rep(x3_x), up(x4_0_v)]), "conv3_1_x")
    x2_2x = cb(cat([rep(x2_x), up(x3_1x)]), "conv2_2_x")
    x1_3x = cb(cat([rep(x1_x), up(x2_2x)]), "conv1_3_x")
    x0_4x = cb(cat([rep(x0_x), up(x1_3x)]), "conv0_4_x")
    x_ori = conv3d_p(x0_4x, p["conv00"], act="tanh")

    # ---- segmentation branch ----
    x1_0 = cb(pool(x0_0), "conv1_0")
    x2_0 = cb(pool(x1_0), "conv2_0")
    x3_0 = cb(pool(x2_0), "conv3_0")
    x4_0 = cb(pool(x3_0), "conv4_0")
    x4_0_ = conv3d_p(x4_0, p["conv_down_"], stride=(1, 2, 2), padding=(0, 1, 1))
    x4_0d = jnp.transpose(x4_0_, (0, 1, 4, 2, 3)).reshape(B, depth, -1)
    Z_f = linear(x4_0d, p["x_ori_vec"])
    Z_f_nchw = linear(Z_f, p["transform_"]).reshape(B, C4, D4, H4, W4)
    Z_f_ = jnp.tile(jnp.transpose(Z_f_nchw, (0, 2, 3, 4, 1)), (M, 1, 1, 1, 1))
    x4_0_z = conv_transpose3d(Z_f_, p["conv_up_"], stride=(1, 2, 2),
                              padding=(0, 1, 1), out_spatial=x4_0.shape[1:4])
    x4_0c = cat([x4_0_z, x4_0_v])

    x3_1 = cb(cat([rep(x3_0), up(x4_0c)]), "conv3_1")
    x2_2 = cb(cat([rep(x2_0), up(x3_1)]), "conv2_2")
    x1_3 = cb(cat([rep(x1_0), up(x2_2)]), "conv1_3")
    x0_4 = cb(cat([rep(x0_0), up(x1_3)]), "conv0_4")
    output = conv3d_p(x0_4, p["final"], padding=(0, 0, 0))

    return (_to_ncdhw(output), mean, covar.reshape(-1, depth, Dlat, Dlat),
            _to_ncdhw(x_ori), Z)


# ----------------------------------------------------------------------------
if __name__ == "__main__":
    key = jax.random.PRNGKey(0)
    pkey, xkey, ekey = jax.random.split(key, 3)

    num_classes = 2
    # resize_w = resize_h = 32 => latent spatial w = h = 1; input (N, C, D, H, W)
    x = jax.random.normal(xkey, (1, 3, 2, 32, 32), jnp.float32)

    raw_params = init_params(pkey, num_classes=num_classes, input_channels=3)
    params = prepare_params(raw_params)

    outs = lrl_forward(params, x, ekey, M=1)
    outs = jax.tree_util.tree_map(jax.block_until_ready, outs)

    # shapes: output (1,2,2,32,32), mean (1,2,256), covar (1,2,256,256),
    #         x_ori (1,3,2,32,32), Z (1,2,256)
    print("KERNEL_OK")
</pallas_src>

<mosaic_0001>
module attributes {stable_mosaic.version = 11 : i64} {
  func.func @_mm_fused_kernel(%arg0: i32, %arg1: i32, %arg2: i32, %arg3: memref<2048x128xbf16, #tpu.memory_space<vmem>>, %arg4: memref<128x128xbf16, #tpu.memory_space<vmem>>, %arg5: memref<1x128xf32, #tpu.memory_space<vmem>>, %arg6: memref<2048x128xf32, #tpu.memory_space<vmem>>) attributes {dimension_semantics = [#tpu.dimension_semantics<parallel>, #tpu.dimension_semantics<parallel>, #tpu.dimension_semantics<arbitrary>], iteration_bounds = array<i64: 1, 1, 1>, scalar_prefetch = 0 : i64, scratch_operands = 0 : i64, tpu.core_type = #tpu.core_type<tc>, window_params = [{transform_indices = @transform_0, window_bounds = array<i64: 2048, 128>}, {transform_indices = @transform_1, window_bounds = array<i64: 128, 128>}, {transform_indices = @transform_2, window_bounds = array<i64: 1, 128>}, {transform_indices = @transform_3, window_bounds = array<i64: 2048, 128>}]} {
    %c0_i32 = arith.constant 0 : i32
    %0 = arith.cmpi eq, %arg2, %c0_i32 : i32
    %1 = arith.extui %0 : i1 to i32
    %c0_i32_0 = arith.constant 0 : i32
    %2 = arith.cmpi ne, %1, %c0_i32_0 : i32
    scf.if %2 {
      %cst_10 = arith.constant 0.000000e+00 : f32
      %12 = vector.broadcast %cst_10 : f32 to vector<2048x128xf32>
      %c0_11 = arith.constant 0 : index
      %c0_12 = arith.constant 0 : index
      %13 = vector.load %arg6[%c0_11, %c0_12] : memref<2048x128xf32, #tpu.memory_space<vmem>>, vector<2048x128xf32>
      tpu.vector_store %arg6[%c0_11, %c0_12], %12 {strides = array<i32>} : memref<2048x128xf32, #tpu.memory_space<vmem>>, vector<2048x128xf32>,
    } else {
    }
    %c0 = arith.constant 0 : index
    %c0_1 = arith.constant 0 : index
    %3 = vector.load %arg6[%c0, %c0_1] : memref<2048x128xf32, #tpu.memory_space<vmem>>, vector<2048x128xf32>
    %c0_2 = arith.constant 0 : index
    %c0_3 = arith.constant 0 : index
    %4 = vector.load %arg3[%c0_2, %c0_3] : memref<2048x128xbf16, #tpu.memory_space<vmem>>, vector<2048x128xbf16>
    %c0_4 = arith.constant 0 : index
    %c0_5 = arith.constant 0 : index
    %5 = vector.load %arg4[%c0_4, %c0_5] : memref<128x128xbf16, #tpu.memory_space<vmem>>, vector<128x128xbf16>
    %cst = arith.constant dense<0.000000e+00> : vector<2048x128xf32>
    %6 = tpu.matmul %4, %5, %cst {dimension_numbers = #tpu.dot_dimension_numbers<[1], [0], [0], [1], [0, 0, 1, 1], [], []>} : vector<2048x128xbf16>, vector<128x128xbf16>, vector<2048x128xf32> -> vector<2048x128xf32>
    %7 = arith.addf %3, %6 : vector<2048x128xf32>
    %c0_6 = arith.constant 0 : index
    %c0_7 = arith.constant 0 : index
    %8 = vector.load %arg6[%c0_6, %c0_7] : memref<2048x128xf32, #tpu.memory_space<vmem>>, vector<2048x128xf32>
    tpu.vector_store %arg6[%c0_6, %c0_7], %7 {strides = array<i32>} : memref<2048x128xf32, #tpu.memory_space<vmem>>, vector<2048x128xf32>,
    %c0_i32_8 = arith.constant 0 : i32
    %9 = arith.cmpi eq, %arg2, %c0_i32_8 : i32
    %10 = arith.extui %9 : i1 to i32
    %c0_i32_9 = arith.constant 0 : i32
    %11 = arith.cmpi ne, %10, %c0_i32_9 : i32
    scf.if %11 {
      %c0_10 = arith.constant 0 : index
      %c0_11 = arith.constant 0 : index
      %12 = vector.load %arg6[%c0_10, %c0_11] : memref<2048x128xf32, #tpu.memory_space<vmem>>, vector<2048x128xf32>
      %c0_12 = arith.constant 0 : index
      %c0_13 = arith.constant 0 : index
      %13 = vector.load %arg5[%c0_12, %c0_13] : memref<1x128xf32, #tpu.memory_space<vmem>>, vector<1x128xf32>
      %14 = vector.broadcast %13 : vector<1x128xf32> to vector<2048x128xf32>
      %15 = arith.addf %12, %14 : vector<2048x128xf32>
      %cst_14 = arith.constant dense<0.000000e+00> : vector<128xf32>
      %16 = vector.multi_reduction <add>, %15, %cst_14 [0] : vector<2048x128xf32> to vector<128xf32>
      %17 = vector.shape_cast %16 : vector<128xf32> to vector<1x128xf32>
      %cst_15 = arith.constant 2.048000e+03 : f32
      %18 = vector.broadcast %cst_15 : f32 to vector<1x128xf32>
      %19 = arith.divf %17, %18 : vector<1x128xf32>
      %20 = vector.broadcast %19 : vector<1x128xf32> to vector<2048x128xf32>
      %21 = arith.subf %15, %20 : vector<2048x128xf32>
      %22 = vector.broadcast %19 : vector<1x128xf32> to vector<2048x128xf32>
      %23 = arith.subf %15, %22 : vector<2048x128xf32>
      %24 = arith.mulf %21, %23 : vector<2048x128xf32>
      %cst_16 = arith.constant dense<0.000000e+00> : vector<128xf32>
      %25 = vector.multi_reduction <add>, %24, %cst_16 [0] : vector<2048x128xf32> to vector<128xf32>
      %26 = vector.shape_cast %25 : vector<128xf32> to vector<1x128xf32>
      %cst_17 = arith.constant 2.048000e+03 : f32
      %27 = vector.broadcast %cst_17 : f32 to vector<1x128xf32>
      %28 = arith.divf %26, %27 : vector<1x128xf32>
      %29 = vector.broadcast %19 : vector<1x128xf32> to vector<2048x128xf32>
      %30 = arith.subf %15, %29 : vector<2048x128xf32>
      %cst_18 = arith.constant 9.99999974E-6 : f32
      %31 = vector.broadcast %cst_18 : f32 to vector<1x128xf32>
      %32 = arith.addf %28, %31 : vector<1x128xf32>
      %33 = math.rsqrt %32 : vector<1x128xf32>
      %34 = vector.broadcast %33 : vector<1x128xf32> to vector<2048x128xf32>
      %35 = arith.mulf %30, %34 : vector<2048x128xf32>
      %cst_19 = arith.constant 0.000000e+00 : f32
      %36 = vector.broadcast %cst_19 : f32 to vector<2048x128xf32>
      %37 = arith.maximumf %35, %36 : vector<2048x128xf32>
      %c0_20 = arith.constant 0 : index
      %c0_21 = arith.constant 0 : index
      %38 = vector.load %arg6[%c0_20, %c0_21] : memref<2048x128xf32, #tpu.memory_space<vmem>>, vector<2048x128xf32>
      tpu.vector_store %arg6[%c0_20, %c0_21], %37 {strides = array<i32>} : memref<2048x128xf32, #tpu.memory_space<vmem>>, vector<2048x128xf32>,
    } else {
    }
    return
  }
  func.func @transform_0(%arg0: i32, %arg1: i32, %arg2: i32) -> (i32, i32) {
    %c0_i32 = arith.constant 0 : i32
    return %arg0, %arg2 : i32, i32
  }
  func.func @transform_1(%arg0: i32, %arg1: i32, %arg2: i32) -> (i32, i32) {
    %c0_i32 = arith.constant 0 : i32
    return %arg2, %arg1 : i32, i32
  }
  func.func @transform_2(%arg0: i32, %arg1: i32, %arg2: i32) -> (i32, i32) {
    %c0_i32 = arith.constant 0 : i32
    %c0_i32_0 = arith.constant 0 : i32
    return %c0_i32, %arg1 : i32, i32
  }
  func.func @transform_3(%arg0: i32, %arg1: i32, %arg2: i32) -> (i32, i32) {
    %c0_i32 = arith.constant 0 : i32
    return %arg0, %arg1 : i32, i32
  }
}

</mosaic_0001>

<bundles_post_ra>
// kernel: tpu_custom_call.1
= control target key start
LH: loop header
LB: loop body
LE: loop exit
PB: predicated region body
PF: predicated region fallthrough
CT: control target
= control target key end

     0   :  { %8 = vsyncpa [#allocation3], 0  ;;  %s9758_s0 = inlined_call_operand.hbm [shape: bf16[2048,128], index: 0, kind: input, shape index: {}]   ;;  %s9759_s1 = inlined_call_operand.hbm [shape: bf16[128,128], index: 1, kind: input, shape index: {}]   ;;  %s9760_s2 = inlined_call_operand.vmem [shape: f32[1,128], index: 2, kind: input, shape index: {}]   ;;  %s9761_s3 = inlined_call_operand.hbm [shape: f32[2048,128], index: 3, kind: output, shape index: {}]  }
   0x1   :  { %9 = vsyncpa [#allocation6], 0 }
   0x2   :  { %10 = vsyncpa [#allocation4], 0  ;;  %s15_s14 = sshll.u32 %s9758_s0, 4  ;;  %s5970_s15 = smov [#allocation2]   ;;  %s16_s14 = int_to_ptr.hbm [resolvable:$true] %s15_s14 }
   0x3   :  { %s17_s16 = sshll.u32 %s5970_s15, 4  ;;  %s28_s19 = sshll.u32 %s9759_s1, 4  ;;  %s18_s16 = int_to_ptr.vmem [resolvable:$true] %s17_s16  ;;  %s29_s19 = int_to_ptr.hbm [resolvable:$true] %s28_s19 }
   0x4   :  { %s5971_s20 = smov 64   ;;  %s5972_s21 = smov 4  }
   0x5   :  { %23 = dma.hbm_to_vmem [thread:$0]  %s16_s14, 16384, %s18_s16, [#allocation3], %s5971_s20, %s5971_s20, %s5972_s21  }
   0x6   :  { %s5973_s22 = smov [#allocation5]  }
   0x7   :  { %s30_s23 = sshll.u32 %s5973_s22, 4  ;;  %s31_s23 = int_to_ptr.vmem [resolvable:$true] %s30_s23 }
   0x8   :  { %36 = dma.hbm_to_vmem [thread:$0]  %s29_s19, 1024, %s31_s23, [#allocation6], %s5971_s20, %s5971_s20, %s5972_s21  }
   0x9   :  { %5964 = dma.done.wait [#allocation3], 16384  }
   0xa   :  { %5965 = vsyncadd [#allocation3], 4294950912 }
   0xb   :  { %5966 = dma.done.wait [#allocation6], 1024  }
   0xc   :  { %5967 = vsyncadd [#allocation6], 4294966272  ;;  %v5852_v0 = vld [vmem:[#allocation5 + $0x38] sm:$0xff]  ;;  %v5851_v1 = vld [vmem:[#allocation5 + $0x30] sm:$0xff]  ;;  %s5159_s29 = sshll.u32 %s9761_s3, 4  ;;  %s5976_s30 = smov 128   ;;  %s5160_s29 = int_to_ptr.hbm [resolvable:$true] %s5159_s29 }
   0xd   :  { %1651 = vmatpush.bf16.msra.mxu0 %v5852_v0  ;;  %5853 = vmatpush.bf16.msra.mxu1 %v5852_v0  ;;  %v5850_v2 = vld [vmem:[#allocation5 + $0x28] sm:$0xff]  ;;  %v5849_v3 = vld [vmem:[#allocation5 + $0x20] sm:$0xff]  ;;  %v5848_v4 = vld [vmem:[#allocation5 + $0x18] sm:$0xff]  ;;  %s5977_s4 = smov 8  }
   0xe   :  { %5854 = vmatpush.bf16.msra.mxu2 %v5852_v0  ;;  %5855 = vmatpush.bf16.msra.mxu3 %v5852_v0  ;;  %v5847_v5 = vld [vmem:[#allocation5 + $0x10] sm:$0xff]  ;;  %v5846_v6 = vld [vmem:[#allocation5 + $0x8] sm:$0xff]  ;;  %v5845_v7 = vld [vmem:[#allocation5] sm:$0xff] }
   0xf   :  { %v5717_v8 = vld [vmem:[#allocation2] sm:$0xff]  ;;  %v5718_v9 = vld [vmem:[#allocation2 + $0x8] sm:$0xff]  ;;  %v5719_v10 = vld [vmem:[#allocation2 + $0x10] sm:$0xff] }
  0x10   :  { %v5720_v11 = vld [vmem:[#allocation2 + $0x18] sm:$0xff]  ;;  %v5721_v12 = vld [vmem:[#allocation2 + $0x20] sm:$0xff]  ;;  %v5722_v13 = vld [vmem:[#allocation2 + $0x28] sm:$0xff] }
  0x11   :  { %1652 = vmatpush.bf16.msra.mxu0 %v5851_v1  ;;  %5856 = vmatpush.bf16.msra.mxu1 %v5851_v1  ;;  %v5749_v14 = vld [vmem:[#allocation2 + $0x100] sm:$0xff]  ;;  %v5723_v15 = vld [vmem:[#allocation2 + $0x30] sm:$0xff]  ;;  %v5750_v16 = vld [vmem:[#allocation2 + $0x108] sm:$0xff] }
  0x12   :  { %5857 = vmatpush.bf16.msra.mxu2 %v5851_v1  ;;  %5858 = vmatpush.bf16.msra.mxu3 %v5851_v1  ;;  %v5724_v17 = vld [vmem:[#allocation2 + $0x38] sm:$0xff]  ;;  %v5751_v18 = vld [vmem:[#allocation2 + $0x110] sm:$0xff]  ;;  %v5725_v19 = vld [vmem:[#allocation2 + $0x40] sm:$0xff] }
  0x13   :  { %v5752_v22 = vld [vmem:[#allocation2 + $0x118] sm:$0xff]  ;;  %v5726_v23 = vld [vmem:[#allocation2 + $0x48] sm:$0xff]  ;;  %v5753_v26 = vld [vmem:[#allocation2 + $0x120] sm:$0xff] }
  0x14   :  { %v5727_v27 = vld [vmem:[#allocation2 + $0x50] sm:$0xff]  ;;  %v5754_v30 = vld [vmem:[#allocation2 + $0x128] sm:$0xff]  ;;  %v5728_v31 = vld [vmem:[#allocation2 + $0x58] sm:$0xff] }
  0x15   :  { %1653 = vmatpush.bf16.msra.mxu0 %v5850_v2  ;;  %5859 = vmatpush.bf16.msra.mxu1 %v5850_v2  ;;  %v5755_v34 = vld [vmem:[#allocation2 + $0x130] sm:$0xff]  ;;  %v5729_v35 = vld [vmem:[#allocation2 + $0x60] sm:$0xff]  ;;  %v5756_v38 = vld [vmem:[#allocation2 + $0x138] sm:$0xff] }
  0x16   :  { %5860 = vmatpush.bf16.msra.mxu2 %v5850_v2  ;;  %5861 = vmatpush.bf16.msra.mxu3 %v5850_v2  ;;  %v5730_v39 = vld [vmem:[#allocation2 + $0x68] sm:$0xff]  ;;  %v5781_v41 = vld [vmem:[#allocation2 + $0x200] sm:$0xff]  ;;  %v5731_v45 = vld [vmem:[#allocation2 + $0x70] sm:$0xff] }
  0x17   :  { %v5757_v44 = vld [vmem:[#allocation2 + $0x140] sm:$0xff]  ;;  %v5782_v48 = vld [vmem:[#allocation2 + $0x208] sm:$0xff]  ;;  %v5732_v52 = vld [vmem:[#allocation2 + $0x78] sm:$0xff] }
  0x18   :  { %v5758_v51 = vld [vmem:[#allocation2 + $0x148] sm:$0xff]  ;;  %v5783_v55 = vld [vmem:[#allocation2 + $0x210] sm:$0xff]  ;;  %v5733_v59 = vld [vmem:[#allocation2 + $0x80] sm:$0xff] }
  0x19   :  { %1654 = vmatpush.bf16.msra.mxu0 %v5849_v3  ;;  %5862 = vmatpush.bf16.msra.mxu1 %v5849_v3  ;;  %v5759_v58 = vld [vmem:[#allocation2 + $0x150] sm:$0xff]  ;;  %v5784_v62 = vld [vmem:[#allocation2 + $0x218] sm:$0xff]  ;;  %v5734_v2 = vld [vmem:[#allocation2 + $0x88] sm:$0xff] }
  0x1a   :  { %5863 = vmatpush.bf16.msra.mxu2 %v5849_v3  ;;  %5864 = vmatpush.bf16.msra.mxu3 %v5849_v3  ;;  %v5760_v1 = vld [vmem:[#allocation2 + $0x158] sm:$0xff] }
  0x1d   :  { %1655 = vmatpush.bf16.msra.mxu0 %v5848_v4  ;;  %5865 = vmatpush.bf16.msra.mxu1 %v5848_v4 }
  0x1e   :  { %5866 = vmatpush.bf16.msra.mxu2 %v5848_v4  ;;  %5867 = vmatpush.bf16.msra.mxu3 %v5848_v4 }
  0x21   :  { %1656 = vmatpush.bf16.msra.mxu0 %v5847_v5  ;;  %5868 = vmatpush.bf16.msra.mxu1 %v5847_v5 }
  0x22   :  { %5869 = vmatpush.bf16.msra.mxu2 %v5847_v5  ;;  %5870 = vmatpush.bf16.msra.mxu3 %v5847_v5  ;;  %v5785_v5 = vld [vmem:[#allocation2 + $0x220] sm:$0xff] }
  0x25   :  { %1657 = vmatpush.bf16.msra.mxu0 %v5846_v6  ;;  %5871 = vmatpush.bf16.msra.mxu1 %v5846_v6 }
  0x26   :  { %5872 = vmatpush.bf16.msra.mxu2 %v5846_v6  ;;  %5873 = vmatpush.bf16.msra.mxu3 %v5846_v6 }
  0x29   :  { %1658 = vmatpush.bf16.msra.mxu0 %v5845_v7  ;;  %5874 = vmatpush.bf16.msra.mxu1 %v5845_v7 }
  0x2a   :  { %5875 = vmatpush.bf16.msra.mxu2 %v5845_v7  ;;  %5876 = vmatpush.bf16.msra.mxu3 %v5845_v7 }
  0x2c   :  { %1659 = vmatmul.bf16.vlgmr.msra.gmra.mxu0 %v5717_v8  ;;  %1819 = vmatmul.bf16.vlgmr.msra.gmra.mxu1 %v5749_v14  ;;  %v5761_v8 = vld [vmem:[#allocation2 + $0x160] sm:$0xff] }
  0x2d   :  { %1979 = vmatmul.bf16.vlgmr.msra.gmra.mxu2 %v5781_v41  ;;  %v5738_v41 = vld [vmem:[#allocation2 + $0xa8] sm:$0xff] }
  0x3c   :  { %1664 = vmatmul.bf16.gmra.mxu0 %v5718_v9  ;;  %1824 = vmatmul.bf16.gmra.mxu1 %v5750_v16  ;;  %v5735_v9 = vld [vmem:[#allocation2 + $0x90] sm:$0xff]  ;;  %v5736_v16 = vld [vmem:[#allocation2 + $0x98] sm:$0xff] }
  0x3d   :  { %1984 = vmatmul.bf16.gmra.mxu2 %v5782_v48  ;;  %v5789_v48 = vld [vmem:[#allocation2 + $0x240] sm:$0xff] }
  0x4c   :  { %1669 = vmatmul.bf16.gmra.mxu0 %v5719_v10  ;;  %1829 = vmatmul.bf16.gmra.mxu1 %v5751_v18 }
  0x4d   :  { %1989 = vmatmul.bf16.gmra.mxu2 %v5783_v55 }
  0x5c   :  { %1674 = vmatmul.bf16.gmra.mxu0 %v5720_v11  ;;  %1834 = vmatmul.bf16.gmra.mxu1 %v5752_v22 }
  0x5d   :  { %1994 = vmatmul.bf16.gmra.mxu2 %v5784_v62  ;;  %v5739_v62 = vld [vmem:[#allocation2 + $0xb0] sm:$0xff] }
  0x6c   :  { %1679 = vmatmul.bf16.gmra.mxu0 %v5721_v12  ;;  %1839 = vmatmul.bf16.gmra.mxu1 %v5753_v26  ;;  %v5786_v12 = vld [vmem:[#allocation2 + $0x228] sm:$0xff]  ;;  %v5763_v26 = vld [vmem:[#allocation2 + $0x170] sm:$0xff] }
  0x6d   :  { %1999 = vmatmul.bf16.gmra.mxu2 %v5785_v5 }
  0x7c   :  { %1684 = vmatmul.bf16.gmra.mxu0 %v5722_v13  ;;  %1844 = vmatmul.bf16.gmra.mxu1 %v5754_v30 }
  0x7d   :  { %2004 = vmatmul.bf16.gmra.mxu2 %v5786_v12 }
  0x8c   :  { %1689 = vmatmul.bf16.gmra.mxu0 %v5723_v15  ;;  %1849 = vmatmul.bf16.gmra.mxu1 %v5755_v34  ;;  %v5762_v15 = vld [vmem:[#allocation2 + $0x168] sm:$0xff]  ;;  %v5788_v34 = vld [vmem:[#allocation2 + $0x238] sm:$0xff] }
  0x9c   :  { %1694 = vmatmul.bf16.gmra.mxu0 %v5724_v17  ;;  %1854 = vmatmul.bf16.gmra.mxu1 %v5756_v38 }
  0xa9   :  { %v6004_v20 = vpop.f32.mrf.mxu0  ;;  %v6028_v43 = vpop.f32.mrf.mxu1 }
  0xac   :  { %1699 = vmatmul.bf16.gmra.mxu0 %v5725_v19  ;;  %1859 = vmatmul.bf16.gmra.mxu1 %v5757_v44  ;;  %v5787_v19 = vld [vmem:[#allocation2 + $0x230] sm:$0xff] }
  0xad   :  { %2009 = vmatmul.bf16.gmra.mxu2 %v5787_v19  ;;  %v5766_v19 = vld [vmem:[#allocation2 + $0x188] sm:$0xff] }
  0xb1   :  { %v6006_v21 = vpop.f32.mrf.mxu0  ;;  %v6032_v47 = vpop.f32.mrf.mxu1 }
  0xb9   :  { %v6008_v24 = vpop.f32.mrf.mxu0  ;;  %v6036_v50 = vpop.f32.mrf.mxu1 }
  0xbc   :  { %1704 = vmatmul.bf16.gmra.mxu0 %v5726_v23  ;;  %1864 = vmatmul.bf16.gmra.mxu1 %v5758_v51  ;;  %v5813_v51 = vld [vmem:[#allocation2 + $0x300] sm:$0xff] }
  0xbd   :  { %2014 = vmatmul.bf16.gmra.mxu2 %v5788_v34  ;;  %2139 = vmatmul.bf16.vlgmr.msra.gmra.mxu3 %v5813_v51 }
  0xc1   :  { %v6010_v25 = vpop.f32.mrf.mxu0  ;;  %v6040_v54 = vpop.f32.mrf.mxu1 }
  0xc9   :  { %v6012_v28 = vpop.f32.mrf.mxu0  ;;  %v6044_v57 = vpop.f32.mrf.mxu1 }
  0xcc   :  { %1709 = vmatmul.bf16.gmra.mxu0 %v5727_v27  ;;  %1869 = vmatmul.bf16.gmra.mxu1 %v5759_v58  ;;  %v5737_v27 = vld [vmem:[#allocation2 + $0xa0] sm:$0xff]  ;;  %v6094_v58 = vpop.f32.mrf.mxu2 }
  0xcd   :  { %2019 = vmatmul.bf16.gmra.mxu2 %v5789_v48  ;;  %10197 = vst [vmem:[#allocation23_spill] sm:$0xff] %v6094_v58  ;;  %v5815_v48 = vld [vmem:[#allocation2 + $0x310] sm:$0xff] }
  0xd1   :  { %v6014_v29 = vpop.f32.mrf.mxu0  ;;  %v6048_v61 = vpop.f32.mrf.mxu1 }
  0xd2   :  { %10185 = vst [vmem:[#allocation11_spill] sm:$0xff] %v6048_v61  ;;  %v5824_v61 = vld [vmem:[#allocation2 + $0x358] sm:$0xff] }
  0xd4   :  { %v6100_v5 = vpop.f32.mrf.mxu2 }
  0xd5   :  { %10199 = vst [vmem:[#allocation25_spill] sm:$0xff] %v6100_v5 }
  0xd9   :  { %v6016_v32 = vpop.f32.mrf.mxu0  ;;  %v6052_v0 = vpop.f32.mrf.mxu1 }
  0xda   :  { %10186 = vst [vmem:[#allocation12_spill] sm:$0xff] %v6052_v0  ;;  %v5775_v0 = vld [vmem:[#allocation2 + $0x1d0] sm:$0xff] }
  0xdc   :  { %1714 = vmatmul.bf16.gmra.mxu0 %v5728_v31  ;;  %1874 = vmatmul.bf16.gmra.mxu1 %v5760_v1 }
  0xe1   :  { %v6018_v33 = vpop.f32.mrf.mxu0  ;;  %v6056_v4 = vpop.f32.mrf.mxu1 }
  0xe2   :  { %10187 = vst [vmem:[#allocation13_spill] sm:$0xff] %v6056_v4 }
  0xe9   :  { %v6020_v36 = vpop.f32.mrf.mxu0  ;;  %v6060_v7 = vpop.f32.mrf.mxu1 }
  0xea   :  { %10188 = vst [vmem:[#allocation14_spill] sm:$0xff] %v6060_v7  ;;  %v5774_v7 = vld [vmem:[#allocation2 + $0x1c8] sm:$0xff] }
  0xec   :  { %1719 = vmatmul.bf16.gmra.mxu0 %v5729_v35  ;;  %1879 = vmatmul.bf16.gmra.mxu1 %v5761_v8  ;;  %v5790_v8 = vld [vmem:[#allocation2 + $0x248] sm:$0xff] }
  0xed   :  { %2024 = vmatmul.bf16.gmra.mxu2 %v5790_v8  ;;  %v5767_v8 = vld [vmem:[#allocation2 + $0x190] sm:$0xff] }
  0xf1   :  { %v6022_v37 = vpop.f32.mrf.mxu0  ;;  %v6064_v11 = vpop.f32.mrf.mxu1 }
  0xf2   :  { %10189 = vst [vmem:[#allocation15_spill] sm:$0xff] %v6064_v11 }
  0xf9   :  { %v6024_v40 = vpop.f32.mrf.mxu0  ;;  %v6068_v14 = vpop.f32.mrf.mxu1 }
  0xfa   :  { %10190 = vst [vmem:[#allocation16_spill] sm:$0xff] %v6068_v14  ;;  %v5747_v14 = vld [vmem:[#allocation2 + $0xf0] sm:$0xff] }
  0xfc   :  { %1724 = vmatmul.bf16.gmra.mxu0 %v5730_v39  ;;  %1884 = vmatmul.bf16.gmra.mxu1 %v5762_v15  ;;  %v5764_v39 = vld [vmem:[#allocation2 + $0x178] sm:$0xff] }
 0x101   :  { %v6026_v42 = vpop.f32.mrf.mxu0  ;;  %v6072_v18 = vpop.f32.mrf.mxu1 }
 0x102   :  { %10191 = vst [vmem:[#allocation17_spill] sm:$0xff] %v6072_v18 }
 0x109   :  { %v6030_v46 = vpop.f32.mrf.mxu0  ;;  %v6076_v23 = vpop.f32.mrf.mxu1 }
 0x10a   :  { %10192 = vst [vmem:[#allocation18_spill] sm:$0xff] %v6076_v23 }
 0x10c   :  { %1729 = vmatmul.bf16.gmra.mxu0 %v5731_v45  ;;  %1889 = vmatmul.bf16.gmra.mxu1 %v5763_v26  ;;  %v5740_v26 = vld [vmem:[#allocation2 + $0xb8] sm:$0xff] }
 0x111   :  { %v6034_v49 = vpop.f32.mrf.mxu0  ;;  %v6080_v31 = vpop.f32.mrf.mxu1 }
 0x112   :  { %10193 = vst [vmem:[#allocation19_spill] sm:$0xff] %v6080_v31 }
 0x119   :  { %v6038_v53 = vpop.f32.mrf.mxu0  ;;  %v6084_v38 = vpop.f32.mrf.mxu1 }
 0x11a   :  { %10194 = vst [vmem:[#allocation20_spill] sm:$0xff] %v6084_v38 }
 0x11c   :  { %1734 = vmatmul.bf16.gmra.mxu0 %v5732_v52  ;;  %1894 = vmatmul.bf16.gmra.mxu1 %v5764_v39 }
 0x121   :  { %v6042_v56 = vpop.f32.mrf.mxu0  ;;  %v6088_v45 = vpop.f32.mrf.mxu1 }
 0x122   :  { %10195 = vst [vmem:[#allocation21_spill] sm:$0xff] %v6088_v45 }
 0x129   :  { %v6046_v60 = vpop.f32.mrf.mxu0  ;;  %v6092_v55 = vpop.f32.mrf.mxu1 }
 0x12a   :  { %10196 = vst [vmem:[#allocation22_spill] sm:$0xff] %v6092_v55 }
 0x12c   :  { %1739 = vmatmul.bf16.gmra.mxu0 %v5733_v59  ;;  %v5765_v59 = vld [vmem:[#allocation2 + $0x180] sm:$0xff] }
 0x12d   :  { %1899 = vmatmul.bf16.gmra.mxu1 %v5765_v59 }
 0x131   :  { %v6050_v63 = vpop.f32.mrf.mxu0 }
 0x139   :  { %v6054_v3 = vpop.f32.mrf.mxu0 }
 0x13c   :  { %1744 = vmatmul.bf16.gmra.mxu0 %v5734_v2  ;;  %v6098_v2 = vpop.f32.mrf.mxu1 }
 0x13d   :  { %10198 = vst [vmem:[#allocation24_spill] sm:$0xff] %v6098_v2  ;;  %1904 = vmatmul.bf16.gmra.mxu1 %v5766_v19 }
 0x141   :  { %v6058_v6 = vpop.f32.mrf.mxu0 }
 0x144   :  { %v6104_v15 = vpop.f32.mrf.mxu1 }
 0x145   :  { %10200 = vst [vmem:[#allocation26_spill] sm:$0xff] %v6104_v15 }
 0x149   :  { %v6062_v10 = vpop.f32.mrf.mxu0 }
 0x14c   :  { %1749 = vmatmul.bf16.gmra.mxu0 %v5735_v9  ;;  %v5814_v9 = vld [vmem:[#allocation2 + $0x308] sm:$0xff]  ;;  %v6110_v34 = vpop.f32.mrf.mxu1 }
 0x14d   :  { %2144 = vmatmul.bf16.gmra.mxu3 %v5814_v9  ;;  %10202 = vst [vmem:[#allocation28_spill] sm:$0xff] %v6110_v34  ;;  %1909 = vmatmul.bf16.gmra.mxu1 %v5767_v8  ;;  %v5741_v9 = vld [vmem:[#allocation2 + $0xc0] sm:$0xff]  ;;  %v5742_v8 = vld [vmem:[#allocation2 + $0xc8] sm:$0xff] }
 0x151   :  { %v6066_v13 = vpop.f32.mrf.mxu0 }
 0x154   :  { %v6116_v59 = vpop.f32.mrf.mxu1 }
 0x155   :  { %10204 = vst [vmem:[#allocation30_spill] sm:$0xff] %v6116_v59 }
 0x159   :  { %v6070_v17 = vpop.f32.mrf.mxu0 }
 0x15c   :  { %1754 = vmatmul.bf16.gmra.mxu0 %v5736_v16  ;;  %v6106_v16 = vpop.f32.mrf.mxu2 }
 0x15d   :  { %10201 = vst [vmem:[#allocation27_spill] sm:$0xff] %v6106_v16  ;;  %2149 = vmatmul.bf16.gmra.mxu3 %v5815_v48  ;;  %v6122_v16 = vpop.f32.mrf.mxu1 }
 0x15e   :  { %10206 = vst [vmem:[#allocation32_spill] sm:$0xff] %v6122_v16 }
 0x161   :  { %v6074_v22 = vpop.f32.mrf.mxu0 }
 0x164   :  { %v6112_v39 = vpop.f32.mrf.mxu2 }
 0x165   :  { %10203 = vst [vmem:[#allocation29_spill] sm:$0xff] %v6112_v39  ;;  %v5816_v39 = vld [vmem:[#allocation2 + $0x318] sm:$0xff]  ;;  %v6128_v48 = vpop.f32.mrf.mxu1 }
 0x166   :  { %10208 = vst [vmem:[#allocation34_spill] sm:$0xff] %v6128_v48 }
 0x169   :  { %v6078_v30 = vpop.f32.mrf.mxu0 }
 0x16c   :  { %1759 = vmatmul.bf16.gmra.mxu0 %v5737_v27 }
 0x16d   :  { %2154 = vmatmul.bf16.gmra.mxu3 %v5816_v39  ;;  %v6134_v34 = vpop.f32.mrf.mxu1 }
 0x16e   :  { %10210 = vst [vmem:[#allocation36_spill] sm:$0xff] %v6134_v34 }
 0x171   :  { %v6082_v35 = vpop.f32.mrf.mxu0 }
 0x179   :  { %v6086_v44 = vpop.f32.mrf.mxu0 }
 0x17c   :  { %1764 = vmatmul.bf16.gmra.mxu0 %v5738_v41  ;;  %v5791_v41 = vld [vmem:[#allocation2 + $0x250] sm:$0xff] }
 0x17d   :  { %2029 = vmatmul.bf16.gmra.mxu2 %v5791_v41 }
 0x181   :  { %v6090_v52 = vpop.f32.mrf.mxu0 }
 0x189   :  { %v6096_v1 = vpop.f32.mrf.mxu0 }
 0x18c   :  { %1769 = vmatmul.bf16.gmra.mxu0 %v5739_v62  ;;  %v6118_v62 = vpop.f32.mrf.mxu2 }
 0x18d   :  { %10205 = vst [vmem:[#allocation31_spill] sm:$0xff] %v6118_v62  ;;  %v5768_v62 = vld [vmem:[#allocation2 + $0x198] sm:$0xff] }
 0x18e   :  { %1914 = vmatmul.bf16.gmra.mxu1 %v5768_v62  ;;  %v5743_v62 = vld [vmem:[#allocation2 + $0xd0] sm:$0xff] }
 0x191   :  { %v6102_v12 = vpop.f32.mrf.mxu0 }
 0x194   :  { %v6124_v5 = vpop.f32.mrf.mxu2 }
 0x195   :  { %10207 = vst [vmem:[#allocation33_spill] sm:$0xff] %v6124_v5  ;;  %v5817_v5 = vld [vmem:[#allocation2 + $0x320] sm:$0xff] }
 0x196   :  { %2159 = vmatmul.bf16.gmra.mxu3 %v5817_v5 }
 0x199   :  { %v6108_v27 = vpop.f32.mrf.mxu0 }
 0x19c   :  { %1774 = vmatmul.bf16.gmra.mxu0 %v5740_v26  ;;  %v5792_v26 = vld [vmem:[#allocation2 + $0x258] sm:$0xff]  ;;  %v6130_v58 = vpop.f32.mrf.mxu2 }
 0x19d   :  { %2034 = vmatmul.bf16.gmra.mxu2 %v5792_v26  ;;  %10209 = vst [vmem:[#allocation35_spill] sm:$0xff] %v6130_v58  ;;  %v6140_v26 = vpop.f32.mrf.mxu1  ;;  %v5769_v58 = vld [vmem:[#allocation2 + $0x1a0] sm:$0xff] }
 0x19e   :  { %10212 = vst [vmem:[#allocation38_spill] sm:$0xff] %v6140_v26  ;;  %1919 = vmatmul.bf16.gmra.mxu1 %v5769_v58  ;;  %v5744_v58 = vld [vmem:[#allocation2 + $0xd8] sm:$0xff] }
 0x1a1   :  { %v6114_v51 = vpop.f32.mrf.mxu0 }
 0x1a4   :  { %v6136_v16 = vpop.f32.mrf.mxu2 }
 0x1a5   :  { %10211 = vst [vmem:[#allocation37_spill] sm:$0xff] %v6136_v16  ;;  %v6146_v2 = vpop.f32.mrf.mxu1  ;;  %v5818_v16 = vld [vmem:[#allocation2 + $0x328] sm:$0xff] }
 0x1a6   :  { %10214 = vst [vmem:[#allocation40_spill] sm:$0xff] %v6146_v2  ;;  %2164 = vmatmul.bf16.gmra.mxu3 %v5818_v16 }
 0x1a9   :  { %v6120_v19 = vpop.f32.mrf.mxu0 }
 0x1ac   :  { %1779 = vmatmul.bf16.gmra.mxu0 %v5741_v9  ;;  %v5793_v9 = vld [vmem:[#allocation2 + $0x260] sm:$0xff]  ;;  %v6142_v48 = vpop.f32.mrf.mxu2 }
 0x1ad   :  { %2039 = vmatmul.bf16.gmra.mxu2 %v5793_v9  ;;  %10213 = vst [vmem:[#allocation39_spill] sm:$0xff] %v6142_v48  ;;  %v6152_v9 = vpop.f32.mrf.mxu1  ;;  %v5770_v48 = vld [vmem:[#allocation2 + $0x1a8] sm:$0xff] }
 0x1ae   :  { %10216 = vst [vmem:[#allocation42_spill] sm:$0xff] %v6152_v9  ;;  %1924 = vmatmul.bf16.gmra.mxu1 %v5770_v48  ;;  %v5745_v48 = vld [vmem:[#allocation2 + $0xe0] sm:$0xff] }
 0x1b1   :  { %v6126_v41 = vpop.f32.mrf.mxu0 }
 0x1b4   :  { %v6148_v34 = vpop.f32.mrf.mxu2 }
 0x1b5   :  { %10215 = vst [vmem:[#allocation41_spill] sm:$0xff] %v6148_v34  ;;  %v6158_v45 = vpop.f32.mrf.mxu1  ;;  %v5819_v34 = vld [vmem:[#allocation2 + $0x330] sm:$0xff] }
 0x1b6   :  { %10218 = vst [vmem:[#allocation44_spill] sm:$0xff] %v6158_v45  ;;  %2169 = vmatmul.bf16.gmra.mxu3 %v5819_v34 }
 0x1b9   :  { %v6132_v59 = vpop.f32.mrf.mxu0 }
 0x1bc   :  { %1784 = vmatmul.bf16.gmra.mxu0 %v5742_v8  ;;  %v5794_v8 = vld [vmem:[#allocation2 + $0x268] sm:$0xff]  ;;  %v6154_v26 = vpop.f32.mrf.mxu2 }
 0x1bd   :  { %2044 = vmatmul.bf16.gmra.mxu2 %v5794_v8  ;;  %10217 = vst [vmem:[#allocation43_spill] sm:$0xff] %v6154_v26  ;;  %v6164_v8 = vpop.f32.mrf.mxu1  ;;  %v5771_v26 = vld [vmem:[#allocation2 + $0x1b0] sm:$0xff] }
 0x1be   :  { %10220 = vst [vmem:[#allocation46_spill] sm:$0xff] %v6164_v8  ;;  %1929 = vmatmul.bf16.gmra.mxu1 %v5771_v26  ;;  %v5746_v26 = vld [vmem:[#allocation2 + $0xe8] sm:$0xff] }
 0x1c1   :  { %v6138_v39 = vpop.f32.mrf.mxu0 }
 0x1c4   :  { %v6160_v2 = vpop.f32.mrf.mxu2 }
 0x1c5   :  { %10219 = vst [vmem:[#allocation45_spill] sm:$0xff] %v6160_v2  ;;  %v6170_v31 = vpop.f32.mrf.mxu1  ;;  %v5820_v2 = vld [vmem:[#allocation2 + $0x338] sm:$0xff] }
 0x1c6   :  { %10222 = vst [vmem:[#allocation48_spill] sm:$0xff] %v6170_v31  ;;  %2174 = vmatmul.bf16.gmra.mxu3 %v5820_v2 }
 0x1c9   :  { %v6144_v15 = vpop.f32.mrf.mxu0 }
 0x1cc   :  { %1789 = vmatmul.bf16.gmra.mxu0 %v5743_v62  ;;  %v5795_v62 = vld [vmem:[#allocation2 + $0x270] sm:$0xff]  ;;  %v6166_v9 = vpop.f32.mrf.mxu2 }
 0x1cd   :  { %2049 = vmatmul.bf16.gmra.mxu2 %v5795_v62  ;;  %10221 = vst [vmem:[#allocation47_spill] sm:$0xff] %v6166_v9  ;;  %v6176_v62 = vpop.f32.mrf.mxu1  ;;  %v5772_v9 = vld [vmem:[#allocation2 + $0x1b8] sm:$0xff] }
 0x1ce   :  { %10224 = vst [vmem:[#allocation50_spill] sm:$0xff] %v6176_v62  ;;  %1934 = vmatmul.bf16.gmra.mxu1 %v5772_v9  ;;  %v5773_v9 = vld [vmem:[#allocation2 + $0x1c0] sm:$0xff] }
 0x1d1   :  { %v6150_v5 = vpop.f32.mrf.mxu0 }
 0x1d4   :  { %v6172_v45 = vpop.f32.mrf.mxu2 }
 0x1d5   :  { %10223 = vst [vmem:[#allocation49_spill] sm:$0xff] %v6172_v45  ;;  %v6182_v18 = vpop.f32.mrf.mxu1  ;;  %v5821_v45 = vld [vmem:[#allocation2 + $0x340] sm:$0xff] }
 0x1d6   :  { %10226 = vst [vmem:[#allocation52_spill] sm:$0xff] %v6182_v18  ;;  %2179 = vmatmul.bf16.gmra.mxu3 %v5821_v45  ;;  %v5798_v45 = vld [vmem:[#allocation2 + $0x288] sm:$0xff] }
 0x1d9   :  { %v6156_v55 = vpop.f32.mrf.mxu0 }
 0x1dc   :  { %1794 = vmatmul.bf16.gmra.mxu0 %v5744_v58  ;;  %v5796_v58 = vld [vmem:[#allocation2 + $0x278] sm:$0xff]  ;;  %v6178_v8 = vpop.f32.mrf.mxu2 }
 0x1dd   :  { %2054 = vmatmul.bf16.gmra.mxu2 %v5796_v58  ;;  %10225 = vst [vmem:[#allocation51_spill] sm:$0xff] %v6178_v8  ;;  %v6188_v58 = vpop.f32.mrf.mxu1  ;;  %v6192_v8 = vpop.f32.mrf.mxu3 }
 0x1de   :  { %10228 = vst [vmem:[#allocation54_spill] sm:$0xff] %v6188_v58  ;;  %1939 = vmatmul.bf16.gmra.mxu1 %v5773_v9 }
 0x1df   :  { %10230 = vst [vmem:[#allocation56_spill] sm:$0xff] %v6192_v8 }
 0x1e1   :  { %v6162_v16 = vpop.f32.mrf.mxu0 }
 0x1e4   :  { %v6184_v31 = vpop.f32.mrf.mxu2 }
 0x1e5   :  { %10227 = vst [vmem:[#allocation53_spill] sm:$0xff] %v6184_v31  ;;  %v6196_v18 = vpop.f32.mrf.mxu1  ;;  %v6200_v31 = vpop.f32.mrf.mxu3 }
 0x1e6   :  { %10231 = vst [vmem:[#allocation57_spill] sm:$0xff] %v6196_v18  ;;  %v5748_v18 = vld [vmem:[#allocation2 + $0xf8] sm:$0xff] }
 0x1e7   :  { %10233 = vst [vmem:[#allocation59_spill] sm:$0xff] %v6200_v31 }
 0x1e9   :  { %v6168_v38 = vpop.f32.mrf.mxu0 }
 0x1ec   :  { %1799 = vmatmul.bf16.gmra.mxu0 %v5745_v48  ;;  %v5797_v48 = vld [vmem:[#allocation2 + $0x280] sm:$0xff]  ;;  %v6190_v62 = vpop.f32.mrf.mxu2 }
 0x1ed   :  { %2059 = vmatmul.bf16.gmra.mxu2 %v5797_v48  ;;  %10229 = vst [vmem:[#allocation55_spill] sm:$0xff] %v6190_v62  ;;  %v5822_v48 = vld [vmem:[#allocation2 + $0x348] sm:$0xff]  ;;  %v6204_v62 = vpop.f32.mrf.mxu1  ;;  %v6208_v9 = vpop.f32.mrf.mxu3 }
 0x1ee   :  { %2184 = vmatmul.bf16.gmra.mxu3 %v5822_v48  ;;  %10234 = vst [vmem:[#allocation60_spill] sm:$0xff] %v6204_v62  ;;  %1944 = vmatmul.bf16.gmra.mxu1 %v5774_v7  ;;  %v5823_v48 = vld [vmem:[#allocation2 + $0x350] sm:$0xff] }
 0x1ef   :  { %10236 = vst [vmem:[#allocation62_spill] sm:$0xff] %v6208_v9 }
 0x1f1   :  { %v6174_v34 = vpop.f32.mrf.mxu0 }
 0x1f5   :  { %v6216_v31 = vpop.f32.mrf.mxu3 }
 0x1f6   :  { %10239 = vst [vmem:[#allocation65_spill] sm:$0xff] %v6216_v31 }
 0x1f9   :  { %v6180_v23 = vpop.f32.mrf.mxu0 }
 0x1fc   :  { %1804 = vmatmul.bf16.gmra.mxu0 %v5746_v26  ;;  %v6198_v26 = vpop.f32.mrf.mxu2 }
 0x1fd   :  { %10232 = vst [vmem:[#allocation58_spill] sm:$0xff] %v6198_v26  ;;  %2064 = vmatmul.bf16.gmra.mxu2 %v5798_v45  ;;  %v6212_v26 = vpop.f32.mrf.mxu1  ;;  %v5799_v45 = vld [vmem:[#allocation2 + $0x290] sm:$0xff]  ;;  %v6224_v7 = vpop.f32.mrf.mxu3 }
 0x1fe   :  { %10237 = vst [vmem:[#allocation63_spill] sm:$0xff] %v6212_v26  ;;  %2189 = vmatmul.bf16.gmra.mxu3 %v5823_v48  ;;  %1949 = vmatmul.bf16.gmra.mxu1 %v5775_v0  ;;  %v5800_v26 = vld [vmem:[#allocation2 + $0x298] sm:$0xff] }
 0x1ff   :  { %10242 = vst [vmem:[#allocation68_spill] sm:$0xff] %v6224_v7 }
 0x201   :  { %v6186_v2 = vpop.f32.mrf.mxu0 }
 0x204   :  { %v6206_v8 = vpop.f32.mrf.mxu2 }
 0x205   :  { %10235 = vst [vmem:[#allocation61_spill] sm:$0xff] %v6206_v8  ;;  %v6220_v8 = vpop.f32.mrf.mxu1 }
 0x206   :  { %10240 = vst [vmem:[#allocation66_spill] sm:$0xff] %v6220_v8  ;;  %v6255_v8 = vpop.f32.mrf.mxu3 }
 0x209   :  { %v6194_v11 = vpop.f32.mrf.mxu0 }
 0x20c   :  { %1809 = vmatmul.bf16.gmra.mxu0 %v5747_v14  ;;  %v6214_v14 = vpop.f32.mrf.mxu2 }
 0x20d   :  { %10238 = vst [vmem:[#allocation64_spill] sm:$0xff] %v6214_v14  ;;  %2069 = vmatmul.bf16.gmra.mxu2 %v5799_v45  ;;  %v6229_v14 = vld [vmem:[%s9760_s2] ss:$0 sm:$0xff]  ;;  %v6245_v31 = vpop.f32.mrf.mxu1 }
 0x20e   :  { %v6237_v45 = vadd.f32 %v6229_v14, %v6004_v20  ;;  %v6241_v48 = vadd.f32 %v6229_v14, %v6008_v24  ;;  %10246 = vst [vmem:[#allocation72_spill] sm:$0xff] %v6245_v31  ;;  %v6251_v0 = vadd.f32 %v6229_v14, %v6010_v25  ;;  %v6260_v24 = vadd.f32 %v6229_v14, %v6012_v28 }
 0x20f   :  { %2194 = vmatmul.bf16.gmra.mxu3 %v5824_v61  ;;  %v5776_v61 = vld [vmem:[#allocation2 + $0x1d8] sm:$0xff] }
 0x210   :  { %10244 = vst [vmem:[#allocation70_spill] sm:$0xff] %v6237_v45  ;;  %1954 = vmatmul.bf16.gmra.mxu1 %v5776_v61  ;;  %v6307_v61 = vadd.f32 %v6229_v14, %v6026_v42 }
 0x211   :  { %v6202_v58 = vpop.f32.mrf.mxu0  ;;  %10245 = vst [vmem:[#allocation71_spill] sm:$0xff] %v6241_v48 }
 0x212   :  { %10247 = vst [vmem:[#allocation73_spill] sm:$0xff] %v6251_v0 }
 0x213   :  { %10248 = vst [vmem:[#allocation74_spill] sm:$0xff] %v6260_v24 }
 0x214   :  { %v6222_v9 = vpop.f32.mrf.mxu2  ;;  %10255 = vst [vmem:[#allocation81_spill] sm:$0xff] %v6307_v61 }
 0x215   :  { %10241 = vst [vmem:[#allocation67_spill] sm:$0xff] %v6222_v9  ;;  %v6274_v28 = vpop.f32.mrf.mxu1 }
 0x219   :  { %v6210_v4 = vpop.f32.mrf.mxu0 }
 0x21c   :  { %1814 = vmatmul.bf16.gmra.mxu0 %v5748_v18  ;;  %v6233_v18 = vadd.f32 %v6229_v14, %v6006_v21  ;;  %v6253_v21 = vpop.f32.mrf.mxu2 }
 0x21d   :  { %2074 = vmatmul.bf16.gmra.mxu2 %v5800_v26  ;;  %v6283_v26 = vpop.f32.mrf.mxu3 }
 0x21e   :  { %10243 = vst [vmem:[#allocation69_spill] sm:$0xff] %v6233_v18  ;;  %v3331_v9 = vadd.f32 %v6233_v18, %v6237_v45  ;;  %v6265_v18 = vadd.f32 %v6229_v14, %v6014_v29  ;;  %v6270_v45 = vadd.f32 %v6229_v14, %v6016_v32  ;;  %v6288_v32 = vadd.f32 %v6229_v14, %v6020_v36 }
 0x220   :  { %v3332_v20 = vadd.f32 %v3331_v9, %v6241_v48  ;;  %10249 = vst [vmem:[#allocation75_spill] sm:$0xff] %v6265_v18 }
 0x221   :  { %v6218_v62 = vpop.f32.mrf.mxu0  ;;  %10250 = vst [vmem:[#allocation76_spill] sm:$0xff] %v6270_v45 }
 0x222   :  { %v3333_v31 = vadd.f32 %v3332_v20, %v6251_v0  ;;  %v6279_v20 = vadd.f32 %v6229_v14, %v6018_v33  ;;  %10252 = vst [vmem:[#allocation78_spill] sm:$0xff] %v6288_v32 }
 0x224   :  { %v3334_v25 = vadd.f32 %v3333_v31, %v6260_v24  ;;  %10251 = vst [vmem:[#allocation77_spill] sm:$0xff] %v6279_v20  ;;  %v6281_v29 = vpop.f32.mrf.mxu2 }
 0x226   :  { %v3335_v48 = vadd.f32 %v3334_v25, %v6265_v18  ;;  %v6293_v25 = vadd.f32 %v6229_v14, %v6022_v37  ;;  %v6298_v18 = vadd.f32 %v6229_v14, %v6024_v40  ;;  %v6311_v37 = vpop.f32.mrf.mxu3  ;;  %v6316_v40 = vadd.f32 %v6229_v14, %v6030_v46 }
 0x228   :  { %v3336_v31 = vadd.f32 %v3335_v48, %v6270_v45  ;;  %10253 = vst [vmem:[#allocation79_spill] sm:$0xff] %v6293_v25  ;;  %v6302_v48 = vpop.f32.mrf.mxu1 }
 0x229   :  { %v6243_v7 = vpop.f32.mrf.mxu0  ;;  %10254 = vst [vmem:[#allocation80_spill] sm:$0xff] %v6298_v18 }
 0x22a   :  { %v3337_v24 = vadd.f32 %v3336_v31, %v6279_v20  ;;  %10256 = vst [vmem:[#allocation82_spill] sm:$0xff] %v6316_v40  ;;  %v5825_v20 = vld [vmem:[#allocation2 + $0x360] sm:$0xff] }
 0x22b   :  { %2199 = vmatmul.bf16.gmra.mxu3 %v5825_v20  ;;  %v5777_v20 = vld [vmem:[#allocation2 + $0x1e0] sm:$0xff] }
 0x22c   :  { %v3338_v33 = vadd.f32 %v3337_v24, %v6288_v32  ;;  %v6309_v31 = vpop.f32.mrf.mxu2  ;;  %v5801_v32 = vld [vmem:[#allocation2 + $0x2a0] sm:$0xff]  ;;  %1959 = vmatmul.bf16.gmra.mxu1 %v5777_v20  ;;  %v6363_v20 = vadd.f32 %v6229_v14, %v6058_v6 }
 0x22d   :  { %2079 = vmatmul.bf16.gmra.mxu2 %v5801_v32 }
 0x22e   :  { %v3339_v36 = vadd.f32 %v3338_v33, %v6293_v25  ;;  %v6321_v33 = vadd.f32 %v6229_v14, %v6034_v49  ;;  %v6326_v25 = vadd.f32 %v6229_v14, %v6038_v53  ;;  %v6339_v32 = vpop.f32.mrf.mxu3  ;;  %v6344_v53 = vadd.f32 %v6229_v14, %v6046_v60  ;;  %10263 = vst [vmem:[#allocation89_spill] sm:$0xff] %v6363_v20 }
 0x230   :  { %v3340_v24 = vadd.f32 %v3339_v36, %v6298_v18  ;;  %10257 = vst [vmem:[#allocation83_spill] sm:$0xff] %v6321_v33  ;;  %v6330_v46 = vpop.f32.mrf.mxu1 }
 0x231   :  { %v6272_v9 = vpop.f32.mrf.mxu0  ;;  %10258 = vst [vmem:[#allocation84_spill] sm:$0xff] %v6326_v25 }
 0x232   :  { %v3341_v45 = vadd.f32 %v3340_v24, %v6307_v61  ;;  %v6335_v24 = vadd.f32 %v6229_v14, %v6042_v56  ;;  %10260 = vst [vmem:[#allocation86_spill] sm:$0xff] %v6344_v53 }
 0x234   :  { %v3342_v42 = vadd.f32 %v3341_v45, %v6316_v40  ;;  %10259 = vst [vmem:[#allocation85_spill] sm:$0xff] %v6335_v24  ;;  %v6337_v49 = vpop.f32.mrf.mxu2 }
 0x236   :  { %v3343_v18 = vadd.f32 %v3342_v42, %v6321_v33  ;;  %v6349_v42 = vadd.f32 %v6229_v14, %v6050_v63  ;;  %v6354_v33 = vadd.f32 %v6229_v14, %v6054_v3  ;;  %v6367_v63 = vpop.f32.mrf.mxu3  ;;  %v6372_v3 = vadd.f32 %v6229_v14, %v6062_v10 }
 0x237   :  { %10264 = vst [vmem:[#allocation90_spill] sm:$0xff] %v6367_v63 }
 0x238   :  { %v3344_v45 = vadd.f32 %v3343_v18, %v6326_v25  ;;  %10261 = vst [vmem:[#allocation87_spill] sm:$0xff] %v6349_v42  ;;  %v6358_v18 = vpop.f32.mrf.mxu1 }
 0x239   :  { %v6300_v0 = vpop.f32.mrf.mxu0  ;;  %10262 = vst [vmem:[#allocation88_spill] sm:$0xff] %v6354_v33 }
 0x23a   :  { %v3345_v40 = vadd.f32 %v3344_v45, %v6335_v24  ;;  %10265 = vst [vmem:[#allocation91_spill] sm:$0xff] %v6372_v3  ;;  %v5826_v24 = vld [vmem:[#allocation2 + $0x368] sm:$0xff] }
 0x23b   :  { %2204 = vmatmul.bf16.gmra.mxu3 %v5826_v24  ;;  %v5778_v24 = vld [vmem:[#allocation2 + $0x1e8] sm:$0xff] }
 0x23c   :  { %v3346_v56 = vadd.f32 %v3345_v40, %v6344_v53  ;;  %v6365_v45 = vpop.f32.mrf.mxu2  ;;  %v5802_v53 = vld [vmem:[#allocation2 + $0x2a8] sm:$0xff]  ;;  %1964 = vmatmul.bf16.gmra.mxu1 %v5778_v24  ;;  %v6419_v24 = vadd.f32 %v6229_v14, %v6090_v52 }
 0x23d   :  { %2084 = vmatmul.bf16.gmra.mxu2 %v5802_v53 }
 0x23e   :  { %v3347_v60 = vadd.f32 %v3346_v56, %v6349_v42  ;;  %v6377_v56 = vadd.f32 %v6229_v14, %v6066_v13  ;;  %v6382_v42 = vadd.f32 %v6229_v14, %v6070_v17  ;;  %v6395_v53 = vpop.f32.mrf.mxu3  ;;  %v6400_v17 = vadd.f32 %v6229_v14, %v6078_v30  ;;  %10273 = vst [vmem:[#allocation99_spill] sm:$0xff] %v6419_v24 }
 0x23f   :  { %10269 = vst [vmem:[#allocation95_spill] sm:$0xff] %v6395_v53 }
 0x240   :  { %v3348_v40 = vadd.f32 %v3347_v60, %v6354_v33  ;;  %10266 = vst [vmem:[#allocation92_spill] sm:$0xff] %v6377_v56  ;;  %v6386_v10 = vpop.f32.mrf.mxu1 }
 0x241   :  { %v6328_v36 = vpop.f32.mrf.mxu0  ;;  %10267 = vst [vmem:[#allocation93_spill] sm:$0xff] %v6382_v42 }
 0x242   :  { %v3349_v25 = vadd.f32 %v3348_v40, %v6363_v20  ;;  %v6391_v40 = vadd.f32 %v6229_v14, %v6074_v22  ;;  %10270 = vst [vmem:[#allocation96_spill] sm:$0xff] %v6400_v17 }
 0x244   :  { %v3350_v6 = vadd.f32 %v3349_v25, %v6372_v3  ;;  %10268 = vst [vmem:[#allocation94_spill] sm:$0xff] %v6391_v40  ;;  %v6393_v13 = vpop.f32.mrf.mxu2 }
 0x246   :  { %v3351_v33 = vadd.f32 %v3350_v6, %v6377_v56  ;;  %v6405_v6 = vadd.f32 %v6229_v14, %v6082_v35  ;;  %v6410_v56 = vadd.f32 %v6229_v14, %v6086_v44  ;;  %v6423_v35 = vpop.f32.mrf.mxu3  ;;  %v6428_v44 = vadd.f32 %v6229_v14, %v6096_v1 }
 0x247   :  { %10274 = vst [vmem:[#allocation100_spill] sm:$0xff] %v6423_v35 }
 0x248   :  { %v3352_v25 = vadd.f32 %v3351_v33, %v6382_v42  ;;  %10271 = vst [vmem:[#allocation97_spill] sm:$0xff] %v6405_v6  ;;  %v6414_v33 = vpop.f32.mrf.mxu1 }
 0x249   :  { %v6356_v61 = vpop.f32.mrf.mxu0  ;;  %10272 = vst [vmem:[#allocation98_spill] sm:$0xff] %v6410_v56 }
 0x24a   :  { %v3353_v3 = vadd.f32 %v3352_v25, %v6391_v40  ;;  %10275 = vst [vmem:[#allocation101_spill] sm:$0xff] %v6428_v44  ;;  %v5827_v40 = vld [vmem:[#allocation2 + $0x370] sm:$0xff] }
 0x24b   :  { %2209 = vmatmul.bf16.gmra.mxu3 %v5827_v40  ;;  %v5779_v40 = vld [vmem:[#allocation2 + $0x1f0] sm:$0xff] }
 0x24c   :  { %v3354_v22 = vadd.f32 %v3353_v3, %v6400_v17  ;;  %v6421_v25 = vpop.f32.mrf.mxu2  ;;  %v5803_v17 = vld [vmem:[#allocation2 + $0x2b0] sm:$0xff]  ;;  %1969 = vmatmul.bf16.gmra.mxu1 %v5779_v40  ;;  %v6475_v40 = vadd.f32 %v6229_v14, %v6138_v39 }
 0x24d   :  { %2089 = vmatmul.bf16.gmra.mxu2 %v5803_v17 }
 0x24e   :  { %v3355_v30 = vadd.f32 %v3354_v22, %v6405_v6  ;;  %v6433_v22 = vadd.f32 %v6229_v14, %v6102_v12  ;;  %v6438_v6 = vadd.f32 %v6229_v14, %v6108_v27  ;;  %v6451_v17 = vpop.f32.mrf.mxu3  ;;  %v6456_v27 = vadd.f32 %v6229_v14, %v6120_v19  ;;  %10283 = vst [vmem:[#allocation109_spill] sm:$0xff] %v6475_v40 }
 0x24f   :  { %10279 = vst [vmem:[#allocation105_spill] sm:$0xff] %v6451_v17  ;;  %v10375_v17 = vld [vmem:[#allocation46_spill] sm:$0xff] }
 0x250   :  { %v3356_v3 = vadd.f32 %v3355_v30, %v6410_v56  ;;  %10276 = vst [vmem:[#allocation102_spill] sm:$0xff] %v6433_v22  ;;  %v6442_v1 = vpop.f32.mrf.mxu1 }
 0x251   :  { %v6384_v60 = vpop.f32.mrf.mxu0  ;;  %10277 = vst [vmem:[#allocation103_spill] sm:$0xff] %v6438_v6 }
 0x252   :  { %v3357_v42 = vadd.f32 %v3356_v3, %v6419_v24  ;;  %v6447_v3 = vadd.f32 %v6229_v14, %v6114_v51  ;;  %10280 = vst [vmem:[#allocation106_spill] sm:$0xff] %v6456_v27 }
 0x254   :  { %v3358_v52 = vadd.f32 %v3357_v42, %v6428_v44  ;;  %10278 = vst [vmem:[#allocation104_spill] sm:$0xff] %v6447_v3  ;;  %v6449_v12 = vpop.f32.mrf.mxu2 }
 0x256   :  { %v3359_v56 = vadd.f32 %v3358_v52, %v6433_v22  ;;  %v6461_v52 = vadd.f32 %v6229_v14, %v6126_v41  ;;  %v6466_v22 = vadd.f32 %v6229_v14, %v6132_v59  ;;  %v6479_v41 = vpop.f32.mrf.mxu3  ;;  %v6484_v59 = vadd.f32 %v6229_v14, %v6144_v15 }
 0x257   :  { %10284 = vst [vmem:[#allocation110_spill] sm:$0xff] %v6479_v41  ;;  %v5835_v41 = vld [vmem:[#allocation2 + $0x3b0] sm:$0xff] }
 0x258   :  { %v3360_v42 = vadd.f32 %v3359_v56, %v6438_v6  ;;  %10281 = vst [vmem:[#allocation107_spill] sm:$0xff] %v6461_v52  ;;  %v6470_v56 = vpop.f32.mrf.mxu1 }
 0x259   :  { %v6412_v20 = vpop.f32.mrf.mxu0  ;;  %10282 = vst [vmem:[#allocation108_spill] sm:$0xff] %v6466_v22 }
 0x25a   :  { %v3361_v44 = vadd.f32 %v3360_v42, %v6447_v3  ;;  %10285 = vst [vmem:[#allocation111_spill] sm:$0xff] %v6484_v59  ;;  %v5828_v3 = vld [vmem:[#allocation2 + $0x378] sm:$0xff] }
 0x25b   :  { %2214 = vmatmul.bf16.gmra.mxu3 %v5828_v3 }
 0x25c   :  { %v3362_v51 = vadd.f32 %v3361_v44, %v6456_v27  ;;  %v6477_v42 = vpop.f32.mrf.mxu2  ;;  %v5804_v27 = vld [vmem:[#allocation2 + $0x2b8] sm:$0xff] }
 0x25d   :  { %2094 = vmatmul.bf16.gmra.mxu2 %v5804_v27 }
 0x25e   :  { %v3363_v19 = vadd.f32 %v3362_v51, %v6461_v52  ;;  %v6489_v51 = vadd.f32 %v6229_v14, %v6150_v5  ;;  %v6494_v52 = vadd.f32 %v6229_v14, %v6156_v55  ;;  %v5780_v5 = vld [vmem:[#allocation2 + $0x1f8] sm:$0xff]  ;;  %v6512_v55 = vpop.f32.mrf.mxu3 }
 0x25f   :  { %10290 = vst [vmem:[#allocation116_spill] sm:$0xff] %v6512_v55  ;;  %1974 = vmatmul.bf16.gmra.mxu1 %v5780_v5  ;;  %v10364_v55 = vld [vmem:[#allocation36_spill] sm:$0xff] }
 0x260   :  { %v3364_v44 = vadd.f32 %v3363_v19, %v6466_v22  ;;  %10286 = vst [vmem:[#allocation112_spill] sm:$0xff] %v6489_v51  ;;  %v6501_v22 = vadd.f32 %v6229_v14, %v6162_v16  ;;  %v6517_v16 = vadd.f32 %v6229_v14, %v6174_v34  ;;  %v6534_v34 = vadd.f32 %v6229_v14, %v6194_v11 }
 0x261   :  { %v6440_v30 = vpop.f32.mrf.mxu0  ;;  %10287 = vst [vmem:[#allocation113_spill] sm:$0xff] %v6494_v52  ;;  %v6548_v11 = vadd.f32 %v6229_v14, %v6210_v4  ;;  %v6565_v4 = vadd.f32 %v6229_v14, %v6272_v9 }
 0x262   :  { %v3365_v6 = vadd.f32 %v3364_v44, %v6475_v40  ;;  %10288 = vst [vmem:[#allocation114_spill] sm:$0xff] %v6501_v22  ;;  %v6505_v40 = vpop.f32.mrf.mxu1 }
 0x263   :  { %10291 = vst [vmem:[#allocation117_spill] sm:$0xff] %v6517_v16 }
 0x264   :  { %v3366_v39 = vadd.f32 %v3365_v6, %v6484_v59  ;;  %v6503_v44 = vpop.f32.mrf.mxu2  ;;  %v6510_v6 = vadd.f32 %v6229_v14, %v6168_v38  ;;  %v6527_v38 = vadd.f32 %v6229_v14, %v6186_v2  ;;  %10294 = vst [vmem:[#allocation120_spill] sm:$0xff] %v6534_v34 }
 0x265   :  { %10297 = vst [vmem:[#allocation123_spill] sm:$0xff] %v6548_v11 }
 0x266   :  { %v3367_v15 = vadd.f32 %v3366_v39, %v6489_v51  ;;  %10289 = vst [vmem:[#allocation115_spill] sm:$0xff] %v6510_v6  ;;  %v6522_v51 = vadd.f32 %v6229_v14, %v6180_v23  ;;  %v6543_v2 = vpop.f32.mrf.mxu3 }
 0x267   :  { %10293 = vst [vmem:[#allocation119_spill] sm:$0xff] %v6527_v38 }
 0x268   :  { %v3368_v3 = vadd.f32 %v3367_v15, %v6494_v52  ;;  %10292 = vst [vmem:[#allocation118_spill] sm:$0xff] %v6522_v51 }
 0x269   :  { %v6468_v24 = vpop.f32.mrf.mxu0  ;;  %10296 = vst [vmem:[#allocation122_spill] sm:$0xff] %v6543_v2 }
 0x26a   :  { %v3369_v27 = vadd.f32 %v3368_v3, %v6501_v22  ;;  %v6536_v22 = vpop.f32.mrf.mxu1  ;;  %10300 = vst [vmem:[#allocation126_spill] sm:$0xff] %v6565_v4 }
 0x26c   :  { %v3370_v39 = vadd.f32 %v3369_v27, %v6510_v6  ;;  %v6529_v5 = vpop.f32.mrf.mxu2  ;;  %v5805_v27 = vld [vmem:[#allocation2 + $0x2c0] sm:$0xff] }
 0x26d   :  { %v5829_v6 = vld [vmem:[#allocation2 + $0x380] sm:$0xff]  ;;  %2099 = vmatmul.bf16.gmra.mxu2 %v5805_v27 }
 0x26e   :  { %v3371_v52 = vadd.f32 %v3370_v39, %v6517_v16  ;;  %v6541_v39 = vadd.f32 %v6229_v14, %v6202_v58  ;;  %2219 = vmatmul.bf16.gmra.mxu3 %v5829_v6  ;;  %v6560_v6 = vadd.f32 %v6229_v14, %v6243_v7 }
 0x270   :  { %v3372_v3 = vadd.f32 %v3371_v52, %v6522_v51  ;;  %10295 = vst [vmem:[#allocation121_spill] sm:$0xff] %v6541_v39 }
 0x271   :  { %v6496_v19 = vpop.f32.mrf.mxu0  ;;  %10299 = vst [vmem:[#allocation125_spill] sm:$0xff] %v6560_v6 }
 0x272   :  { %v3373_v23 = vadd.f32 %v3372_v3, %v6527_v38  ;;  %v6553_v3 = vadd.f32 %v6229_v14, %v6218_v62  ;;  %v6572_v62 = vadd.f32 %v6229_v14, %v6300_v0  ;;  %v5830_v0 = vld [vmem:[#allocation2 + $0x388] sm:$0xff] }
 0x274   :  { %v3374_v52 = vadd.f32 %v3373_v23, %v6534_v34  ;;  %10298 = vst [vmem:[#allocation124_spill] sm:$0xff] %v6553_v3  ;;  %v6555_v38 = vpop.f32.mrf.mxu2  ;;  %v6567_v23 = vpop.f32.mrf.mxu1  ;;  %v6591_v34 = vadd.f32 %v6229_v14, %v6384_v60 }
 0x275   :  { %10301 = vst [vmem:[#allocation127_spill] sm:$0xff] %v6572_v62 }
 0x276   :  { %v3375_v16 = vadd.f32 %v3374_v52, %v6541_v39  ;;  %v6574_v39 = vpop.f32.mrf.mxu3  ;;  %10305 = vst [vmem:[#allocation131_spill] sm:$0xff] %v6591_v34 }
 0x277   :  { %10302 = vst [vmem:[#allocation128_spill] sm:$0xff] %v6574_v39  ;;  %v10357_v39 = vld [vmem:[#allocation30_spill] sm:$0xff] }
 0x278   :  { %v3376_v58 = vadd.f32 %v3375_v16, %v6548_v11 }
 0x279   :  { %v1805_v15 = vpop.f32.mrf.mxu0 }
 0x27a   :  { %v3377_v27 = vadd.f32 %v3376_v58, %v6553_v3  ;;  %v6579_v58 = vadd.f32 %v6229_v14, %v6328_v36 }
 0x27c   :  { %v3378_v52 = vadd.f32 %v3377_v27, %v6560_v6  ;;  %10303 = vst [vmem:[#allocation129_spill] sm:$0xff] %v6579_v58  ;;  %v6581_v3 = vpop.f32.mrf.mxu2  ;;  %v6586_v27 = vadd.f32 %v6229_v14, %v6356_v61  ;;  %v5806_v6 = vld [vmem:[#allocation2 + $0x2c8] sm:$0xff] }
 0x27d   :  { %2104 = vmatmul.bf16.gmra.mxu2 %v5806_v6 }
 0x27e   :  { %v3379_v7 = vadd.f32 %v3378_v52, %v6565_v4  ;;  %10304 = vst [vmem:[#allocation130_spill] sm:$0xff] %v6586_v27  ;;  %2224 = vmatmul.bf16.gmra.mxu3 %v5830_v0  ;;  %v6596_v52 = vadd.f32 %v6229_v14, %v6412_v20  ;;  %v6617_v0 = vadd.f32 %v6229_v14, %v6496_v19 }
 0x280   :  { %v3380_v9 = vadd.f32 %v3379_v7, %v6572_v62  ;;  %10306 = vst [vmem:[#allocation132_spill] sm:$0xff] %v6596_v52  ;;  %v6598_v62 = vpop.f32.mrf.mxu1 }
 0x281   :  { %v1807_v51 = vpop.f32.mrf.mxu0  ;;  %10310 = vst [vmem:[#allocation136_spill] sm:$0xff] %v6617_v0 }
 0x282   :  { %v3381_v11 = vadd.f32 %v3380_v9, %v6579_v58  ;;  %v6603_v9 = vadd.f32 %v6229_v14, %v6440_v30  ;;  %v6605_v58 = vpop.f32.mrf.mxu3  ;;  %v6621_v30 = vadd.f32 %v6229_v14, %v1805_v15  ;;  %v5831_v15 = vld [vmem:[#allocation2 + $0x390] sm:$0xff] }
 0x283   :  { %10308 = vst [vmem:[#allocation134_spill] sm:$0xff] %v6605_v58  ;;  %v5834_v58 = vld [vmem:[#allocation2 + $0x3a8] sm:$0xff] }
 0x284   :  { %v3382_v36 = vadd.f32 %v3381_v11, %v6586_v27  ;;  %10307 = vst [vmem:[#allocation133_spill] sm:$0xff] %v6603_v9  ;;  %v6607_v60 = vpop.f32.mrf.mxu2  ;;  %v6612_v11 = vadd.f32 %v6229_v14, %v6468_v24 }
 0x285   :  { %10311 = vst [vmem:[#allocation137_spill] sm:$0xff] %v6621_v30 }
 0x286   :  { %v3383_v61 = vadd.f32 %v3382_v36, %v6591_v34  ;;  %10309 = vst [vmem:[#allocation135_spill] sm:$0xff] %v6612_v11 }
 0x288   :  { %v3384_v6 = vadd.f32 %v3383_v61, %v6596_v52  ;;  %v6625_v61 = vadd.f32 %v6229_v14, %v1807_v51  ;;  %v6629_v24 = vpop.f32.mrf.mxu1 }
 0x289   :  { %v1810_v16 = vpop.f32.mrf.mxu0 }
 0x28a   :  { %v3385_v20 = vadd.f32 %v3384_v6, %v6603_v9  ;;  %10312 = vst [vmem:[#allocation138_spill] sm:$0xff] %v6625_v61  ;;  %v6633_v19 = vadd.f32 %v6229_v14, %v1810_v16  ;;  %v6635_v9 = vpop.f32.mrf.mxu3 }
 0x28b   :  { %10314 = vst [vmem:[#allocation140_spill] sm:$0xff] %v6635_v9  ;;  %v10346_v9 = vld [vmem:[#allocation21_spill] sm:$0xff] }
 0x28c   :  { %v3386_v36 = vadd.f32 %v3385_v20, %v6612_v11  ;;  %v6627_v52 = vpop.f32.mrf.mxu2  ;;  %10313 = vst [vmem:[#allocation139_spill] sm:$0xff] %v6633_v19  ;;  %v5807_v20 = vld [vmem:[#allocation2 + $0x2d0] sm:$0xff] }
 0x28d   :  { %2109 = vmatmul.bf16.gmra.mxu2 %v5807_v20  ;;  %v6663_v20 = vadd.f32 %v6229_v14, %v6032_v47  ;;  %v6680_v47 = vadd.f32 %v6229_v14, %v6044_v57 }
 0x28e   :  { %v3387_v27 = vadd.f32 %v3386_v36, %v6617_v0  ;;  %2229 = vmatmul.bf16.gmra.mxu3 %v5831_v15 }
 0x28f   :  { %10320 = vst [vmem:[#allocation146_spill] sm:$0xff] %v6663_v20 }
 0x290   :  { %v3388_v6 = vadd.f32 %v3387_v27, %v6621_v30  ;;  %10323 = vst [vmem:[#allocation149_spill] sm:$0xff] %v6680_v47 }
 0x291   :  { %v1812_v7 = vpop.f32.mrf.mxu0 }
 0x292   :  { %v3389_v11 = vadd.f32 %v3388_v6, %v6625_v61  ;;  %v6639_v36 = vadd.f32 %v6229_v14, %v1812_v7  ;;  %v6652_v6 = vpop.f32.mrf.mxu1  ;;  %v6656_v7 = vadd.f32 %v6229_v14, %v6028_v43  ;;  %v6675_v43 = vadd.f32 %v6229_v14, %v6040_v54  ;;  %v10338_v61 = vld [vmem:[#allocation17_spill] sm:$0xff] }
 0x294   :  { %10315 = vst [vmem:[#allocation141_spill] sm:$0xff] %v6639_v36  ;;  %v3390_v51 = vadd.f32 %v3389_v11, %v6633_v19  ;;  %v6646_v30 = vpop.f32.mrf.mxu2  ;;  %v10335_v19 = vld [vmem:[#allocation16_spill] sm:$0xff] }
 0x295   :  { %10318 = vst [vmem:[#allocation144_spill] sm:$0xff] %v6656_v7 }
 0x296   :  { %v3391_v16 = vadd.f32 %v3390_v51, %v6639_v36  ;;  %v6668_v51 = vadd.f32 %v6229_v14, %v6036_v50  ;;  %10322 = vst [vmem:[#allocation148_spill] sm:$0xff] %v6675_v43 }
 0x298   :  { %10321 = vst [vmem:[#allocation147_spill] sm:$0xff] %v6668_v51 }
 0x299   :  { %v1815_v34 = vpop.f32.mrf.mxu0 }
 0x29a   :  { %v6643_v0 = vadd.f32 %v6229_v14, %v1815_v34  ;;  %v6659_v34 = vpop.f32.mrf.mxu3  ;;  %v6683_v50 = vpop.f32.mrf.mxu1 }
 0x29b   :  { %10319 = vst [vmem:[#allocation145_spill] sm:$0xff] %v6659_v34 }
 0x29c   :  { %10316 = vst [vmem:[#allocation142_spill] sm:$0xff] %v6643_v0  ;;  %v3392_v4 = vadd.f32 %v3391_v16, %v6643_v0  ;;  %v6671_v16 = vpop.f32.mrf.mxu2  ;;  %v5832_v0 = vld [vmem:[#allocation2 + $0x398] sm:$0xff] }
 0x29e   :  { %2234 = vmatmul.bf16.gmra.mxu3 %v5832_v0 }
 0x2a1   :  { %v1817_v27 = vpop.f32.mrf.mxu0 }
 0x2a2   :  { %v6650_v59 = vadd.f32 %v6229_v14, %v1817_v27 }
 0x2a4   :  { %10317 = vst [vmem:[#allocation143_spill] sm:$0xff] %v6650_v59  ;;  %v3393_v11 = vadd.f32 %v3392_v4, %v6650_v59  ;;  %v5808_v59 = vld [vmem:[#allocation2 + $0x2d8] sm:$0xff]  ;;  %v6697_v36 = vpop.f32.mrf.mxu2 }
 0x2a5   :  { %2114 = vmatmul.bf16.gmra.mxu2 %v5808_v59  ;;  %v10329_v59 = vld [vmem:[#allocation13_spill] sm:$0xff] }
 0x2a6   :  { %v3394_v15 = vadd.f32 %v3393_v11, %v6656_v7  ;;  %v6690_v7 = vpop.f32.mrf.mxu3  ;;  %v6701_v0 = vadd.f32 %v6229_v14, %v10329_v59  ;;  %v6718_v59 = vadd.f32 %v6229_v14, %v10335_v19 }
 0x2a7   :  { %10326 = vst [vmem:[#allocation150_spill] sm:$0xff] %v6690_v7 }
 0x2a8   :  { %v3395_v27 = vadd.f32 %v3394_v15, %v6663_v20  ;;  %v10324_v15 = vld [vmem:[#allocation11_spill] sm:$0xff]  ;;  %10330 = vst [vmem:[#allocation13_spill] sm:$0xff] %v6701_v0 }
 0x2a9   :  { %v6687_v20 = vadd.f32 %v6229_v14, %v10324_v15  ;;  %v10331_v15 = vld [vmem:[#allocation14_spill] sm:$0xff]  ;;  %10336 = vst [vmem:[#allocation16_spill] sm:$0xff] %v6718_v59 }
 0x2aa   :  { %v3396_v4 = vadd.f32 %v3395_v27, %v6668_v51  ;;  %v10327_v27 = vld [vmem:[#allocation12_spill] sm:$0xff] }
 0x2ab   :  { %10325 = vst [vmem:[#allocation11_spill] sm:$0xff] %v6687_v20  ;;  %v6694_v51 = vadd.f32 %v6229_v14, %v10327_v27 }
 0x2ac   :  { %v3397_v11 = vadd.f32 %v3396_v4, %v6675_v43  ;;  %v6706_v43 = vadd.f32 %v6229_v14, %v10331_v15  ;;  %v6723_v15 = vpop.f32.mrf.mxu2 }
 0x2ad   :  { %10328 = vst [vmem:[#allocation12_spill] sm:$0xff] %v6694_v51 }
 0x2ae   :  { %v3398_v54 = vadd.f32 %v3397_v11, %v6680_v47  ;;  %10332 = vst [vmem:[#allocation14_spill] sm:$0xff] %v6706_v43  ;;  %v10333_v47 = vld [vmem:[#allocation15_spill] sm:$0xff] }
 0x2af   :  { %v6711_v27 = vadd.f32 %v6229_v14, %v10333_v47 }
 0x2b0   :  { %v3399_v57 = vadd.f32 %v3398_v54, %v6687_v20  ;;  %v6714_v20 = vpop.f32.mrf.mxu1 }
 0x2b1   :  { %10334 = vst [vmem:[#allocation15_spill] sm:$0xff] %v6711_v27 }
 0x2b2   :  { %v3400_v4 = vadd.f32 %v3399_v57, %v6694_v51  ;;  %v6721_v51 = vpop.f32.mrf.mxu3 }
 0x2b3   :  { %10337 = vst [vmem:[#allocation151_spill] sm:$0xff] %v6721_v51 }
 0x2b4   :  { %v3401_v11 = vadd.f32 %v3400_v4, %v6701_v0  ;;  %v6727_v4 = vadd.f32 %v6229_v14, %v10338_v61  ;;  %v5809_v0 = vld [vmem:[#allocation2 + $0x2e0] sm:$0xff]  ;;  %v10344_v61 = vld [vmem:[#allocation20_spill] sm:$0xff] }
 0x2b5   :  { %2119 = vmatmul.bf16.gmra.mxu2 %v5809_v0  ;;  %v6742_v34 = vadd.f32 %v6229_v14, %v10344_v61  ;;  %v6751_v0 = vadd.f32 %v6229_v14, %v10346_v9 }
 0x2b6   :  { %v3402_v54 = vadd.f32 %v3401_v11, %v6706_v43  ;;  %10339 = vst [vmem:[#allocation17_spill] sm:$0xff] %v6727_v4  ;;  %v5833_v11 = vld [vmem:[#allocation2 + $0x3a0] sm:$0xff]  ;;  %v10340_v43 = vld [vmem:[#allocation18_spill] sm:$0xff] }
 0x2b7   :  { %v6732_v7 = vadd.f32 %v6229_v14, %v10340_v43  ;;  %2239 = vmatmul.bf16.gmra.mxu3 %v5833_v11  ;;  %10345 = vst [vmem:[#allocation20_spill] sm:$0xff] %v6742_v34 }
 0x2b8   :  { %v3403_v57 = vadd.f32 %v3402_v54, %v6711_v27  ;;  %v10342_v54 = vld [vmem:[#allocation19_spill] sm:$0xff]  ;;  %v6747_v43 = vpop.f32.mrf.mxu1  ;;  %10347 = vst [vmem:[#allocation21_spill] sm:$0xff] %v6751_v0 }
 0x2b9   :  { %10341 = vst [vmem:[#allocation18_spill] sm:$0xff] %v6732_v7  ;;  %v6737_v27 = vadd.f32 %v6229_v14, %v10342_v54  ;;  %v10349_v54 = vld [vmem:[#allocation22_spill] sm:$0xff] }
 0x2ba   :  { %v3404_v47 = vadd.f32 %v3403_v57, %v6718_v59  ;;  %v6745_v59 = vpop.f32.mrf.mxu2  ;;  %v6754_v11 = vpop.f32.mrf.mxu3 }
 0x2bb   :  { %10343 = vst [vmem:[#allocation19_spill] sm:$0xff] %v6737_v27 }
 0x2bc   :  { %v3405_v19 = vadd.f32 %v3404_v47, %v6727_v4  ;;  %10348 = vst [vmem:[#allocation152_spill] sm:$0xff] %v6754_v11  ;;  %v10353_v4 = vld [vmem:[#allocation26_spill] sm:$0xff]  ;;  %v10355_v11 = vld [vmem:[#allocation28_spill] sm:$0xff] }
 0x2bd   :  { %v6768_v9 = vadd.f32 %v6229_v14, %v10353_v4 }
 0x2be   :  { %v3406_v51 = vadd.f32 %v3405_v19, %v6732_v7  ;;  %v6758_v19 = vadd.f32 %v6229_v14, %v10349_v54  ;;  %v10351_v7 = vld [vmem:[#allocation24_spill] sm:$0xff]  ;;  %v6775_v54 = vadd.f32 %v6229_v14, %v10355_v11 }
 0x2bf   :  { %10354 = vst [vmem:[#allocation26_spill] sm:$0xff] %v6768_v9 }
 0x2c0   :  { %v3407_v57 = vadd.f32 %v3406_v51, %v6737_v27  ;;  %10350 = vst [vmem:[#allocation22_spill] sm:$0xff] %v6758_v19  ;;  %v6763_v51 = vadd.f32 %v6229_v14, %v10351_v7  ;;  %v6778_v7 = vpop.f32.mrf.mxu1 }
 0x2c1   :  { %10356 = vst [vmem:[#allocation28_spill] sm:$0xff] %v6775_v54 }
 0x2c2   :  { %v3408_v47 = vadd.f32 %v3407_v57, %v6742_v34  ;;  %10352 = vst [vmem:[#allocation24_spill] sm:$0xff] %v6763_v51  ;;  %v6771_v34 = vpop.f32.mrf.mxu2 }
 0x2c4   :  { %v3409_v61 = vadd.f32 %v3408_v47, %v6751_v0  ;;  %v5810_v0 = vld [vmem:[#allocation2 + $0x2e8] sm:$0xff] }
 0x2c5   :  { %2124 = vmatmul.bf16.gmra.mxu2 %v5810_v0  ;;  %v10366_v0 = vld [vmem:[#allocation38_spill] sm:$0xff] }
 0x2c6   :  { %v3410_v27 = vadd.f32 %v3409_v61, %v6758_v19  ;;  %v6782_v61 = vadd.f32 %v6229_v14, %v10357_v39  ;;  %v6785_v19 = vpop.f32.mrf.mxu3 }
 0x2c7   :  { %10359 = vst [vmem:[#allocation153_spill] sm:$0xff] %v6785_v19  ;;  %2244 = vmatmul.bf16.gmra.mxu3 %v5834_v58 }
 0x2c8   :  { %v3411_v57 = vadd.f32 %v3410_v27, %v6763_v51  ;;  %10358 = vst [vmem:[#allocation30_spill] sm:$0xff] %v6782_v61  ;;  %v10360_v27 = vld [vmem:[#allocation32_spill] sm:$0xff] }
 0x2c9   :  { %v6789_v11 = vadd.f32 %v6229_v14, %v10360_v27  ;;  %v6806_v27 = vadd.f32 %v6229_v14, %v10366_v0 }
 0x2ca   :  { %v3412_v47 = vadd.f32 %v3411_v57, %v6768_v9  ;;  %v10362_v9 = vld [vmem:[#allocation34_spill] sm:$0xff]  ;;  %v6797_v39 = vpop.f32.mrf.mxu2 }
 0x2cb   :  { %10361 = vst [vmem:[#allocation32_spill] sm:$0xff] %v6789_v11  ;;  %v6794_v51 = vadd.f32 %v6229_v14, %v10362_v9  ;;  %v10368_v9 = vld [vmem:[#allocation40_spill] sm:$0xff] }
 0x2cc   :  { %v3413_v4 = vadd.f32 %v3412_v47, %v6775_v54  ;;  %v6801_v47 = vadd.f32 %v6229_v14, %v10364_v55  ;;  %10367 = vst [vmem:[#allocation38_spill] sm:$0xff] %v6806_v27  ;;  %v6813_v54 = vadd.f32 %v6229_v14, %v10368_v9  ;;  %v10371_v55 = vld [vmem:[#allocation42_spill] sm:$0xff]  ;;  %v5811_v9 = vld [vmem:[#allocation2 + $0x2f0] sm:$0xff] }
 0x2cd   :  { %10363 = vst [vmem:[#allocation34_spill] sm:$0xff] %v6794_v51  ;;  %v6820_v19 = vadd.f32 %v6229_v14, %v10371_v55  ;;  %v10377_v55 = vld [vmem:[#allocation48_spill] sm:$0xff] }
 0x2ce   :  { %v3414_v57 = vadd.f32 %v3413_v4, %v6782_v61  ;;  %10365 = vst [vmem:[#allocation36_spill] sm:$0xff] %v6801_v47  ;;  %v6809_v61 = vpop.f32.mrf.mxu1 }
 0x2cf   :  { %10369 = vst [vmem:[#allocation40_spill] sm:$0xff] %v6813_v54 }
 0x2d0   :  { %v3415_v2 = vadd.f32 %v3414_v57, %v6789_v11  ;;  %v6816_v11 = vpop.f32.mrf.mxu3  ;;  %10372 = vst [vmem:[#allocation42_spill] sm:$0xff] %v6820_v19 }
 0x2d1   :  { %10370 = vst [vmem:[#allocation154_spill] sm:$0xff] %v6816_v11  ;;  %v10379_v11 = vld [vmem:[#allocation50_spill] sm:$0xff] }
 0x2d2   :  { %v3416_v58 = vadd.f32 %v3415_v2, %v6794_v51  ;;  %v6823_v0 = vpop.f32.mrf.mxu2  ;;  %v10373_v51 = vld [vmem:[#allocation44_spill] sm:$0xff] }
 0x2d4   :  { %v3417_v4 = vadd.f32 %v3416_v58, %v6801_v47  ;;  %v6827_v58 = vadd.f32 %v6229_v14, %v10373_v51 }
 0x2d5   :  { %2129 = vmatmul.bf16.gmra.mxu2 %v5811_v9 }
 0x2d6   :  { %v3418_v57 = vadd.f32 %v3417_v4, %v6806_v27  ;;  %10374 = vst [vmem:[#allocation44_spill] sm:$0xff] %v6827_v58  ;;  %v6832_v4 = vadd.f32 %v6229_v14, %v10375_v17  ;;  %v6840_v51 = vpop.f32.mrf.mxu1 }
 0x2d7   :  { %2249 = vmatmul.bf16.gmra.mxu3 %v5835_v41 }
 0x2d8   :  { %v3419_v2 = vadd.f32 %v3418_v57, %v6813_v54  ;;  %10376 = vst [vmem:[#allocation46_spill] sm:$0xff] %v6832_v4  ;;  %v6837_v57 = vadd.f32 %v6229_v14, %v10377_v55  ;;  %v6847_v17 = vpop.f32.mrf.mxu3  ;;  %v10384_v55 = vld [vmem:[#allocation54_spill] sm:$0xff] }
 0x2d9   :  { %10381 = vst [vmem:[#allocation155_spill] sm:$0xff] %v6847_v17 }
 0x2da   :  { %v3420_v47 = vadd.f32 %v3419_v2, %v6820_v19  ;;  %10378 = vst [vmem:[#allocation48_spill] sm:$0xff] %v6837_v57  ;;  %v6844_v2 = vadd.f32 %v6229_v14, %v10379_v11  ;;  %v6849_v35 = vpop.f32.mrf.mxu2  ;;  %v10386_v11 = vld [vmem:[#allocation57_spill] sm:$0xff] }
 0x2dc   :  { %v3421_v27 = vadd.f32 %v3420_v47, %v6827_v58  ;;  %10380 = vst [vmem:[#allocation50_spill] sm:$0xff] %v6844_v2  ;;  %v10382_v47 = vld [vmem:[#allocation52_spill] sm:$0xff]  ;;  %v6863_v58 = vadd.f32 %v6229_v14, %v10386_v11 }
 0x2dd   :  { %v6853_v41 = vadd.f32 %v6229_v14, %v10382_v47 }
 0x2de   :  { %v3422_v54 = vadd.f32 %v3421_v27, %v6832_v4  ;;  %v6858_v27 = vadd.f32 %v6229_v14, %v10384_v55  ;;  %10387 = vst [vmem:[#allocation57_spill] sm:$0xff] %v6863_v58  ;;  %v10390_v55 = vld [vmem:[#allocation63_spill] sm:$0xff] }
 0x2df   :  { %10383 = vst [vmem:[#allocation52_spill] sm:$0xff] %v6853_v41 }
 0x2e0   :  { %v3423_v19 = vadd.f32 %v3422_v54, %v6837_v57  ;;  %10385 = vst [vmem:[#allocation54_spill] sm:$0xff] %v6858_v27  ;;  %v10388_v57 = vld [vmem:[#allocation60_spill] sm:$0xff]  ;;  %v6880_v11 = vpop.f32.mrf.mxu3 }
 0x2e1   :  { %v6868_v17 = vadd.f32 %v6229_v14, %v10388_v57  ;;  %10391 = vst [vmem:[#allocation63_spill] sm:$0xff] %v6880_v11 }
 0x2e2   :  { %v3424_v9 = vadd.f32 %v3423_v19, %v6844_v2  ;;  %v6871_v53 = vpop.f32.mrf.mxu2  ;;  %v6873_v19 = vpop.f32.mrf.mxu1  ;;  %v6877_v2 = vadd.f32 %v6229_v14, %v10390_v55 }
 0x2e3   :  { %10389 = vst [vmem:[#allocation60_spill] sm:$0xff] %v6868_v17 }
 0x2e4   :  { %v3425_v4 = vadd.f32 %v3424_v9, %v6853_v41  ;;  %v5812_v41 = vld [vmem:[#allocation2 + $0x2f8] sm:$0xff] }
 0x2e5   :  { %2134 = vmatmul.bf16.gmra.mxu2 %v5812_v41 }
 0x2e6   :  { %v3426_v54 = vadd.f32 %v3425_v4, %v6858_v27  ;;  %v5836_v4 = vld [vmem:[#allocation2 + $0x3b8] sm:$0xff] }
 0x2e7   :  { %v10392_v27 = vld [vmem:[#allocation66_spill] sm:$0xff]  ;;  %2254 = vmatmul.bf16.gmra.mxu3 %v5836_v4 }
 0x2e8   :  { %v3427_v47 = vadd.f32 %v3426_v54, %v6863_v58  ;;  %v6884_v57 = vadd.f32 %v6229_v14, %v10392_v27  ;;  %v10393_v58 = vld [vmem:[#allocation72_spill] sm:$0xff]  ;;  %v6901_v27 = vadd.f32 %v6229_v14, %v6302_v48  ;;  %v6918_v48 = vadd.f32 %v6229_v14, %v6386_v10 }
 0x2e9   :  { %v6889_v63 = vadd.f32 %v6229_v14, %v10393_v58  ;;  %v6906_v58 = vadd.f32 %v6229_v14, %v6330_v46  ;;  %v6923_v46 = vadd.f32 %v6229_v14, %v6414_v33 }
 0x2ea   :  { %v3428_v9 = vadd.f32 %v3427_v47, %v6868_v17  ;;  %v6894_v47 = vadd.f32 %v6229_v14, %v6274_v28  ;;  %v6897_v11 = vpop.f32.mrf.mxu2  ;;  %10396 = vst [vmem:[#allocation156_spill] sm:$0xff] %v6901_v27  ;;  %v6913_v28 = vadd.f32 %v6229_v14, %v6358_v18  ;;  %v6930_v18 = vadd.f32 %v6229_v14, %v6442_v1 }
 0x2eb   :  { %10394 = vst [vmem:[#allocation66_spill] sm:$0xff] %v6889_v63  ;;  %v6947_v1 = vadd.f32 %v6229_v14, %v6536_v22 }
 0x2ec   :  { %v3429_v54 = vadd.f32 %v3428_v9, %v6877_v2  ;;  %10395 = vst [vmem:[#allocation72_spill] sm:$0xff] %v6894_v47  ;;  %v1967_v9 = vpop.f32.mrf.mxu1 }
 0x2ed   :  { %10397 = vst [vmem:[#allocation157_spill] sm:$0xff] %v6906_v58 }
 0x2ee   :  { %v3430_v55 = vadd.f32 %v3429_v54, %v6884_v57  ;;  %v6909_v54 = vpop.f32.mrf.mxu3  ;;  %10398 = vst [vmem:[#allocation158_spill] sm:$0xff] %v6913_v28 }
 0x2ef   :  { %10399 = vst [vmem:[#allocation159_spill] sm:$0xff] %v6918_v48 }
 0x2f0   :  { %v3431_v17 = vadd.f32 %v3430_v55, %v6889_v63  ;;  %10400 = vst [vmem:[#allocation160_spill] sm:$0xff] %v6923_v46  ;;  %v10458_v63 = vld [vmem:[#allocation67_spill] sm:$0xff] }
 0x2f1   :  { %10401 = vst [vmem:[#allocation161_spill] sm:$0xff] %v6930_v18 }
 0x2f2   :  { %v3432_v41 = vadd.f32 %v3431_v17, %v6894_v47  ;;  %v6926_v47 = vpop.f32.mrf.mxu2  ;;  %10404 = vst [vmem:[#allocation164_spill] sm:$0xff] %v6947_v1 }
 0x2f4   :  { %v3433_v4 = vadd.f32 %v3432_v41, %v6901_v27  ;;  %v5837_v27 = vld [vmem:[#allocation2 + $0x3c0] sm:$0xff]  ;;  %v1970_v10 = vpop.f32.mrf.mxu1 }
 0x2f6   :  { %v3434_v55 = vadd.f32 %v3433_v4, %v6906_v58 }
 0x2f7   :  { %2259 = vmatmul.bf16.gmra.mxu3 %v5837_v27 }
 0x2f8   :  { %v3435_v17 = vadd.f32 %v3434_v55, %v6913_v28  ;;  %v6935_v55 = vadd.f32 %v6229_v14, %v6470_v56  ;;  %v6938_v28 = vpop.f32.mrf.mxu3  ;;  %v6953_v56 = vadd.f32 %v6229_v14, %v6567_v23 }
 0x2fa   :  { %v3436_v41 = vadd.f32 %v3435_v17, %v6918_v48  ;;  %10402 = vst [vmem:[#allocation162_spill] sm:$0xff] %v6935_v55  ;;  %v6942_v17 = vadd.f32 %v6229_v14, %v6505_v40  ;;  %v6960_v40 = vadd.f32 %v6229_v14, %v6598_v62  ;;  %v6977_v62 = vadd.f32 %v6229_v14, %v6683_v50 }
 0x2fb   :  { %10405 = vst [vmem:[#allocation165_spill] sm:$0xff] %v6953_v56 }
 0x2fc   :  { %v3437_v4 = vadd.f32 %v3436_v41, %v6923_v46  ;;  %10403 = vst [vmem:[#allocation163_spill] sm:$0xff] %v6942_v17  ;;  %v10451_v46 = vld [vmem:[#allocation53_spill] sm:$0xff] }
 0x2fd   :  { %10406 = vst [vmem:[#allocation166_spill] sm:$0xff] %v6960_v40 }
 0x2fe   :  { %v3438_v33 = vadd.f32 %v3437_v4, %v6930_v18  ;;  %v6955_v4 = vpop.f32.mrf.mxu2  ;;  %10409 = vst [vmem:[#allocation169_spill] sm:$0xff] %v6977_v62 }
 0x300   :  { %v3439_v48 = vadd.f32 %v3438_v33, %v6935_v55  ;;  %v1972_v33 = vpop.f32.mrf.mxu1 }
 0x302   :  { %v3440_v27 = vadd.f32 %v3439_v48, %v6942_v17  ;;  %v6965_v48 = vadd.f32 %v6229_v14, %v6629_v24  ;;  %v6983_v24 = vld [vmem:[%s9760_s2] ss:$0 sm:$0xff]  ;;  %s5975_s2 = smov [#allocation7]  }
 0x303   :  { %v10445_v17 = vld [vmem:[#allocation47_spill] sm:$0xff]  ;;  %s5157_s26 = sshll.u32 %s5975_s2, 4  ;;  %s5158_s26 = int_to_ptr.vmem [resolvable:$true] %s5157_s26 }
 0x304   :  { %v3441_v41 = vadd.f32 %v3440_v27, %v6947_v1  ;;  %10407 = vst [vmem:[#allocation167_spill] sm:$0xff] %v6965_v48  ;;  %v6967_v27 = vpop.f32.mrf.mxu3  ;;  %v6972_v1 = vadd.f32 %v6229_v14, %v6652_v6  ;;  %v6994_v14 = vadd.f32 %v6983_v24, %v6747_v43  ;;  %v7011_v43 = vadd.f32 %v6983_v24, %v6840_v51 }
 0x305   :  { %v7026_v51 = vadd.f32 %v6983_v24, %v1970_v10 }
 0x306   :  { %v3442_v18 = vadd.f32 %v3441_v41, %v6953_v56  ;;  %10408 = vst [vmem:[#allocation168_spill] sm:$0xff] %v6972_v1  ;;  %v5838_v41 = vld [vmem:[#allocation2 + $0x3c8] sm:$0xff]  ;;  %v6989_v6 = vpop.f32.mrf.mxu2 }
 0x307   :  { %2264 = vmatmul.bf16.gmra.mxu3 %v5838_v41  ;;  %10411 = vst [vmem:[#allocation171_spill] sm:$0xff] %v6994_v14  ;;  %v6999_v41 = vadd.f32 %v6983_v24, %v6778_v7  ;;  %v7016_v7 = vadd.f32 %v6983_v24, %v6873_v19 }
 0x308   :  { %v3443_v22 = vadd.f32 %v3442_v18, %v6960_v40  ;;  %v1975_v50 = vpop.f32.mrf.mxu1  ;;  %10414 = vst [vmem:[#allocation174_spill] sm:$0xff] %v7011_v43  ;;  %v10441_v40 = vld [vmem:[#allocation43_spill] sm:$0xff] }
 0x309   :  { %10412 = vst [vmem:[#allocation172_spill] sm:$0xff] %v6999_v41 }
 0x30a   :  { %v3444_v23 = vadd.f32 %v3443_v22, %v6965_v48  ;;  %v6987_v22 = vadd.f32 %v6983_v24, %v6714_v20  ;;  %10415 = vst [vmem:[#allocation175_spill] sm:$0xff] %v7016_v7 }
 0x30b   :  { %10417 = vst [vmem:[#allocation177_spill] sm:$0xff] %v7026_v51 }
 0x30c   :  { %v3445_v56 = vadd.f32 %v3444_v23, %v6972_v1  ;;  %10410 = vst [vmem:[#allocation170_spill] sm:$0xff] %v6987_v22  ;;  %v7006_v1 = vadd.f32 %v6983_v24, %v6809_v61  ;;  %v5839_v61 = vld [vmem:[#allocation2 + $0x3d0] sm:$0xff] }
 0x30e   :  { %v3446_v18 = vadd.f32 %v3445_v56, %v6977_v62  ;;  %v7001_v62 = vpop.f32.mrf.mxu3  ;;  %10413 = vst [vmem:[#allocation173_spill] sm:$0xff] %v7006_v1 }
 0x310   :  { %v3447_v23 = vadd.f32 %v3446_v18, %v6987_v22  ;;  %v1977_v22 = vpop.f32.mrf.mxu1 }
 0x312   :  { %v3448_v56 = vadd.f32 %v3447_v23, %v6994_v14  ;;  %v7018_v14 = vpop.f32.mrf.mxu2 }
 0x314   :  { %v3449_v20 = vadd.f32 %v3448_v56, %v6999_v41  ;;  %v7022_v41 = vadd.f32 %v6983_v24, %v1967_v9  ;;  %v7036_v9 = vadd.f32 %v6983_v24, %v1975_v50 }
 0x316   :  { %v3450_v18 = vadd.f32 %v3449_v20, %v7006_v1  ;;  %10416 = vst [vmem:[#allocation176_spill] sm:$0xff] %v7022_v41  ;;  %v7028_v1 = vpop.f32.mrf.mxu3 }
 0x317   :  { %2269 = vmatmul.bf16.gmra.mxu3 %v5839_v61  ;;  %10419 = vst [vmem:[#allocation179_spill] sm:$0xff] %v7036_v9 }
 0x318   :  { %v3451_v23 = vadd.f32 %v3450_v18, %v7011_v43  ;;  %v7032_v18 = vadd.f32 %v6983_v24, %v1972_v33  ;;  %v10423_v33 = vld [vmem:[#allocation25_spill] sm:$0xff]  ;;  %v10429_v43 = vld [vmem:[#allocation31_spill] sm:$0xff] }
 0x31a   :  { %v3452_v56 = vadd.f32 %v3451_v23, %v7016_v7  ;;  %10418 = vst [vmem:[#allocation178_spill] sm:$0xff] %v7032_v18  ;;  %v7042_v10 = vpop.f32.mrf.mxu2 }
 0x31c   :  { %v3453_v20 = vadd.f32 %v3452_v56, %v7022_v41  ;;  %v7040_v56 = vadd.f32 %v6983_v24, %v1977_v22  ;;  %v10421_v41 = vld [vmem:[#allocation23_spill] sm:$0xff] }
 0x31d   :  { %v7046_v61 = vadd.f32 %v6983_v24, %v10421_v41 }
 0x31e   :  { %v3454_v19 = vadd.f32 %v3453_v20, %v7026_v51  ;;  %10420 = vst [vmem:[#allocation180_spill] sm:$0xff] %v7040_v56  ;;  %v7051_v51 = vadd.f32 %v6983_v24, %v10423_v33  ;;  %v7068_v33 = vadd.f32 %v6983_v24, %v10429_v43  ;;  %v10435_v43 = vld [vmem:[#allocation37_spill] sm:$0xff] }
 0x31f   :  { %10422 = vst [vmem:[#allocation23_spill] sm:$0xff] %v7046_v61 }
 0x320   :  { %v3455_v23 = vadd.f32 %v3454_v19, %v7032_v18  ;;  %10424 = vst [vmem:[#allocation25_spill] sm:$0xff] %v7051_v51  ;;  %v7054_v19 = vpop.f32.mrf.mxu3  ;;  %v10427_v18 = vld [vmem:[#allocation29_spill] sm:$0xff] }
 0x321   :  { %v7063_v41 = vadd.f32 %v6983_v24, %v10427_v18  ;;  %10430 = vst [vmem:[#allocation31_spill] sm:$0xff] %v7068_v33  ;;  %v10433_v18 = vld [vmem:[#allocation35_spill] sm:$0xff] }
 0x322   :  { %v3456_v7 = vadd.f32 %v3455_v23, %v7036_v9  ;;  %v10425_v23 = vld [vmem:[#allocation27_spill] sm:$0xff] }
 0x323   :  { %v7058_v22 = vadd.f32 %v6983_v24, %v10425_v23  ;;  %10428 = vst [vmem:[#allocation29_spill] sm:$0xff] %v7063_v41  ;;  %v10431_v23 = vld [vmem:[#allocation33_spill] sm:$0xff] }
 0x324   :  { %v3457_v20 = vadd.f32 %v3456_v7, %v7040_v56  ;;  %v5840_v56 = vld [vmem:[#allocation2 + $0x3d8] sm:$0xff]  ;;  %v7075_v48 = vadd.f32 %v6983_v24, %v10431_v23 }
 0x325   :  { %10426 = vst [vmem:[#allocation27_spill] sm:$0xff] %v7058_v22 }
 0x326   :  { %v3458_v50 = vadd.f32 %v3457_v20, %v7046_v61  ;;  %v7071_v61 = vpop.f32.mrf.mxu2  ;;  %10432 = vst [vmem:[#allocation33_spill] sm:$0xff] %v7075_v48 }
 0x327   :  { %2274 = vmatmul.bf16.gmra.mxu3 %v5840_v56 }
 0x328   :  { %v3459_v9 = vadd.f32 %v3458_v50, %v7051_v51  ;;  %v7080_v51 = vadd.f32 %v6983_v24, %v10433_v18 }
 0x32a   :  { %v3460_v7 = vadd.f32 %v3459_v9, %v7058_v22  ;;  %10434 = vst [vmem:[#allocation35_spill] sm:$0xff] %v7080_v51  ;;  %v7083_v22 = vpop.f32.mrf.mxu3 }
 0x32c   :  { %v3461_v20 = vadd.f32 %v3460_v7, %v7063_v41  ;;  %v7087_v7 = vadd.f32 %v6983_v24, %v10435_v43  ;;  %v10437_v41 = vld [vmem:[#allocation39_spill] sm:$0xff]  ;;  %v7104_v43 = vadd.f32 %v6983_v24, %v10441_v40  ;;  %v10447_v40 = vld [vmem:[#allocation49_spill] sm:$0xff] }
 0x32d   :  { %v7092_v23 = vadd.f32 %v6983_v24, %v10437_v41  ;;  %v7121_v55 = vadd.f32 %v6983_v24, %v10447_v40 }
 0x32e   :  { %v3462_v50 = vadd.f32 %v3461_v20, %v7068_v33  ;;  %10436 = vst [vmem:[#allocation37_spill] sm:$0xff] %v7087_v7  ;;  %v10439_v33 = vld [vmem:[#allocation41_spill] sm:$0xff] }
 0x32f   :  { %10438 = vst [vmem:[#allocation39_spill] sm:$0xff] %v7092_v23  ;;  %v7097_v18 = vadd.f32 %v6983_v24, %v10439_v33  ;;  %v5841_v33 = vld [vmem:[#allocation2 + $0x3e0] sm:$0xff] }
 0x330   :  { %v3463_v9 = vadd.f32 %v3462_v50, %v7075_v48  ;;  %v7100_v48 = vpop.f32.mrf.mxu2  ;;  %10442 = vst [vmem:[#allocation43_spill] sm:$0xff] %v7104_v43 }
 0x331   :  { %10440 = vst [vmem:[#allocation41_spill] sm:$0xff] %v7097_v18 }
 0x332   :  { %v3464_v56 = vadd.f32 %v3463_v9, %v7080_v51  ;;  %v10443_v51 = vld [vmem:[#allocation45_spill] sm:$0xff]  ;;  %10448 = vst [vmem:[#allocation49_spill] sm:$0xff] %v7121_v55 }
 0x333   :  { %v7109_v41 = vadd.f32 %v6983_v24, %v10443_v51  ;;  %v10449_v51 = vld [vmem:[#allocation51_spill] sm:$0xff] }
 0x334   :  { %v3465_v20 = vadd.f32 %v3464_v56, %v7087_v7  ;;  %v7112_v7 = vpop.f32.mrf.mxu3 }
 0x335   :  { %10444 = vst [vmem:[#allocation45_spill] sm:$0xff] %v7109_v41 }
 0x336   :  { %v3466_v50 = vadd.f32 %v3465_v20, %v7092_v23  ;;  %v7116_v20 = vadd.f32 %v6983_v24, %v10445_v17  ;;  %v7133_v17 = vadd.f32 %v6983_v24, %v10451_v46 }
 0x337   :  { %2279 = vmatmul.bf16.gmra.mxu3 %v5841_v33  ;;  %v10453_v33 = vld [vmem:[#allocation55_spill] sm:$0xff] }
 0x338   :  { %v3467_v9 = vadd.f32 %v3466_v50, %v7097_v18  ;;  %10446 = vst [vmem:[#allocation47_spill] sm:$0xff] %v7116_v20  ;;  %v7126_v18 = vadd.f32 %v6983_v24, %v10449_v51  ;;  %v7138_v40 = vadd.f32 %v6983_v24, %v10453_v33  ;;  %v10454_v51 = vld [vmem:[#allocation58_spill] sm:$0xff] }
 0x339   :  { %10452 = vst [vmem:[#allocation53_spill] sm:$0xff] %v7133_v17 }
 0x33a   :  { %v3468_v56 = vadd.f32 %v3467_v9, %v7104_v43  ;;  %10450 = vst [vmem:[#allocation51_spill] sm:$0xff] %v7126_v18  ;;  %v7129_v43 = vpop.f32.mrf.mxu2 }
 0x33c   :  { %v3469_v23 = vadd.f32 %v3468_v56, %v7109_v41  ;;  %v7145_v41 = vadd.f32 %v6983_v24, %v10454_v51  ;;  %v7162_v51 = vadd.f32 %v6983_v24, %v10458_v63  ;;  %v7179_v63 = vadd.f32 %v6983_v24, %v6309_v31 }
 0x33d   :  { %v7196_v31 = vadd.f32 %v6983_v24, %v6393_v13  ;;  %v7213_v13 = vadd.f32 %v6983_v24, %v6477_v42  ;;  %v7232_v42 = vadd.f32 %v6983_v24, %v6555_v38 }
 0x33e   :  { %v3470_v50 = vadd.f32 %v3469_v23, %v7116_v20  ;;  %v7141_v20 = vpop.f32.mrf.mxu3 }
 0x33f   :  { %10462 = vst [vmem:[#allocation67_spill] sm:$0xff] %v7213_v13 }
 0x340   :  { %v3471_v9 = vadd.f32 %v3470_v50, %v7121_v55  ;;  %v10455_v55 = vld [vmem:[#allocation61_spill] sm:$0xff]  ;;  %10464 = vst [vmem:[#allocation182_spill] sm:$0xff] %v7232_v42 }
 0x341   :  { %v7150_v46 = vadd.f32 %v6983_v24, %v10455_v55  ;;  %v7167_v55 = vadd.f32 %v6983_v24, %v6253_v21  ;;  %10460 = vst [vmem:[#allocation61_spill] sm:$0xff] %v7179_v63  ;;  %v7184_v21 = vadd.f32 %v6983_v24, %v6337_v49  ;;  %v7203_v49 = vadd.f32 %v6983_v24, %v6421_v25 }
 0x342   :  { %v3472_v56 = vadd.f32 %v3471_v9, %v7126_v18  ;;  %v10457_v18 = vld [vmem:[#allocation64_spill] sm:$0xff]  ;;  %v7158_v58 = vpop.f32.mrf.mxu2  ;;  %v7220_v25 = vadd.f32 %v6983_v24, %v6503_v44  ;;  %v7237_v44 = vadd.f32 %v6983_v24, %v6581_v3  ;;  %v7252_v3 = vadd.f32 %v6983_v24, %v6646_v30 }
 0x343   :  { %10456 = vst [vmem:[#allocation55_spill] sm:$0xff] %v7150_v46  ;;  %v7155_v33 = vadd.f32 %v6983_v24, %v10457_v18  ;;  %v7269_v30 = vadd.f32 %v6983_v24, %v6723_v15 }
 0x344   :  { %v3473_v23 = vadd.f32 %v3472_v56, %v7133_v17  ;;  %v5842_v17 = vld [vmem:[#allocation2 + $0x3e8] sm:$0xff]  ;;  %10463 = vst [vmem:[#allocation181_spill] sm:$0xff] %v7220_v25 }
 0x345   :  { %10466 = vst [vmem:[#allocation184_spill] sm:$0xff] %v7269_v30 }
 0x346   :  { %v3474_v50 = vadd.f32 %v3473_v23, %v7138_v40  ;;  %v7170_v18 = vpop.f32.mrf.mxu3 }
 0x347   :  { %2284 = vmatmul.bf16.gmra.mxu3 %v5842_v17 }
 0x348   :  { %v3475_v9 = vadd.f32 %v3474_v50, %v7145_v41 }
 0x34a   :  { %v3476_v56 = vadd.f32 %v3475_v9, %v7150_v46  ;;  %v7174_v9 = vadd.f32 %v6983_v24, %v6281_v29  ;;  %v7191_v29 = vadd.f32 %v6983_v24, %v6365_v45  ;;  %v7208_v45 = vadd.f32 %v6983_v24, %v6449_v12 }
 0x34b   :  { %v7225_v12 = vadd.f32 %v6983_v24, %v6529_v5  ;;  %v7242_v5 = vadd.f32 %v6983_v24, %v6607_v60  ;;  %v7259_v60 = vadd.f32 %v6983_v24, %v6671_v16 }
 0x34c   :  { %v3477_v23 = vadd.f32 %v3476_v56, %v7155_v33  ;;  %10459 = vst [vmem:[#allocation58_spill] sm:$0xff] %v7174_v9 }
 0x34d   :  { %10461 = vst [vmem:[#allocation64_spill] sm:$0xff] %v7191_v29 }
 0x34e   :  { %v3478_v50 = vadd.f32 %v3477_v23, %v7162_v51  ;;  %v7187_v23 = vpop.f32.mrf.mxu2 }
 0x350   :  { %v3479_v46 = vadd.f32 %v3478_v50, %v7167_v55 }
 0x352   :  { %v3480_v17 = vadd.f32 %v3479_v46, %v7174_v9  ;;  %v7199_v9 = vpop.f32.mrf.mxu3 }
 0x354   :  { %v3481_v56 = vadd.f32 %v3480_v17, %v7179_v63  ;;  %v5843_v63 = vld [vmem:[#allocation2 + $0x3f0] sm:$0xff] }
 0x356   :  { %v3482_v50 = vadd.f32 %v3481_v56, %v7184_v21 }
 0x357   :  { %2289 = vmatmul.bf16.gmra.mxu3 %v5843_v63 }
 0x358   :  { %v3483_v46 = vadd.f32 %v3482_v50, %v7191_v29  ;;  %v7216_v29 = vpop.f32.mrf.mxu2 }
 0x35a   :  { %v3484_v17 = vadd.f32 %v3483_v46, %v7196_v31 }
 0x35c   :  { %v3485_v56 = vadd.f32 %v3484_v17, %v7203_v49  ;;  %v7228_v17 = vpop.f32.mrf.mxu3 }
 0x35e   :  { %v3486_v50 = vadd.f32 %v3485_v56, %v7208_v45 }
 0x360   :  { %v3487_v46 = vadd.f32 %v3486_v50, %v7213_v13  ;;  %v7247_v13 = vadd.f32 %v6983_v24, %v6627_v52  ;;  %v7264_v52 = vadd.f32 %v6983_v24, %v6697_v36 }
 0x362   :  { %v3488_v63 = vadd.f32 %v3487_v46, %v7220_v25  ;;  %v2125_v25 = vpop.f32.mrf.mxu2  ;;  %10465 = vst [vmem:[#allocation183_spill] sm:$0xff] %v7247_v13 }
 0x364   :  { %v3489_v56 = vadd.f32 %v3488_v63, %v7225_v12  ;;  %v5844_v63 = vld [vmem:[#allocation2 + $0x3f8] sm:$0xff] }
 0x366   :  { %v3490_v50 = vadd.f32 %v3489_v56, %v7232_v42  ;;  %v7255_v42 = vpop.f32.mrf.mxu3 }
 0x367   :  { %2294 = vmatmul.bf16.gmra.mxu3 %v5844_v63  ;;  %v7274_v63 = vadd.f32 %v6983_v24, %v6745_v59 }
 0x368   :  { %v3491_v46 = vadd.f32 %v3490_v50, %v7237_v44 }
 0x36a   :  { %v3492_v38 = vadd.f32 %v3491_v46, %v7242_v5 }
 0x36c   :  { %v3493_v56 = vadd.f32 %v3492_v38, %v7247_v13  ;;  %v2127_v13 = vpop.f32.mrf.mxu2 }
 0x36e   :  { %v3494_v50 = vadd.f32 %v3493_v56, %v7252_v3  ;;  %v7279_v56 = vadd.f32 %v6983_v24, %v6771_v34 }
 0x370   :  { %v3495_v46 = vadd.f32 %v3494_v50, %v7259_v60  ;;  %v7284_v50 = vadd.f32 %v6983_v24, %v6797_v39 }
 0x372   :  { %v3496_v38 = vadd.f32 %v3495_v46, %v7264_v52  ;;  %v7289_v46 = vadd.f32 %v6983_v24, %v6823_v0 }
 0x374   :  { %v3497_v16 = vadd.f32 %v3496_v38, %v7269_v30  ;;  %v7294_v38 = vadd.f32 %v6983_v24, %v6849_v35  ;;  %v2130_v30 = vpop.f32.mrf.mxu2 }
 0x376   :  { %v3498_v36 = vadd.f32 %v3497_v16, %v7274_v63  ;;  %10467 = vst [vmem:[#allocation185_spill] sm:$0xff] %v7294_v38  ;;  %v7299_v16 = vadd.f32 %v6983_v24, %v6871_v53  ;;  %v7315_v53 = vadd.f32 %v6983_v24, %v6955_v4 }
 0x378   :  { %v3499_v15 = vadd.f32 %v3498_v36, %v7279_v56  ;;  %v7304_v36 = vadd.f32 %v6983_v24, %v6897_v11  ;;  %v7320_v11 = vadd.f32 %v6983_v24, %v6989_v6 }
 0x37a   :  { %v3500_v59 = vadd.f32 %v3499_v15, %v7284_v50  ;;  %v7309_v15 = vadd.f32 %v6983_v24, %v6926_v47  ;;  %v7325_v47 = vadd.f32 %v6983_v24, %v7018_v14 }
 0x37c   :  { %v3501_v34 = vadd.f32 %v3500_v59, %v7289_v46  ;;  %10468 = vst [vmem:[#allocation186_spill] sm:$0xff] %v7325_v47 }
 0x37e   :  { %v3502_v39 = vadd.f32 %v3501_v34, %v7294_v38  ;;  %v2132_v38 = vpop.f32.mrf.mxu2 }
 0x380   :  { %v3503_v0 = vadd.f32 %v3502_v39, %v7299_v16 }
 0x382   :  { %v3504_v35 = vadd.f32 %v3503_v0, %v7304_v36 }
 0x384   :  { %v3505_v59 = vadd.f32 %v3504_v35, %v7309_v15  ;;  %v7330_v35 = vadd.f32 %v6983_v24, %v7042_v10 }
 0x386   :  { %v3506_v34 = vadd.f32 %v3505_v59, %v7315_v53  ;;  %v7335_v59 = vadd.f32 %v6983_v24, %v7071_v61  ;;  %v2135_v10 = vpop.f32.mrf.mxu2 }
 0x388   :  { %v3507_v39 = vadd.f32 %v3506_v34, %v7320_v11  ;;  %v7340_v34 = vadd.f32 %v6983_v24, %v7100_v48 }
 0x38a   :  { %v3508_v0 = vadd.f32 %v3507_v39, %v7325_v47  ;;  %v7345_v39 = vadd.f32 %v6983_v24, %v7129_v43 }
 0x38c   :  { %v3509_v4 = vadd.f32 %v3508_v0, %v7330_v35  ;;  %10469 = vst [vmem:[#allocation187_spill] sm:$0xff] %v7345_v39  ;;  %v7350_v0 = vadd.f32 %v6983_v24, %v7158_v58 }
 0x38e   :  { %v3510_v6 = vadd.f32 %v3509_v4, %v7335_v59  ;;  %10470 = vst [vmem:[#allocation188_spill] sm:$0xff] %v7350_v0  ;;  %v7355_v4 = vadd.f32 %v6983_v24, %v7187_v23 }
 0x390   :  { %v3511_v14 = vadd.f32 %v3510_v6, %v7340_v34  ;;  %10471 = vst [vmem:[#allocation189_spill] sm:$0xff] %v7355_v4  ;;  %v7360_v6 = vadd.f32 %v6983_v24, %v7216_v29 }
 0x392   :  { %v3512_v47 = vadd.f32 %v3511_v14, %v7345_v39  ;;  %10472 = vst [vmem:[#allocation190_spill] sm:$0xff] %v7360_v6  ;;  %v7364_v14 = vadd.f32 %v6983_v24, %v2125_v25  ;;  %v7368_v39 = vadd.f32 %v6983_v24, %v2127_v13 }
 0x394   :  { %v3513_v61 = vadd.f32 %v3512_v47, %v7350_v0  ;;  %10473 = vst [vmem:[#allocation191_spill] sm:$0xff] %v7364_v14  ;;  %v2137_v47 = vpop.f32.mrf.mxu2  ;;  %v7372_v0 = vadd.f32 %v6983_v24, %v2130_v30 }
 0x395   :  { %10474 = vst [vmem:[#allocation192_spill] sm:$0xff] %v7368_v39 }
 0x396   :  { %v3514_v48 = vadd.f32 %v3513_v61, %v7355_v4  ;;  %10475 = vst [vmem:[#allocation193_spill] sm:$0xff] %v7372_v0  ;;  %v7374_v61 = vpop.f32.mrf.mxu3 }
 0x398   :  { %v3515_v43 = vadd.f32 %v3514_v48, %v7360_v6  ;;  %v7378_v48 = vadd.f32 %v6983_v24, %v2132_v38 }
 0x39a   :  { %v3516_v58 = vadd.f32 %v3515_v43, %v7364_v14  ;;  %10476 = vst [vmem:[#allocation194_spill] sm:$0xff] %v7378_v48  ;;  %v7382_v43 = vadd.f32 %v6983_v24, %v2135_v10  ;;  %v7386_v14 = vadd.f32 %v6983_v24, %v2137_v47  ;;  %v10483_v10 = vld [vmem:[#allocation62_spill] sm:$0xff] }
 0x39c   :  { %v3517_v23 = vadd.f32 %v3516_v58, %v7368_v39  ;;  %10477 = vst [vmem:[#allocation195_spill] sm:$0xff] %v7382_v43  ;;  %v10479_v58 = vld [vmem:[#allocation56_spill] sm:$0xff] }
 0x39d   :  { %10478 = vst [vmem:[#allocation196_spill] sm:$0xff] %v7386_v14  ;;  %v7390_v30 = vadd.f32 %v6983_v24, %v10479_v58 }
 0x39e   :  { %v3518_v29 = vadd.f32 %v3517_v23, %v7372_v0  ;;  %v10481_v23 = vld [vmem:[#allocation59_spill] sm:$0xff] }
 0x39f   :  { %10480 = vst [vmem:[#allocation56_spill] sm:$0xff] %v7390_v30  ;;  %v7395_v38 = vadd.f32 %v6983_v24, %v10481_v23 }
 0x3a0   :  { %v3519_v25 = vadd.f32 %v3518_v29, %v7378_v48  ;;  %v7398_v48 = vpop.f32.mrf.mxu3 }
 0x3a1   :  { %10482 = vst [vmem:[#allocation59_spill] sm:$0xff] %v7395_v38 }
 0x3a2   :  { %v3520_v13 = vadd.f32 %v3519_v25, %v7382_v43  ;;  %v7402_v25 = vadd.f32 %v6983_v24, %v10483_v10  ;;  %v10485_v43 = vld [vmem:[#allocation65_spill] sm:$0xff] }
 0x3a3   :  { %v7407_v58 = vadd.f32 %v6983_v24, %v10485_v43 }
 0x3a4   :  { %v3521_v39 = vadd.f32 %v3520_v13, %v7386_v14  ;;  %10484 = vst [vmem:[#allocation62_spill] sm:$0xff] %v7402_v25  ;;  %v10487_v14 = vld [vmem:[#allocation68_spill] sm:$0xff] }
 0x3a5   :  { %10486 = vst [vmem:[#allocation65_spill] sm:$0xff] %v7407_v58  ;;  %v7412_v23 = vadd.f32 %v6983_v24, %v10487_v14  ;;  %v7429_v14 = vadd.f32 %v6983_v24, %v6311_v37 }
 0x3a6   :  { %v3522_v29 = vadd.f32 %v3521_v39, %v7390_v30  ;;  %v7417_v30 = vadd.f32 %v6983_v24, %v6255_v8  ;;  %v7434_v8 = vadd.f32 %v6983_v24, %v6339_v32 }
 0x3a7   :  { %10488 = vst [vmem:[#allocation68_spill] sm:$0xff] %v7412_v23 }
 0x3a8   :  { %v3523_v47 = vadd.f32 %v3522_v29, %v7395_v38  ;;  %10489 = vst [vmem:[#allocation197_spill] sm:$0xff] %v7417_v30  ;;  %v7422_v29 = vadd.f32 %v6983_v24, %v6283_v26  ;;  %v7425_v38 = vpop.f32.mrf.mxu3 }
 0x3a9   :  { %10491 = vst [vmem:[#allocation199_spill] sm:$0xff] %v7429_v14 }
 0x3aa   :  { %v3524_v13 = vadd.f32 %v3523_v47, %v7402_v25  ;;  %10490 = vst [vmem:[#allocation198_spill] sm:$0xff] %v7422_v29 }
 0x3ab   :  { %10492 = vst [vmem:[#allocation200_spill] sm:$0xff] %v7434_v8 }
 0x3ac   :  { %v3525_v39 = vadd.f32 %v3524_v13, %v7407_v58  ;;  %v10497_v58 = vld [vmem:[#allocation100_spill] sm:$0xff] }
 0x3ae   :  { %v3526_v10 = vadd.f32 %v3525_v39, %v7412_v23  ;;  %v10493_v39 = vld [vmem:[#allocation90_spill] sm:$0xff] }
 0x3af   :  { %v7439_v26 = vadd.f32 %v6983_v24, %v10493_v39  ;;  %v10499_v39 = vld [vmem:[#allocation105_spill] sm:$0xff] }
 0x3b0   :  { %v3527_v43 = vadd.f32 %v3526_v10, %v7417_v30  ;;  %v10495_v30 = vld [vmem:[#allocation95_spill] sm:$0xff] }
 0x3b1   :  { %10494 = vst [vmem:[#allocation90_spill] sm:$0xff] %v7439_v26  ;;  %v7444_v23 = vadd.f32 %v6983_v24, %v10495_v30  ;;  %v10501_v30 = vld [vmem:[#allocation110_spill] sm:$0xff] }
 0x3b2   :  { %v3528_v47 = vadd.f32 %v3527_v43, %v7422_v29  ;;  %v7449_v43 = vadd.f32 %v6983_v24, %v10497_v58  ;;  %v7452_v29 = vpop.f32.mrf.mxu3 }
 0x3b3   :  { %10496 = vst [vmem:[#allocation95_spill] sm:$0xff] %v7444_v23 }
 0x3b4   :  { %v3529_v13 = vadd.f32 %v3528_v47, %v7429_v14  ;;  %10498 = vst [vmem:[#allocation100_spill] sm:$0xff] %v7449_v43  ;;  %v7457_v14 = vadd.f32 %v6983_v24, %v10499_v39 }
 0x3b6   :  { %v3530_v10 = vadd.f32 %v3529_v13, %v7434_v8  ;;  %10500 = vst [vmem:[#allocation105_spill] sm:$0xff] %v7457_v14  ;;  %v7462_v8 = vadd.f32 %v6983_v24, %v10501_v30 }
 0x3b8   :  { %v3531_v37 = vadd.f32 %v3530_v10, %v7439_v26  ;;  %10502 = vst [vmem:[#allocation110_spill] sm:$0xff] %v7462_v8  ;;  %v10503_v26 = vld [vmem:[#allocation116_spill] sm:$0xff] }
 0x3ba   :  { %v3532_v32 = vadd.f32 %v3531_v37, %v7444_v23  ;;  %v7465_v58 = vpop.f32.mrf.mxu3  ;;  %v7469_v37 = vadd.f32 %v6983_v24, %v10503_v26 }
 0x3bc   :  { %v3533_v47 = vadd.f32 %v3532_v32, %v7449_v43  ;;  %10504 = vst [vmem:[#allocation116_spill] sm:$0xff] %v7469_v37  ;;  %v10505_v43 = vld [vmem:[#allocation122_spill] sm:$0xff] }
 0x3bd   :  { %v7474_v39 = vadd.f32 %v6983_v24, %v10505_v43 }
 0x3be   :  { %v3534_v13 = vadd.f32 %v3533_v47, %v7457_v14  ;;  %v10507_v14 = vld [vmem:[#allocation128_spill] sm:$0xff] }
 0x3bf   :  { %10506 = vst [vmem:[#allocation122_spill] sm:$0xff] %v7474_v39  ;;  %v7479_v30 = vadd.f32 %v6983_v24, %v10507_v14  ;;  %v10513_v14 = vld [vmem:[#allocation145_spill] sm:$0xff] }
 0x3c0   :  { %v3535_v10 = vadd.f32 %v3534_v13, %v7462_v8  ;;  %v10509_v8 = vld [vmem:[#allocation134_spill] sm:$0xff]  ;;  %v7498_v25 = vadd.f32 %v6983_v24, %v10513_v14 }
 0x3c1   :  { %10508 = vst [vmem:[#allocation128_spill] sm:$0xff] %v7479_v30  ;;  %v7486_v26 = vadd.f32 %v6983_v24, %v10509_v8 }
 0x3c2   :  { %v3536_v32 = vadd.f32 %v3535_v10, %v7469_v37  ;;  %v7481_v23 = vpop.f32.mrf.mxu3  ;;  %v10511_v37 = vld [vmem:[#allocation140_spill] sm:$0xff]  ;;  %10514 = vst [vmem:[#allocation145_spill] sm:$0xff] %v7498_v25 }
 0x3c3   :  { %10510 = vst [vmem:[#allocation134_spill] sm:$0xff] %v7486_v26  ;;  %v7491_v43 = vadd.f32 %v6983_v24, %v10511_v37 }
 0x3c4   :  { %v3537_v47 = vadd.f32 %v3536_v32, %v7474_v39 }
 0x3c5   :  { %10512 = vst [vmem:[#allocation140_spill] sm:$0xff] %v7491_v43 }
 0x3c6   :  { %v3538_v13 = vadd.f32 %v3537_v47, %v7479_v30  ;;  %v10515_v30 = vld [vmem:[#allocation150_spill] sm:$0xff] }
 0x3c7   :  { %v7503_v8 = vadd.f32 %v6983_v24, %v10515_v30 }
 0x3c8   :  { %v3539_v10 = vadd.f32 %v3538_v13, %v7486_v26  ;;  %v10517_v26 = vld [vmem:[#allocation151_spill] sm:$0xff] }
 0x3c9   :  { %10516 = vst [vmem:[#allocation150_spill] sm:$0xff] %v7503_v8  ;;  %v7508_v37 = vadd.f32 %v6983_v24, %v10517_v26 }
 0x3ca   :  { %v3540_v32 = vadd.f32 %v3539_v10, %v7491_v43  ;;  %v7494_v39 = vpop.f32.mrf.mxu3  ;;  %v10519_v43 = vld [vmem:[#allocation152_spill] sm:$0xff] }
 0x3cb   :  { %10518 = vst [vmem:[#allocation151_spill] sm:$0xff] %v7508_v37  ;;  %v7513_v6 = vadd.f32 %v6983_v24, %v10519_v43 }
 0x3cc   :  { %v3541_v47 = vadd.f32 %v3540_v32, %v7498_v25  ;;  %v10521_v32 = vld [vmem:[#allocation153_spill] sm:$0xff] }
 0x3cd   :  { %10520 = vst [vmem:[#allocation152_spill] sm:$0xff] %v7513_v6  ;;  %v7518_v25 = vadd.f32 %v6983_v24, %v10521_v32 }
 0x3ce   :  { %v3542_v13 = vadd.f32 %v3541_v47, %v7503_v8  ;;  %v10523_v8 = vld [vmem:[#allocation154_spill] sm:$0xff] }
 0x3cf   :  { %10522 = vst [vmem:[#allocation153_spill] sm:$0xff] %v7518_v25  ;;  %v7523_v26 = vadd.f32 %v6983_v24, %v10523_v8 }
 0x3d0   :  { %v3543_v10 = vadd.f32 %v3542_v13, %v7508_v37  ;;  %v10524_v13 = vld [vmem:[#allocation155_spill] sm:$0xff] }
 0x3d1   :  { %v7528_v37 = vadd.f32 %v6983_v24, %v10524_v13 }
 0x3d2   :  { %v2257_v0 = vpop.f32.mrf.mxu3  ;;  %v3544_v14 = vadd.f32 %v3543_v10, %v7513_v6  ;;  %v10526_v10 = vld [vmem:[#allocation63_spill] sm:$0xff] }
 0x3d3   :  { %10525 = vst [vmem:[#allocation154_spill] sm:$0xff] %v7528_v37  ;;  %v7533_v6 = vadd.f32 %v6983_v24, %v10526_v10  ;;  %v7548_v10 = vadd.f32 %v6983_v24, %v6967_v27 }
 0x3d4   :  { %v3545_v30 = vadd.f32 %v3544_v14, %v7518_v25  ;;  %v7538_v25 = vadd.f32 %v6983_v24, %v6909_v54 }
 0x3d6   :  { %v3546_v4 = vadd.f32 %v3545_v30, %v7523_v26  ;;  %v7543_v30 = vadd.f32 %v6983_v24, %v6938_v28 }
 0x3d8   :  { %v3547_v43 = vadd.f32 %v3546_v4, %v7528_v37  ;;  %10527 = vst [vmem:[#allocation155_spill] sm:$0xff] %v7543_v30 }
 0x3da   :  { %v2260_v47 = vpop.f32.mrf.mxu3  ;;  %v3548_v14 = vadd.f32 %v3547_v43, %v7533_v6  ;;  %v7553_v43 = vadd.f32 %v6983_v24, %v7001_v62 }
 0x3dc   :  { %v3549_v8 = vadd.f32 %v3548_v14, %v7538_v25  ;;  %10528 = vst [vmem:[#allocation63_spill] sm:$0xff] %v7553_v43  ;;  %v7558_v14 = vadd.f32 %v6983_v24, %v7028_v1  ;;  %v7573_v1 = vadd.f32 %v6983_v24, %v7112_v7 }
 0x3de   :  { %v3550_v13 = vadd.f32 %v3549_v8, %v7543_v30  ;;  %v7563_v30 = vadd.f32 %v6983_v24, %v7054_v19 }
 0x3e0   :  { %v3551_v37 = vadd.f32 %v3550_v13, %v7548_v10  ;;  %v7568_v13 = vadd.f32 %v6983_v24, %v7083_v22 }
 0x3e2   :  { %v2262_v32 = vpop.f32.mrf.mxu3  ;;  %v3552_v54 = vadd.f32 %v3551_v37, %v7553_v43  ;;  %10529 = vst [vmem:[#allocation201_spill] sm:$0xff] %v7568_v13 }
 0x3e4   :  { %v3553_v8 = vadd.f32 %v3552_v54, %v7558_v14  ;;  %v7578_v54 = vadd.f32 %v6983_v24, %v7141_v20 }
 0x3e6   :  { %v3554_v27 = vadd.f32 %v3553_v8, %v7563_v30  ;;  %10530 = vst [vmem:[#allocation202_spill] sm:$0xff] %v7578_v54  ;;  %v7583_v8 = vadd.f32 %v6983_v24, %v7170_v18  ;;  %v7598_v18 = vadd.f32 %v6983_v24, %v7255_v42 }
 0x3e8   :  { %v3555_v62 = vadd.f32 %v3554_v27, %v7568_v13  ;;  %v7588_v13 = vadd.f32 %v6983_v24, %v7199_v9 }
 0x3ea   :  { %v2265_v4 = vpop.f32.mrf.mxu3  ;;  %v3556_v43 = vadd.f32 %v3555_v62, %v7573_v1  ;;  %v7593_v62 = vadd.f32 %v6983_v24, %v7228_v17 }
 0x3ec   :  { %v3557_v19 = vadd.f32 %v3556_v43, %v7578_v54  ;;  %10531 = vst [vmem:[#allocation203_spill] sm:$0xff] %v7593_v62 }
 0x3ee   :  { %v3558_v27 = vadd.f32 %v3557_v19, %v7583_v8  ;;  %v7603_v19 = vadd.f32 %v6983_v24, %v7374_v61 }
 0x3f0   :  { %v3559_v7 = vadd.f32 %v3558_v27, %v7588_v13  ;;  %10532 = vst [vmem:[#allocation204_spill] sm:$0xff] %v7603_v19  ;;  %v7608_v27 = vadd.f32 %v6983_v24, %v7398_v48  ;;  %v7623_v48 = vadd.f32 %v6983_v24, %v7465_v58 }
 0x3f2   :  { %v2267_v28 = vpop.f32.mrf.mxu3  ;;  %v3560_v20 = vadd.f32 %v3559_v7, %v7593_v62  ;;  %v7613_v62 = vadd.f32 %v6983_v24, %v7425_v38  ;;  %10534 = vst [vmem:[#allocation206_spill] sm:$0xff] %v7623_v48 }
 0x3f4   :  { %v3561_v54 = vadd.f32 %v3560_v20, %v7598_v18  ;;  %v7618_v20 = vadd.f32 %v6983_v24, %v7452_v29 }
 0x3f6   :  { %v3562_v9 = vadd.f32 %v3561_v54, %v7603_v19  ;;  %10533 = vst [vmem:[#allocation205_spill] sm:$0xff] %v7618_v20 }
 0x3f8   :  { %v3563_v7 = vadd.f32 %v3562_v9, %v7608_v27  ;;  %v7628_v9 = vadd.f32 %v6983_v24, %v7481_v23 }
 0x3fa   :  { %v2270_v37 = vpop.f32.mrf.mxu3  ;;  %v3564_v42 = vadd.f32 %v3563_v7, %v7613_v62  ;;  %10535 = vst [vmem:[#allocation207_spill] sm:$0xff] %v7628_v9  ;;  %v7633_v7 = vadd.f32 %v6983_v24, %v7494_v39 }
 0x3fc   :  { %v3565_v61 = vadd.f32 %v3564_v42, %v7618_v20  ;;  %v7637_v20 = vadd.f32 %v6983_v24, %v2257_v0  ;;  %v7653_v0 = vadd.f32 %v6983_v24, %v2267_v28 }
 0x3fe   :  { %v3566_v19 = vadd.f32 %v3565_v61, %v7623_v48  ;;  %10536 = vst [vmem:[#allocation208_spill] sm:$0xff] %v7637_v20  ;;  %v7641_v61 = vadd.f32 %v6983_v24, %v2260_v47 }
 0x400   :  { %v3567_v38 = vadd.f32 %v3566_v19, %v7628_v9  ;;  %v7645_v19 = vadd.f32 %v6983_v24, %v2262_v32  ;;  %v7649_v9 = vadd.f32 %v6983_v24, %v2265_v4 }
 0x402   :  { %v2272_v22 = vpop.f32.mrf.mxu3  ;;  %v3568_v42 = vadd.f32 %v3567_v38, %v7633_v7  ;;  %10537 = vst [vmem:[#allocation209_spill] sm:$0xff] %v7645_v19 }
 0x403   :  { %v7661_v32 = vadd.f32 %v6983_v24, %v2272_v22 }
 0x404   :  { %v3569_v58 = vadd.f32 %v3568_v42, %v7637_v20  ;;  %v7657_v20 = vadd.f32 %v6983_v24, %v2270_v37 }
 0x405   :  { %10539 = vst [vmem:[#allocation211_spill] sm:$0xff] %v7661_v32 }
 0x406   :  { %v3570_v23 = vadd.f32 %v3569_v58, %v7641_v61  ;;  %10538 = vst [vmem:[#allocation210_spill] sm:$0xff] %v7657_v20 }
 0x408   :  { %v3571_v39 = vadd.f32 %v3570_v23, %v7645_v19 }
 0x40a   :  { %v2275_v43 = vpop.f32.mrf.mxu3  ;;  %v3572_v38 = vadd.f32 %v3571_v39, %v7649_v9 }
 0x40b   :  { %v7665_v19 = vadd.f32 %v6983_v24, %v2275_v43 }
 0x40c   :  { %v3573_v47 = vadd.f32 %v3572_v38, %v7653_v0 }
 0x40d   :  { %10540 = vst [vmem:[#allocation212_spill] sm:$0xff] %v7665_v19 }
 0x40e   :  { %v3574_v58 = vadd.f32 %v3573_v47, %v7657_v20 }
 0x410   :  { %v3575_v23 = vadd.f32 %v3574_v58, %v7661_v32 }
 0x412   :  { %v2277_v17 = vpop.f32.mrf.mxu3  ;;  %v3576_v28 = vadd.f32 %v3575_v23, %v7665_v19 }
 0x413   :  { %v7669_v39 = vadd.f32 %v6983_v24, %v2277_v17 }
 0x415   :  { %10541 = vst [vmem:[#allocation213_spill] sm:$0xff] %v7669_v39  ;;  %v3577_v38 = vadd.f32 %v3576_v28, %v7669_v39 }
 0x41a   :  { %v2280_v54 = vpop.f32.mrf.mxu3 }
 0x41b   :  { %v7673_v37 = vadd.f32 %v6983_v24, %v2280_v54 }
 0x41d   :  { %10542 = vst [vmem:[#allocation214_spill] sm:$0xff] %v7673_v37  ;;  %v3578_v22 = vadd.f32 %v3577_v38, %v7673_v37 }
 0x422   :  { %v2282_v29 = vpop.f32.mrf.mxu3 }
 0x423   :  { %v7677_v20 = vadd.f32 %v6983_v24, %v2282_v29 }
 0x425   :  { %10543 = vst [vmem:[#allocation215_spill] sm:$0xff] %v7677_v20  ;;  %v3579_v58 = vadd.f32 %v3578_v22, %v7677_v20 }
 0x42a   :  { %v2285_v48 = vpop.f32.mrf.mxu3 }
 0x42b   :  { %v7681_v43 = vadd.f32 %v6983_v24, %v2285_v48 }
 0x42d   :  { %10544 = vst [vmem:[#allocation216_spill] sm:$0xff] %v7681_v43  ;;  %v3580_v23 = vadd.f32 %v3579_v58, %v7681_v43 }
 0x432   :  { %v2287_v42 = vpop.f32.mrf.mxu3 }
 0x433   :  { %v7685_v19 = vadd.f32 %v6983_v24, %v2287_v42 }
 0x435   :  { %10545 = vst [vmem:[#allocation217_spill] sm:$0xff] %v7685_v19  ;;  %v3581_v54 = vadd.f32 %v3580_v23, %v7685_v19 }
 0x43a   :  { %v2290_v4 = vpop.f32.mrf.mxu3 }
 0x43b   :  { %v7689_v28 = vadd.f32 %v6983_v24, %v2290_v4  ;;  %v5974_v4 = vmov 2048.0  }
 0x43c   :  { %5887 = vrcp.f32 %v5974_v4  ;;  %v10557_v4 = vld [vmem:[#allocation74_spill] sm:$0xff] }
 0x43d   :  { %10546 = vst [vmem:[#allocation218_spill] sm:$0xff] %v7689_v28  ;;  %v3582_v38 = vadd.f32 %v3581_v54, %v7689_v28 }
 0x442   :  { %v2292_v47 = vpop.f32.mrf.mxu3  ;;  %v5888_v54 = vpop.eup %5887 }
 0x443   :  { %v7693_v29 = vadd.f32 %v6983_v24, %v2292_v47  ;;  %v3593_v47 = vmul.f32 2048.0, %v5888_v54  ;;  %vm3597_vm0 = vweird.f32 %v5888_v54 }
 0x445   :  { %10547 = vst [vmem:[#allocation219_spill] sm:$0xff] %v7693_v29  ;;  %v3583_v48 = vadd.f32 %v3582_v38, %v7693_v29  ;;  %v3594_v37 = vsub.f32 1.0, %v3593_v47 }
 0x447   :  { %v3595_v38 = vmul.f32 %v5888_v54, %v3594_v37 }
 0x44a   :  { %v2295_v17 = vpop.f32.mrf.mxu3 }
 0x44b   :  { %v7697_v20 = vadd.f32 %v6983_v24, %v2295_v17  ;;  %v3596_v17 = vadd.f32 %v5888_v54, %v3595_v38 }
 0x44d   :  { %v3584_v58 = vadd.f32 %v3583_v48, %v7697_v20  ;;  %v7704_v48 = vsel %vm3597_vm0, %v5888_v54, %v3596_v17  ;;  %v10559_v17 = vld [vmem:[#allocation75_spill] sm:$0xff] }
 0x44e   :  { %10548 = vst [vmem:[#allocation220_spill] sm:$0xff] %v7704_v48 }
 0x452   :  { %v2297_v22 = vpop.f32.mrf.mxu3 }
 0x453   :  { %v7701_v42 = vadd.f32 %v6983_v24, %v2297_v22  ;;  %v10549_v22 = vld [vmem:[#allocation70_spill] sm:$0xff] }
 0x455   :  { %v3585_v23 = vadd.f32 %v3584_v58, %v7701_v42 }
 0x457   :  { %v3586_v19 = vrot.slane %v3585_v23, 4 }
 0x459   :  { %v3587_v28 = vadd.f32 %v3586_v19, %v3585_v23  ;;  %v10551_v19 = vld [vmem:[#allocation69_spill] sm:$0xff] }
 0x45b   :  { %v3588_v43 = vrot.slane %v3587_v28, 2 }
 0x45d   :  { %v3589_v39 = vadd.f32 %v3588_v43, %v3587_v28  ;;  %v10553_v43 = vld [vmem:[#allocation71_spill] sm:$0xff] }
 0x45f   :  { %v3590_v29 = vrot.slane %v3589_v39, 1 }
 0x461   :  { %v3591_v32 = vadd.f32 %v3590_v29, %v3589_v39 }
 0x463   :  { %v7707_v24 = vmul.f32 %v7704_v48, %v3591_v32  ;;  %v10555_v32 = vld [vmem:[#allocation73_spill] sm:$0xff] }
 0x464   :  { %v10563_v48 = vld [vmem:[#allocation77_spill] sm:$0xff] }
 0x465   :  { %v7711_v58 = vsub.f32 %v10549_v22, %v7707_v24  ;;  %v7715_v23 = vsub.f32 %v10551_v19, %v7707_v24  ;;  %v7719_v37 = vsub.f32 %v10553_v43, %v7707_v24  ;;  %v7727_v29 = vsub.f32 %v10555_v32, %v7707_v24 }
 0x466   :  { %v7731_v54 = vsub.f32 %v10557_v4, %v7707_v24  ;;  %v7737_v22 = vsub.f32 %v10559_v17, %v7707_v24  ;;  %v10565_v17 = vld [vmem:[#allocation78_spill] sm:$0xff] }
 0x467   :  { %10550 = vst [vmem:[#allocation70_spill] sm:$0xff] %v7711_v58  ;;  %v3856_v39 = vmul.f32 %v7711_v58, %v7711_v58  ;;  %v3857_v28 = vmul.f32 %v7715_v23, %v7715_v23  ;;  %v3858_v47 = vmul.f32 %v7719_v37, %v7719_v37  ;;  %v3859_v19 = vmul.f32 %v7727_v29, %v7727_v29 }
 0x468   :  { %10552 = vst [vmem:[#allocation69_spill] sm:$0xff] %v7715_v23  ;;  %v10561_v23 = vld [vmem:[#allocation76_spill] sm:$0xff]  ;;  %v3860_v4 = vmul.f32 %v7731_v54, %v7731_v54 }
 0x469   :  { %10554 = vst [vmem:[#allocation71_spill] sm:$0xff] %v7719_v37  ;;  %v4112_v38 = vadd.f32 %v3857_v28, %v3856_v39  ;;  %v7743_v32 = vsub.f32 %v10561_v23, %v7707_v24  ;;  %v7749_v37 = vsub.f32 %v10563_v48, %v7707_v24  ;;  %v3861_v39 = vmul.f32 %v7737_v22, %v7737_v22 }
 0x46a   :  { %10556 = vst [vmem:[#allocation73_spill] sm:$0xff] %v7727_v29  ;;  %v7755_v29 = vsub.f32 %v10565_v17, %v7707_v24  ;;  %v10571_v17 = vld [vmem:[#allocation81_spill] sm:$0xff] }
 0x46b   :  { %10558 = vst [vmem:[#allocation74_spill] sm:$0xff] %v7731_v54  ;;  %v4113_v43 = vadd.f32 %v4112_v38, %v3858_v47  ;;  %v3862_v23 = vmul.f32 %v7743_v32, %v7743_v32  ;;  %v10567_v38 = vld [vmem:[#allocation79_spill] sm:$0xff]  ;;  %v3863_v48 = vmul.f32 %v7749_v37, %v7749_v37 }
 0x46c   :  { %10560 = vst [vmem:[#allocation75_spill] sm:$0xff] %v7737_v22  ;;  %v7761_v54 = vsub.f32 %v10567_v38, %v7707_v24  ;;  %v10573_v38 = vld [vmem:[#allocation82_spill] sm:$0xff] }
 0x46d   :  { %10562 = vst [vmem:[#allocation76_spill] sm:$0xff] %v7743_v32  ;;  %v4114_v58 = vadd.f32 %v4113_v43, %v3859_v19  ;;  %v10569_v43 = vld [vmem:[#allocation80_spill] sm:$0xff]  ;;  %v7773_v32 = vsub.f32 %v10571_v17, %v7707_v24 }
 0x46e   :  { %10564 = vst [vmem:[#allocation77_spill] sm:$0xff] %v7749_v37  ;;  %v7767_v22 = vsub.f32 %v10569_v43, %v7707_v24  ;;  %v7779_v37 = vsub.f32 %v10573_v38, %v7707_v24  ;;  %v10575_v43 = vld [vmem:[#allocation83_spill] sm:$0xff]  ;;  %v10577_v17 = vld [vmem:[#allocation84_spill] sm:$0xff]  ;;  %v10579_v38 = vld [vmem:[#allocation85_spill] sm:$0xff] }
 0x46f   :  { %v4115_v28 = vadd.f32 %v4114_v58, %v3860_v4  ;;  %10566 = vst [vmem:[#allocation78_spill] sm:$0xff] %v7755_v29  ;;  %v3864_v58 = vmul.f32 %v7755_v29, %v7755_v29  ;;  %v7785_v29 = vsub.f32 %v10575_v43, %v7707_v24  ;;  %v10581_v43 = vld [vmem:[#allocation86_spill] sm:$0xff] }
 0x470   :  { %10568 = vst [vmem:[#allocation79_spill] sm:$0xff] %v7761_v54 }
 0x471   :  { %v4116_v47 = vadd.f32 %v4115_v28, %v3861_v39  ;;  %10570 = vst [vmem:[#allocation80_spill] sm:$0xff] %v7767_v22  ;;  %v3865_v39 = vmul.f32 %v7761_v54, %v7761_v54  ;;  %v7791_v54 = vsub.f32 %v10577_v17, %v7707_v24  ;;  %v10583_v17 = vld [vmem:[#allocation87_spill] sm:$0xff] }
 0x472   :  { %10572 = vst [vmem:[#allocation81_spill] sm:$0xff] %v7773_v32 }
 0x473   :  { %v4117_v19 = vadd.f32 %v4116_v47, %v3862_v23  ;;  %10574 = vst [vmem:[#allocation82_spill] sm:$0xff] %v7779_v37  ;;  %v3866_v23 = vmul.f32 %v7767_v22, %v7767_v22  ;;  %v7797_v22 = vsub.f32 %v10579_v38, %v7707_v24  ;;  %v10585_v38 = vld [vmem:[#allocation88_spill] sm:$0xff] }
 0x474   :  { %10576 = vst [vmem:[#allocation83_spill] sm:$0xff] %v7785_v29 }
 0x475   :  { %v4118_v4 = vadd.f32 %v4117_v19, %v3863_v48  ;;  %v3867_v48 = vmul.f32 %v7773_v32, %v7773_v32  ;;  %10578 = vst [vmem:[#allocation84_spill] sm:$0xff] %v7791_v54  ;;  %v7803_v32 = vsub.f32 %v10581_v43, %v7707_v24  ;;  %v10587_v43 = vld [vmem:[#allocation89_spill] sm:$0xff] }
 0x476   :  { %10580 = vst [vmem:[#allocation85_spill] sm:$0xff] %v7797_v22 }
 0x477   :  { %v4119_v28 = vadd.f32 %v4118_v4, %v3864_v58  ;;  %v3868_v58 = vmul.f32 %v7779_v37, %v7779_v37  ;;  %10582 = vst [vmem:[#allocation86_spill] sm:$0xff] %v7803_v32  ;;  %v7809_v37 = vsub.f32 %v10583_v17, %v7707_v24  ;;  %v10589_v17 = vld [vmem:[#allocation91_spill] sm:$0xff] }
 0x479   :  { %v4120_v47 = vadd.f32 %v4119_v28, %v3865_v39  ;;  %v3869_v39 = vmul.f32 %v7785_v29, %v7785_v29  ;;  %10584 = vst [vmem:[#allocation87_spill] sm:$0xff] %v7809_v37  ;;  %v7815_v29 = vsub.f32 %v10585_v38, %v7707_v24  ;;  %v10591_v38 = vld [vmem:[#allocation92_spill] sm:$0xff] }
 0x47b   :  { %v4121_v19 = vadd.f32 %v4120_v47, %v3866_v23  ;;  %v3870_v23 = vmul.f32 %v7791_v54, %v7791_v54  ;;  %10586 = vst [vmem:[#allocation88_spill] sm:$0xff] %v7815_v29  ;;  %v7821_v54 = vsub.f32 %v10587_v43, %v7707_v24  ;;  %v10593_v43 = vld [vmem:[#allocation93_spill] sm:$0xff] }
 0x47d   :  { %v4122_v4 = vadd.f32 %v4121_v19, %v3867_v48  ;;  %v3871_v48 = vmul.f32 %v7797_v22, %v7797_v22  ;;  %10588 = vst [vmem:[#allocation89_spill] sm:$0xff] %v7821_v54  ;;  %v7827_v22 = vsub.f32 %v10589_v17, %v7707_v24  ;;  %v10595_v17 = vld [vmem:[#allocation94_spill] sm:$0xff] }
 0x47f   :  { %v4123_v28 = vadd.f32 %v4122_v4, %v3868_v58  ;;  %v3872_v58 = vmul.f32 %v7803_v32, %v7803_v32  ;;  %10590 = vst [vmem:[#allocation91_spill] sm:$0xff] %v7827_v22  ;;  %v7833_v32 = vsub.f32 %v10591_v38, %v7707_v24  ;;  %v10597_v38 = vld [vmem:[#allocation96_spill] sm:$0xff] }
 0x481   :  { %v4124_v47 = vadd.f32 %v4123_v28, %v3869_v39  ;;  %v3873_v39 = vmul.f32 %v7809_v37, %v7809_v37  ;;  %10592 = vst [vmem:[#allocation92_spill] sm:$0xff] %v7833_v32  ;;  %v7839_v37 = vsub.f32 %v10593_v43, %v7707_v24  ;;  %v10599_v43 = vld [vmem:[#allocation97_spill] sm:$0xff] }
 0x483   :  { %v4125_v19 = vadd.f32 %v4124_v47, %v3870_v23  ;;  %v3874_v23 = vmul.f32 %v7815_v29, %v7815_v29  ;;  %10594 = vst [vmem:[#allocation93_spill] sm:$0xff] %v7839_v37  ;;  %v7845_v29 = vsub.f32 %v10595_v17, %v7707_v24  ;;  %v10601_v17 = vld [vmem:[#allocation98_spill] sm:$0xff] }
 0x485   :  { %v4126_v4 = vadd.f32 %v4125_v19, %v3871_v48  ;;  %v3875_v48 = vmul.f32 %v7821_v54, %v7821_v54  ;;  %10596 = vst [vmem:[#allocation94_spill] sm:$0xff] %v7845_v29  ;;  %v7851_v54 = vsub.f32 %v10597_v38, %v7707_v24  ;;  %v10603_v38 = vld [vmem:[#allocation99_spill] sm:$0xff] }
 0x487   :  { %v4127_v28 = vadd.f32 %v4126_v4, %v3872_v58  ;;  %v3876_v58 = vmul.f32 %v7827_v22, %v7827_v22  ;;  %10598 = vst [vmem:[#allocation96_spill] sm:$0xff] %v7851_v54  ;;  %v7857_v22 = vsub.f32 %v10599_v43, %v7707_v24  ;;  %v10605_v43 = vld [vmem:[#allocation101_spill] sm:$0xff] }
 0x489   :  { %v4128_v47 = vadd.f32 %v4127_v28, %v3873_v39  ;;  %v3877_v39 = vmul.f32 %v7833_v32, %v7833_v32  ;;  %10600 = vst [vmem:[#allocation97_spill] sm:$0xff] %v7857_v22  ;;  %v7863_v32 = vsub.f32 %v10601_v17, %v7707_v24  ;;  %v10607_v17 = vld [vmem:[#allocation102_spill] sm:$0xff] }
 0x48b   :  { %v4129_v19 = vadd.f32 %v4128_v47, %v3874_v23  ;;  %v3878_v23 = vmul.f32 %v7839_v37, %v7839_v37  ;;  %10602 = vst [vmem:[#allocation98_spill] sm:$0xff] %v7863_v32  ;;  %v7869_v37 = vsub.f32 %v10603_v38, %v7707_v24  ;;  %v10609_v38 = vld [vmem:[#allocation103_spill] sm:$0xff] }
 0x48d   :  { %v4130_v4 = vadd.f32 %v4129_v19, %v3875_v48  ;;  %v3879_v48 = vmul.f32 %v7845_v29, %v7845_v29  ;;  %10604 = vst [vmem:[#allocation99_spill] sm:$0xff] %v7869_v37  ;;  %v7875_v29 = vsub.f32 %v10605_v43, %v7707_v24  ;;  %v10611_v43 = vld [vmem:[#allocation104_spill] sm:$0xff] }
 0x48f   :  { %v4131_v28 = vadd.f32 %v4130_v4, %v3876_v58  ;;  %v3880_v58 = vmul.f32 %v7851_v54, %v7851_v54  ;;  %10606 = vst [vmem:[#allocation101_spill] sm:$0xff] %v7875_v29  ;;  %v7881_v54 = vsub.f32 %v10607_v17, %v7707_v24  ;;  %v10613_v17 = vld [vmem:[#allocation106_spill] sm:$0xff] }
 0x491   :  { %v4132_v47 = vadd.f32 %v4131_v28, %v3877_v39  ;;  %v3881_v39 = vmul.f32 %v7857_v22, %v7857_v22  ;;  %10608 = vst [vmem:[#allocation102_spill] sm:$0xff] %v7881_v54  ;;  %v7887_v22 = vsub.f32 %v10609_v38, %v7707_v24  ;;  %v10615_v38 = vld [vmem:[#allocation107_spill] sm:$0xff] }
 0x493   :  { %v4133_v19 = vadd.f32 %v4132_v47, %v3878_v23  ;;  %v3882_v23 = vmul.f32 %v7863_v32, %v7863_v32  ;;  %10610 = vst [vmem:[#allocation103_spill] sm:$0xff] %v7887_v22  ;;  %v7893_v32 = vsub.f32 %v10611_v43, %v7707_v24  ;;  %v10617_v43 = vld [vmem:[#allocation108_spill] sm:$0xff] }
 0x495   :  { %v4134_v4 = vadd.f32 %v4133_v19, %v3879_v48  ;;  %v3883_v48 = vmul.f32 %v7869_v37, %v7869_v37  ;;  %10612 = vst [vmem:[#allocation104_spill] sm:$0xff] %v7893_v32  ;;  %v7899_v37 = vsub.f32 %v10613_v17, %v7707_v24  ;;  %v10619_v17 = vld [vmem:[#allocation109_spill] sm:$0xff] }
 0x497   :  { %v4135_v28 = vadd.f32 %v4134_v4, %v3880_v58  ;;  %v3884_v58 = vmul.f32 %v7875_v29, %v7875_v29  ;;  %10614 = vst [vmem:[#allocation106_spill] sm:$0xff] %v7899_v37  ;;  %v7905_v29 = vsub.f32 %v10615_v38, %v7707_v24  ;;  %v10621_v38 = vld [vmem:[#allocation111_spill] sm:$0xff] }
 0x499   :  { %v4136_v47 = vadd.f32 %v4135_v28, %v3881_v39  ;;  %v3885_v39 = vmul.f32 %v7881_v54, %v7881_v54  ;;  %10616 = vst [vmem:[#allocation107_spill] sm:$0xff] %v7905_v29  ;;  %v7911_v54 = vsub.f32 %v10617_v43, %v7707_v24  ;;  %v10623_v43 = vld [vmem:[#allocation112_spill] sm:$0xff] }
 0x49b   :  { %v4137_v19 = vadd.f32 %v4136_v47, %v3882_v23  ;;  %v3886_v23 = vmul.f32 %v7887_v22, %v7887_v22  ;;  %10618 = vst [vmem:[#allocation108_spill] sm:$0xff] %v7911_v54  ;;  %v7917_v22 = vsub.f32 %v10619_v17, %v7707_v24  ;;  %v10625_v17 = vld [vmem:[#allocation113_spill] sm:$0xff] }
 0x49d   :  { %v4138_v4 = vadd.f32 %v4137_v19, %v3883_v48  ;;  %v3887_v48 = vmul.f32 %v7893_v32, %v7893_v32  ;;  %10620 = vst [vmem:[#allocation109_spill] sm:$0xff] %v7917_v22  ;;  %v7923_v32 = vsub.f32 %v10621_v38, %v7707_v24  ;;  %v10627_v38 = vld [vmem:[#allocation114_spill] sm:$0xff] }
 0x49f   :  { %v4139_v28 = vadd.f32 %v4138_v4, %v3884_v58  ;;  %v3888_v58 = vmul.f32 %v7899_v37, %v7899_v37  ;;  %10622 = vst [vmem:[#allocation111_spill] sm:$0xff] %v7923_v32  ;;  %v7929_v37 = vsub.f32 %v10623_v43, %v7707_v24  ;;  %v10629_v43 = vld [vmem:[#allocation115_spill] sm:$0xff] }
 0x4a1   :  { %v4140_v47 = vadd.f32 %v4139_v28, %v3885_v39  ;;  %v3889_v39 = vmul.f32 %v7905_v29, %v7905_v29  ;;  %10624 = vst [vmem:[#allocation112_spill] sm:$0xff] %v7929_v37  ;;  %v7935_v29 = vsub.f32 %v10625_v17, %v7707_v24  ;;  %v10631_v17 = vld [vmem:[#allocation117_spill] sm:$0xff] }
 0x4a3   :  { %v4141_v19 = vadd.f32 %v4140_v47, %v3886_v23  ;;  %v3890_v23 = vmul.f32 %v7911_v54, %v7911_v54  ;;  %10626 = vst [vmem:[#allocation113_spill] sm:$0xff] %v7935_v29  ;;  %v7941_v54 = vsub.f32 %v10627_v38, %v7707_v24  ;;  %v10633_v38 = vld [vmem:[#allocation118_spill] sm:$0xff] }
 0x4a5   :  { %v4142_v4 = vadd.f32 %v4141_v19, %v3887_v48  ;;  %v3891_v48 = vmul.f32 %v7917_v22, %v7917_v22  ;;  %10628 = vst [vmem:[#allocation114_spill] sm:$0xff] %v7941_v54  ;;  %v7947_v22 = vsub.f32 %v10629_v43, %v7707_v24  ;;  %v10635_v43 = vld [vmem:[#allocation119_spill] sm:$0xff] }
 0x4a7   :  { %v4143_v28 = vadd.f32 %v4142_v4, %v3888_v58  ;;  %v3892_v58 = vmul.f32 %v7923_v32, %v7923_v32  ;;  %10630 = vst [vmem:[#allocation115_spill] sm:$0xff] %v7947_v22  ;;  %v7953_v32 = vsub.f32 %v10631_v17, %v7707_v24  ;;  %v10637_v17 = vld [vmem:[#allocation120_spill] sm:$0xff] }
 0x4a9   :  { %v4144_v47 = vadd.f32 %v4143_v28, %v3889_v39  ;;  %v3893_v39 = vmul.f32 %v7929_v37, %v7929_v37  ;;  %10632 = vst [vmem:[#allocation117_spill] sm:$0xff] %v7953_v32  ;;  %v7959_v37 = vsub.f32 %v10633_v38, %v7707_v24  ;;  %v10639_v38 = vld [vmem:[#allocation121_spill] sm:$0xff] }
 0x4ab   :  { %v4145_v19 = vadd.f32 %v4144_v47, %v3890_v23  ;;  %v3894_v23 = vmul.f32 %v7935_v29, %v7935_v29  ;;  %10634 = vst [vmem:[#allocation118_spill] sm:$0xff] %v7959_v37  ;;  %v7965_v29 = vsub.f32 %v10635_v43, %v7707_v24  ;;  %v10641_v43 = vld [vmem:[#allocation123_spill] sm:$0xff] }
 0x4ad   :  { %v4146_v4 = vadd.f32 %v4145_v19, %v3891_v48  ;;  %v3895_v48 = vmul.f32 %v7941_v54, %v7941_v54  ;;  %10636 = vst [vmem:[#allocation119_spill] sm:$0xff] %v7965_v29  ;;  %v7971_v54 = vsub.f32 %v10637_v17, %v7707_v24  ;;  %v10643_v17 = vld [vmem:[#allocation124_spill] sm:$0xff] }
 0x4af   :  { %v4147_v28 = vadd.f32 %v4146_v4, %v3892_v58  ;;  %v3896_v58 = vmul.f32 %v7947_v22, %v7947_v22  ;;  %10638 = vst [vmem:[#allocation120_spill] sm:$0xff] %v7971_v54  ;;  %v7977_v22 = vsub.f32 %v10639_v38, %v7707_v24  ;;  %v10645_v38 = vld [vmem:[#allocation125_spill] sm:$0xff] }
 0x4b1   :  { %v4148_v47 = vadd.f32 %v4147_v28, %v3893_v39  ;;  %v3897_v39 = vmul.f32 %v7953_v32, %v7953_v32  ;;  %10640 = vst [vmem:[#allocation121_spill] sm:$0xff] %v7977_v22  ;;  %v7983_v32 = vsub.f32 %v10641_v43, %v7707_v24  ;;  %v10647_v43 = vld [vmem:[#allocation126_spill] sm:$0xff] }
 0x4b3   :  { %v4149_v19 = vadd.f32 %v4148_v47, %v3894_v23  ;;  %v3898_v23 = vmul.f32 %v7959_v37, %v7959_v37  ;;  %10642 = vst [vmem:[#allocation123_spill] sm:$0xff] %v7983_v32  ;;  %v7989_v37 = vsub.f32 %v10643_v17, %v7707_v24  ;;  %v10649_v17 = vld [vmem:[#allocation127_spill] sm:$0xff] }
 0x4b5   :  { %v4150_v4 = vadd.f32 %v4149_v19, %v3895_v48  ;;  %v3899_v48 = vmul.f32 %v7965_v29, %v7965_v29  ;;  %10644 = vst [vmem:[#allocation124_spill] sm:$0xff] %v7989_v37  ;;  %v7995_v29 = vsub.f32 %v10645_v38, %v7707_v24  ;;  %v10651_v38 = vld [vmem:[#allocation129_spill] sm:$0xff] }
 0x4b7   :  { %v4151_v28 = vadd.f32 %v4150_v4, %v3896_v58  ;;  %v3900_v58 = vmul.f32 %v7971_v54, %v7971_v54  ;;  %10646 = vst [vmem:[#allocation125_spill] sm:$0xff] %v7995_v29  ;;  %v8001_v54 = vsub.f32 %v10647_v43, %v7707_v24  ;;  %v10653_v43 = vld [vmem:[#allocation130_spill] sm:$0xff] }
 0x4b9   :  { %v4152_v47 = vadd.f32 %v4151_v28, %v3897_v39  ;;  %v3901_v39 = vmul.f32 %v7977_v22, %v7977_v22  ;;  %10648 = vst [vmem:[#allocation126_spill] sm:$0xff] %v8001_v54  ;;  %v8007_v22 = vsub.f32 %v10649_v17, %v7707_v24  ;;  %v10655_v17 = vld [vmem:[#allocation131_spill] sm:$0xff] }
 0x4bb   :  { %v4153_v19 = vadd.f32 %v4152_v47, %v3898_v23  ;;  %v3902_v23 = vmul.f32 %v7983_v32, %v7983_v32  ;;  %10650 = vst [vmem:[#allocation127_spill] sm:$0xff] %v8007_v22  ;;  %v8013_v32 = vsub.f32 %v10651_v38, %v7707_v24  ;;  %v10657_v38 = vld [vmem:[#allocation132_spill] sm:$0xff] }
 0x4bd   :  { %v4154_v4 = vadd.f32 %v4153_v19, %v3899_v48  ;;  %v3903_v48 = vmul.f32 %v7989_v37, %v7989_v37  ;;  %10652 = vst [vmem:[#allocation129_spill] sm:$0xff] %v8013_v32  ;;  %v8019_v37 = vsub.f32 %v10653_v43, %v7707_v24  ;;  %v10659_v43 = vld [vmem:[#allocation133_spill] sm:$0xff] }
 0x4bf   :  { %v4155_v28 = vadd.f32 %v4154_v4, %v3900_v58  ;;  %v3904_v58 = vmul.f32 %v7995_v29, %v7995_v29  ;;  %10654 = vst [vmem:[#allocation130_spill] sm:$0xff] %v8019_v37  ;;  %v8025_v29 = vsub.f32 %v10655_v17, %v7707_v24  ;;  %v10661_v17 = vld [vmem:[#allocation135_spill] sm:$0xff] }
 0x4c1   :  { %v4156_v47 = vadd.f32 %v4155_v28, %v3901_v39  ;;  %v3905_v39 = vmul.f32 %v8001_v54, %v8001_v54  ;;  %10656 = vst [vmem:[#allocation131_spill] sm:$0xff] %v8025_v29  ;;  %v8031_v54 = vsub.f32 %v10657_v38, %v7707_v24  ;;  %v10663_v38 = vld [vmem:[#allocation136_spill] sm:$0xff] }
 0x4c3   :  { %v4157_v19 = vadd.f32 %v4156_v47, %v3902_v23  ;;  %v3906_v23 = vmul.f32 %v8007_v22, %v8007_v22  ;;  %10658 = vst [vmem:[#allocation132_spill] sm:$0xff] %v8031_v54  ;;  %v8037_v22 = vsub.f32 %v10659_v43, %v7707_v24  ;;  %v10665_v43 = vld [vmem:[#allocation137_spill] sm:$0xff] }
 0x4c5   :  { %v4158_v4 = vadd.f32 %v4157_v19, %v3903_v48  ;;  %v3907_v48 = vmul.f32 %v8013_v32, %v8013_v32  ;;  %10660 = vst [vmem:[#allocation133_spill] sm:$0xff] %v8037_v22  ;;  %v8043_v32 = vsub.f32 %v10661_v17, %v7707_v24  ;;  %v10667_v17 = vld [vmem:[#allocation138_spill] sm:$0xff] }
 0x4c7   :  { %v4159_v28 = vadd.f32 %v4158_v4, %v3904_v58  ;;  %v3908_v58 = vmul.f32 %v8019_v37, %v8019_v37  ;;  %10662 = vst [vmem:[#allocation135_spill] sm:$0xff] %v8043_v32  ;;  %v8049_v37 = vsub.f32 %v10663_v38, %v7707_v24  ;;  %v10669_v38 = vld [vmem:[#allocation139_spill] sm:$0xff] }
 0x4c9   :  { %v4160_v47 = vadd.f32 %v4159_v28, %v3905_v39  ;;  %v3909_v39 = vmul.f32 %v8025_v29, %v8025_v29  ;;  %10664 = vst [vmem:[#allocation136_spill] sm:$0xff] %v8049_v37  ;;  %v8055_v29 = vsub.f32 %v10665_v43, %v7707_v24  ;;  %v10671_v43 = vld [vmem:[#allocation141_spill] sm:$0xff] }
 0x4cb   :  { %v4161_v19 = vadd.f32 %v4160_v47, %v3906_v23  ;;  %v3910_v23 = vmul.f32 %v8031_v54, %v8031_v54  ;;  %10666 = vst [vmem:[#allocation137_spill] sm:$0xff] %v8055_v29  ;;  %v8061_v54 = vsub.f32 %v10667_v17, %v7707_v24  ;;  %v10673_v17 = vld [vmem:[#allocation142_spill] sm:$0xff] }
 0x4cd   :  { %v4162_v4 = vadd.f32 %v4161_v19, %v3907_v48  ;;  %v3911_v48 = vmul.f32 %v8037_v22, %v8037_v22  ;;  %10668 = vst [vmem:[#allocation138_spill] sm:$0xff] %v8061_v54  ;;  %v8067_v22 = vsub.f32 %v10669_v38, %v7707_v24  ;;  %v10675_v38 = vld [vmem:[#allocation143_spill] sm:$0xff] }
 0x4cf   :  { %v4163_v28 = vadd.f32 %v4162_v4, %v3908_v58  ;;  %v3912_v58 = vmul.f32 %v8043_v32, %v8043_v32  ;;  %10670 = vst [vmem:[#allocation139_spill] sm:$0xff] %v8067_v22  ;;  %v8073_v32 = vsub.f32 %v10671_v43, %v7707_v24  ;;  %v10677_v43 = vld [vmem:[#allocation144_spill] sm:$0xff] }
 0x4d1   :  { %v4164_v47 = vadd.f32 %v4163_v28, %v3909_v39  ;;  %v3913_v39 = vmul.f32 %v8049_v37, %v8049_v37  ;;  %10672 = vst [vmem:[#allocation141_spill] sm:$0xff] %v8073_v32  ;;  %v8079_v37 = vsub.f32 %v10673_v17, %v7707_v24  ;;  %v10679_v17 = vld [vmem:[#allocation146_spill] sm:$0xff] }
 0x4d3   :  { %v4165_v19 = vadd.f32 %v4164_v47, %v3910_v23  ;;  %v3914_v23 = vmul.f32 %v8055_v29, %v8055_v29  ;;  %10674 = vst [vmem:[#allocation142_spill] sm:$0xff] %v8079_v37  ;;  %v8085_v29 = vsub.f32 %v10675_v38, %v7707_v24  ;;  %v10681_v38 = vld [vmem:[#allocation147_spill] sm:$0xff] }
 0x4d5   :  { %v4166_v4 = vadd.f32 %v4165_v19, %v3911_v48  ;;  %v3915_v48 = vmul.f32 %v8061_v54, %v8061_v54  ;;  %10676 = vst [vmem:[#allocation143_spill] sm:$0xff] %v8085_v29  ;;  %v8091_v54 = vsub.f32 %v10677_v43, %v7707_v24  ;;  %v10683_v43 = vld [vmem:[#allocation148_spill] sm:$0xff] }
 0x4d7   :  { %v4167_v28 = vadd.f32 %v4166_v4, %v3912_v58  ;;  %v3916_v58 = vmul.f32 %v8067_v22, %v8067_v22  ;;  %10678 = vst [vmem:[#allocation144_spill] sm:$0xff] %v8091_v54  ;;  %v8097_v22 = vsub.f32 %v10679_v17, %v7707_v24  ;;  %v10685_v17 = vld [vmem:[#allocation149_spill] sm:$0xff] }
 0x4d9   :  { %v4168_v47 = vadd.f32 %v4167_v28, %v3913_v39  ;;  %v3917_v39 = vmul.f32 %v8073_v32, %v8073_v32  ;;  %10680 = vst [vmem:[#allocation146_spill] sm:$0xff] %v8097_v22  ;;  %v8103_v32 = vsub.f32 %v10681_v38, %v7707_v24  ;;  %v10687_v38 = vld [vmem:[#allocation11_spill] sm:$0xff] }
 0x4db   :  { %v4169_v19 = vadd.f32 %v4168_v47, %v3914_v23  ;;  %v3918_v23 = vmul.f32 %v8079_v37, %v8079_v37  ;;  %10682 = vst [vmem:[#allocation147_spill] sm:$0xff] %v8103_v32  ;;  %v8109_v37 = vsub.f32 %v10683_v43, %v7707_v24  ;;  %v10689_v43 = vld [vmem:[#allocation12_spill] sm:$0xff] }
 0x4dd   :  { %v4170_v4 = vadd.f32 %v4169_v19, %v3915_v48  ;;  %v3919_v48 = vmul.f32 %v8085_v29, %v8085_v29  ;;  %10684 = vst [vmem:[#allocation148_spill] sm:$0xff] %v8109_v37  ;;  %v8115_v29 = vsub.f32 %v10685_v17, %v7707_v24  ;;  %v10691_v17 = vld [vmem:[#allocation13_spill] sm:$0xff] }
 0x4df   :  { %v4171_v28 = vadd.f32 %v4170_v4, %v3916_v58  ;;  %v3920_v58 = vmul.f32 %v8091_v54, %v8091_v54  ;;  %10686 = vst [vmem:[#allocation149_spill] sm:$0xff] %v8115_v29  ;;  %v8121_v54 = vsub.f32 %v10687_v38, %v7707_v24  ;;  %v10693_v38 = vld [vmem:[#allocation14_spill] sm:$0xff] }
 0x4e1   :  { %v4172_v47 = vadd.f32 %v4171_v28, %v3917_v39  ;;  %v3921_v39 = vmul.f32 %v8097_v22, %v8097_v22  ;;  %10688 = vst [vmem:[#allocation11_spill] sm:$0xff] %v8121_v54  ;;  %v8127_v22 = vsub.f32 %v10689_v43, %v7707_v24  ;;  %v10695_v43 = vld [vmem:[#allocation15_spill] sm:$0xff] }
 0x4e3   :  { %v4173_v19 = vadd.f32 %v4172_v47, %v3918_v23  ;;  %v3922_v23 = vmul.f32 %v8103_v32, %v8103_v32  ;;  %10690 = vst [vmem:[#allocation12_spill] sm:$0xff] %v8127_v22  ;;  %v8133_v32 = vsub.f32 %v10691_v17, %v7707_v24  ;;  %v10697_v17 = vld [vmem:[#allocation16_spill] sm:$0xff] }
 0x4e5   :  { %v4174_v4 = vadd.f32 %v4173_v19, %v3919_v48  ;;  %v3923_v48 = vmul.f32 %v8109_v37, %v8109_v37  ;;  %10692 = vst [vmem:[#allocation13_spill] sm:$0xff] %v8133_v32  ;;  %v8139_v37 = vsub.f32 %v10693_v38, %v7707_v24  ;;  %v10699_v38 = vld [vmem:[#allocation17_spill] sm:$0xff] }
 0x4e7   :  { %v4175_v28 = vadd.f32 %v4174_v4, %v3920_v58  ;;  %v3924_v58 = vmul.f32 %v8115_v29, %v8115_v29  ;;  %10694 = vst [vmem:[#allocation14_spill] sm:$0xff] %v8139_v37  ;;  %v8145_v29 = vsub.f32 %v10695_v43, %v7707_v24  ;;  %v10701_v43 = vld [vmem:[#allocation18_spill] sm:$0xff] }
 0x4e9   :  { %v4176_v47 = vadd.f32 %v4175_v28, %v3921_v39  ;;  %v3925_v39 = vmul.f32 %v8121_v54, %v8121_v54  ;;  %10696 = vst [vmem:[#allocation15_spill] sm:$0xff] %v8145_v29  ;;  %v8151_v54 = vsub.f32 %v10697_v17, %v7707_v24  ;;  %v10703_v17 = vld [vmem:[#allocation19_spill] sm:$0xff] }
 0x4eb   :  { %v4177_v19 = vadd.f32 %v4176_v47, %v3922_v23  ;;  %v3926_v23 = vmul.f32 %v8127_v22, %v8127_v22  ;;  %10698 = vst [vmem:[#allocation16_spill] sm:$0xff] %v8151_v54  ;;  %v8157_v22 = vsub.f32 %v10699_v38, %v7707_v24  ;;  %v10705_v38 = vld [vmem:[#allocation20_spill] sm:$0xff] }
 0x4ed   :  { %v4178_v4 = vadd.f32 %v4177_v19, %v3923_v48  ;;  %v3927_v48 = vmul.f32 %v8133_v32, %v8133_v32  ;;  %10700 = vst [vmem:[#allocation17_spill] sm:$0xff] %v8157_v22  ;;  %v8163_v32 = vsub.f32 %v10701_v43, %v7707_v24  ;;  %v10707_v43 = vld [vmem:[#allocation21_spill] sm:$0xff] }
 0x4ef   :  { %v4179_v28 = vadd.f32 %v4178_v4, %v3924_v58  ;;  %v3928_v58 = vmul.f32 %v8139_v37, %v8139_v37  ;;  %10702 = vst [vmem:[#allocation18_spill] sm:$0xff] %v8163_v32  ;;  %v8169_v37 = vsub.f32 %v10703_v17, %v7707_v24  ;;  %v10709_v17 = vld [vmem:[#allocation22_spill] sm:$0xff] }
 0x4f1   :  { %v4180_v47 = vadd.f32 %v4179_v28, %v3925_v39  ;;  %v3929_v39 = vmul.f32 %v8145_v29, %v8145_v29  ;;  %10704 = vst [vmem:[#allocation19_spill] sm:$0xff] %v8169_v37  ;;  %v8175_v29 = vsub.f32 %v10705_v38, %v7707_v24  ;;  %v10711_v38 = vld [vmem:[#allocation24_spill] sm:$0xff] }
 0x4f3   :  { %v4181_v19 = vadd.f32 %v4180_v47, %v3926_v23  ;;  %v3930_v23 = vmul.f32 %v8151_v54, %v8151_v54  ;;  %10706 = vst [vmem:[#allocation20_spill] sm:$0xff] %v8175_v29  ;;  %v8181_v54 = vsub.f32 %v10707_v43, %v7707_v24  ;;  %v10713_v43 = vld [vmem:[#allocation26_spill] sm:$0xff] }
 0x4f5   :  { %v4182_v4 = vadd.f32 %v4181_v19, %v3927_v48  ;;  %v3931_v48 = vmul.f32 %v8157_v22, %v8157_v22  ;;  %10708 = vst [vmem:[#allocation21_spill] sm:$0xff] %v8181_v54  ;;  %v8187_v22 = vsub.f32 %v10709_v17, %v7707_v24  ;;  %v10715_v17 = vld [vmem:[#allocation28_spill] sm:$0xff] }
 0x4f7   :  { %v4183_v28 = vadd.f32 %v4182_v4, %v3928_v58  ;;  %v3932_v58 = vmul.f32 %v8163_v32, %v8163_v32  ;;  %10710 = vst [vmem:[#allocation22_spill] sm:$0xff] %v8187_v22  ;;  %v8193_v32 = vsub.f32 %v10711_v38, %v7707_v24  ;;  %v10717_v38 = vld [vmem:[#allocation30_spill] sm:$0xff] }
 0x4f9   :  { %v4184_v47 = vadd.f32 %v4183_v28, %v3929_v39  ;;  %v3933_v39 = vmul.f32 %v8169_v37, %v8169_v37  ;;  %10712 = vst [vmem:[#allocation24_spill] sm:$0xff] %v8193_v32  ;;  %v8199_v37 = vsub.f32 %v10713_v43, %v7707_v24  ;;  %v10719_v43 = vld [vmem:[#allocation32_spill] sm:$0xff] }
 0x4fb   :  { %v4185_v19 = vadd.f32 %v4184_v47, %v3930_v23  ;;  %v3934_v23 = vmul.f32 %v8175_v29, %v8175_v29  ;;  %10714 = vst [vmem:[#allocation26_spill] sm:$0xff] %v8199_v37  ;;  %v8205_v29 = vsub.f32 %v10715_v17, %v7707_v24  ;;  %v10721_v17 = vld [vmem:[#allocation34_spill] sm:$0xff] }
 0x4fd   :  { %v4186_v4 = vadd.f32 %v4185_v19, %v3931_v48  ;;  %v3935_v48 = vmul.f32 %v8181_v54, %v8181_v54  ;;  %10716 = vst [vmem:[#allocation28_spill] sm:$0xff] %v8205_v29  ;;  %v8211_v54 = vsub.f32 %v10717_v38, %v7707_v24  ;;  %v10723_v38 = vld [vmem:[#allocation36_spill] sm:$0xff] }
 0x4ff   :  { %v4187_v28 = vadd.f32 %v4186_v4, %v3932_v58  ;;  %v3936_v58 = vmul.f32 %v8187_v22, %v8187_v22  ;;  %10718 = vst [vmem:[#allocation30_spill] sm:$0xff] %v8211_v54  ;;  %v8217_v22 = vsub.f32 %v10719_v43, %v7707_v24  ;;  %v10725_v43 = vld [vmem:[#allocation38_spill] sm:$0xff] }
 0x501   :  { %v4188_v47 = vadd.f32 %v4187_v28, %v3933_v39  ;;  %v3937_v39 = vmul.f32 %v8193_v32, %v8193_v32  ;;  %10720 = vst [vmem:[#allocation32_spill] sm:$0xff] %v8217_v22  ;;  %v8223_v32 = vsub.f32 %v10721_v17, %v7707_v24  ;;  %v10727_v17 = vld [vmem:[#allocation40_spill] sm:$0xff] }
 0x503   :  { %v4189_v19 = vadd.f32 %v4188_v47, %v3934_v23  ;;  %v3938_v23 = vmul.f32 %v8199_v37, %v8199_v37  ;;  %10722 = vst [vmem:[#allocation34_spill] sm:$0xff] %v8223_v32  ;;  %v8229_v37 = vsub.f32 %v10723_v38, %v7707_v24  ;;  %v10729_v38 = vld [vmem:[#allocation42_spill] sm:$0xff] }
 0x505   :  { %v4190_v4 = vadd.f32 %v4189_v19, %v3935_v48  ;;  %v3939_v48 = vmul.f32 %v8205_v29, %v8205_v29  ;;  %10724 = vst [vmem:[#allocation36_spill] sm:$0xff] %v8229_v37  ;;  %v8235_v29 = vsub.f32 %v10725_v43, %v7707_v24  ;;  %v10731_v43 = vld [vmem:[#allocation44_spill] sm:$0xff] }
 0x507   :  { %v4191_v28 = vadd.f32 %v4190_v4, %v3936_v58  ;;  %v3940_v58 = vmul.f32 %v8211_v54, %v8211_v54  ;;  %10726 = vst [vmem:[#allocation38_spill] sm:$0xff] %v8235_v29  ;;  %v8241_v54 = vsub.f32 %v10727_v17, %v7707_v24  ;;  %v10733_v17 = vld [vmem:[#allocation46_spill] sm:$0xff] }
 0x509   :  { %v4192_v47 = vadd.f32 %v4191_v28, %v3937_v39  ;;  %v3941_v39 = vmul.f32 %v8217_v22, %v8217_v22  ;;  %10728 = vst [vmem:[#allocation40_spill] sm:$0xff] %v8241_v54  ;;  %v8247_v22 = vsub.f32 %v10729_v38, %v7707_v24  ;;  %v10735_v38 = vld [vmem:[#allocation48_spill] sm:$0xff] }
 0x50b   :  { %v4193_v19 = vadd.f32 %v4192_v47, %v3938_v23  ;;  %v3942_v23 = vmul.f32 %v8223_v32, %v8223_v32  ;;  %10730 = vst [vmem:[#allocation42_spill] sm:$0xff] %v8247_v22  ;;  %v8253_v32 = vsub.f32 %v10731_v43, %v7707_v24  ;;  %v10737_v43 = vld [vmem:[#allocation50_spill] sm:$0xff] }
 0x50d   :  { %v4194_v4 = vadd.f32 %v4193_v19, %v3939_v48  ;;  %v3943_v48 = vmul.f32 %v8229_v37, %v8229_v37  ;;  %10732 = vst [vmem:[#allocation44_spill] sm:$0xff] %v8253_v32  ;;  %v8259_v37 = vsub.f32 %v10733_v17, %v7707_v24  ;;  %v10738_v17 = vld [vmem:[#allocation52_spill] sm:$0xff] }
 0x50f   :  { %v4195_v28 = vadd.f32 %v4194_v4, %v3940_v58  ;;  %v3944_v58 = vmul.f32 %v8235_v29, %v8235_v29  ;;  %10734 = vst [vmem:[#allocation46_spill] sm:$0xff] %v8259_v37  ;;  %v8265_v29 = vsub.f32 %v10735_v38, %v7707_v24  ;;  %v10739_v38 = vld [vmem:[#allocation54_spill] sm:$0xff] }
 0x511   :  { %v4196_v47 = vadd.f32 %v4195_v28, %v3941_v39  ;;  %v3945_v39 = vmul.f32 %v8241_v54, %v8241_v54  ;;  %10736 = vst [vmem:[#allocation48_spill] sm:$0xff] %v8265_v29  ;;  %v8271_v54 = vsub.f32 %v10737_v43, %v7707_v24  ;;  %v10741_v43 = vld [vmem:[#allocation57_spill] sm:$0xff] }
 0x513   :  { %v4197_v19 = vadd.f32 %v4196_v47, %v3942_v23  ;;  %v3946_v23 = vmul.f32 %v8247_v22, %v8247_v22  ;;  %v8277_v22 = vsub.f32 %v10738_v17, %v7707_v24  ;;  %v10743_v17 = vld [vmem:[#allocation60_spill] sm:$0xff] }
 0x515   :  { %v4198_v4 = vadd.f32 %v4197_v19, %v3943_v48  ;;  %v3947_v48 = vmul.f32 %v8253_v32, %v8253_v32  ;;  %v8283_v32 = vsub.f32 %v10739_v38, %v7707_v24  ;;  %v8301_v38 = vsub.f32 %v6877_v2, %v7707_v24 }
 0x517   :  { %v4199_v28 = vadd.f32 %v4198_v4, %v3944_v58  ;;  %v3948_v58 = vmul.f32 %v8259_v37, %v8259_v37  ;;  %10740 = vst [vmem:[#allocation50_spill] sm:$0xff] %v8283_v32  ;;  %v8289_v37 = vsub.f32 %v10741_v43, %v7707_v24  ;;  %v8307_v43 = vsub.f32 %v6884_v57, %v7707_v24 }
 0x518   :  { %10745 = vst [vmem:[#allocation57_spill] sm:$0xff] %v8301_v38  ;;  %v3955_v2 = vmul.f32 %v8301_v38, %v8301_v38 }
 0x519   :  { %v4200_v47 = vadd.f32 %v4199_v28, %v3945_v39  ;;  %v3949_v39 = vmul.f32 %v8265_v29, %v8265_v29  ;;  %10742 = vst [vmem:[#allocation52_spill] sm:$0xff] %v8289_v37  ;;  %v8295_v29 = vsub.f32 %v10743_v17, %v7707_v24  ;;  %v10747_v17 = vld [vmem:[#allocation66_spill] sm:$0xff]  ;;  %v3956_v57 = vmul.f32 %v8307_v43, %v8307_v43 }
 0x51a   :  { %10746 = vst [vmem:[#allocation60_spill] sm:$0xff] %v8307_v43 }
 0x51b   :  { %v4201_v19 = vadd.f32 %v4200_v47, %v3946_v23  ;;  %v3950_v23 = vmul.f32 %v8271_v54, %v8271_v54  ;;  %10744 = vst [vmem:[#allocation54_spill] sm:$0xff] %v8295_v29 }
 0x51d   :  { %v4202_v4 = vadd.f32 %v4201_v19, %v3947_v48  ;;  %v3951_v48 = vmul.f32 %v8277_v22, %v8277_v22 }
 0x51f   :  { %v4203_v28 = vadd.f32 %v4202_v4, %v3948_v58  ;;  %v3952_v58 = vmul.f32 %v8283_v32, %v8283_v32  ;;  %v8313_v32 = vsub.f32 %v10747_v17, %v7707_v24  ;;  %v10753_v17 = vld [vmem:[#allocation157_spill] sm:$0xff] }
 0x520   :  { %v8331_v38 = vsub.f32 %v10753_v17, %v7707_v24  ;;  %v10759_v17 = vld [vmem:[#allocation160_spill] sm:$0xff] }
 0x521   :  { %v4204_v47 = vadd.f32 %v4203_v28, %v3949_v39  ;;  %v3953_v39 = vmul.f32 %v8289_v37, %v8289_v37  ;;  %10748 = vst [vmem:[#allocation66_spill] sm:$0xff] %v8313_v32 }
 0x522   :  { %10754 = vst [vmem:[#allocation157_spill] sm:$0xff] %v8331_v38 }
 0x523   :  { %v4205_v19 = vadd.f32 %v4204_v47, %v3950_v23  ;;  %v3954_v23 = vmul.f32 %v8295_v29, %v8295_v29 }
 0x525   :  { %v4206_v4 = vadd.f32 %v4205_v19, %v3951_v48  ;;  %v10749_v19 = vld [vmem:[#allocation72_spill] sm:$0xff] }
 0x526   :  { %v8319_v37 = vsub.f32 %v10749_v19, %v7707_v24  ;;  %v10755_v19 = vld [vmem:[#allocation158_spill] sm:$0xff] }
 0x527   :  { %v4207_v28 = vadd.f32 %v4206_v4, %v3952_v58  ;;  %v10751_v4 = vld [vmem:[#allocation156_spill] sm:$0xff]  ;;  %v8337_v43 = vsub.f32 %v10755_v19, %v7707_v24  ;;  %v10761_v19 = vld [vmem:[#allocation161_spill] sm:$0xff] }
 0x528   :  { %10750 = vst [vmem:[#allocation72_spill] sm:$0xff] %v8319_v37  ;;  %v8325_v29 = vsub.f32 %v10751_v4, %v7707_v24  ;;  %v10757_v4 = vld [vmem:[#allocation159_spill] sm:$0xff] }
 0x529   :  { %v4208_v47 = vadd.f32 %v4207_v28, %v3953_v39  ;;  %v3957_v39 = vmul.f32 %v8313_v32, %v8313_v32  ;;  %10756 = vst [vmem:[#allocation158_spill] sm:$0xff] %v8337_v43  ;;  %v8343_v32 = vsub.f32 %v10757_v4, %v7707_v24  ;;  %v10763_v4 = vld [vmem:[#allocation162_spill] sm:$0xff] }
 0x52a   :  { %10752 = vst [vmem:[#allocation156_spill] sm:$0xff] %v8325_v29 }
 0x52b   :  { %v4209_v48 = vadd.f32 %v4208_v47, %v3954_v23  ;;  %v3958_v23 = vmul.f32 %v8319_v37, %v8319_v37  ;;  %10758 = vst [vmem:[#allocation159_spill] sm:$0xff] %v8343_v32  ;;  %v8349_v37 = vsub.f32 %v10759_v17, %v7707_v24  ;;  %v10765_v17 = vld [vmem:[#allocation163_spill] sm:$0xff] }
 0x52d   :  { %v4210_v58 = vadd.f32 %v4209_v48, %v3955_v2  ;;  %v3959_v2 = vmul.f32 %v8325_v29, %v8325_v29  ;;  %10760 = vst [vmem:[#allocation160_spill] sm:$0xff] %v8349_v37  ;;  %v8355_v29 = vsub.f32 %v10761_v19, %v7707_v24  ;;  %v10767_v19 = vld [vmem:[#allocation164_spill] sm:$0xff] }
 0x52f   :  { %v4211_v28 = vadd.f32 %v4210_v58, %v3956_v57  ;;  %v3960_v57 = vmul.f32 %v8331_v38, %v8331_v38  ;;  %10762 = vst [vmem:[#allocation161_spill] sm:$0xff] %v8355_v29  ;;  %v8361_v38 = vsub.f32 %v10763_v4, %v7707_v24  ;;  %v10769_v4 = vld [vmem:[#allocation165_spill] sm:$0xff] }
 0x531   :  { %v4212_v47 = vadd.f32 %v4211_v28, %v3957_v39  ;;  %v3961_v39 = vmul.f32 %v8337_v43, %v8337_v43  ;;  %10764 = vst [vmem:[#allocation162_spill] sm:$0xff] %v8361_v38  ;;  %v8367_v43 = vsub.f32 %v10765_v17, %v7707_v24  ;;  %v10771_v17 = vld [vmem:[#allocation166_spill] sm:$0xff] }
 0x533   :  { %v4213_v48 = vadd.f32 %v4212_v47, %v3958_v23  ;;  %v3962_v23 = vmul.f32 %v8343_v32, %v8343_v32  ;;  %10766 = vst [vmem:[#allocation163_spill] sm:$0xff] %v8367_v43  ;;  %v8373_v32 = vsub.f32 %v10767_v19, %v7707_v24  ;;  %v10773_v19 = vld [vmem:[#allocation167_spill] sm:$0xff] }
 0x535   :  { %v4214_v58 = vadd.f32 %v4213_v48, %v3959_v2  ;;  %v3963_v2 = vmul.f32 %v8349_v37, %v8349_v37  ;;  %10768 = vst [vmem:[#allocation164_spill] sm:$0xff] %v8373_v32  ;;  %v8379_v37 = vsub.f32 %v10769_v4, %v7707_v24  ;;  %v10775_v4 = vld [vmem:[#allocation168_spill] sm:$0xff] }
 0x537   :  { %v4215_v28 = vadd.f32 %v4214_v58, %v3960_v57  ;;  %v3964_v57 = vmul.f32 %v8355_v29, %v8355_v29  ;;  %10770 = vst [vmem:[#allocation165_spill] sm:$0xff] %v8379_v37  ;;  %v8385_v29 = vsub.f32 %v10771_v17, %v7707_v24  ;;  %v10777_v17 = vld [vmem:[#allocation169_spill] sm:$0xff] }
 0x539   :  { %v4216_v47 = vadd.f32 %v4215_v28, %v3961_v39  ;;  %v3965_v39 = vmul.f32 %v8361_v38, %v8361_v38  ;;  %10772 = vst [vmem:[#allocation166_spill] sm:$0xff] %v8385_v29  ;;  %v8391_v38 = vsub.f32 %v10773_v19, %v7707_v24  ;;  %v10779_v19 = vld [vmem:[#allocation170_spill] sm:$0xff] }
 0x53b   :  { %v4217_v48 = vadd.f32 %v4216_v47, %v3962_v23  ;;  %v3966_v23 = vmul.f32 %v8367_v43, %v8367_v43  ;;  %10774 = vst [vmem:[#allocation167_spill] sm:$0xff] %v8391_v38  ;;  %v8397_v43 = vsub.f32 %v10775_v4, %v7707_v24  ;;  %v10781_v4 = vld [vmem:[#allocation171_spill] sm:$0xff] }
 0x53d   :  { %v4218_v58 = vadd.f32 %v4217_v48, %v3963_v2  ;;  %v3967_v2 = vmul.f32 %v8373_v32, %v8373_v32  ;;  %10776 = vst [vmem:[#allocation168_spill] sm:$0xff] %v8397_v43  ;;  %v8403_v32 = vsub.f32 %v10777_v17, %v7707_v24  ;;  %v10783_v17 = vld [vmem:[#allocation172_spill] sm:$0xff] }
 0x53f   :  { %v4219_v28 = vadd.f32 %v4218_v58, %v3964_v57  ;;  %v3968_v57 = vmul.f32 %v8379_v37, %v8379_v37  ;;  %10778 = vst [vmem:[#allocation169_spill] sm:$0xff] %v8403_v32  ;;  %v8409_v37 = vsub.f32 %v10779_v19, %v7707_v24  ;;  %v10785_v19 = vld [vmem:[#allocation173_spill] sm:$0xff] }
 0x541   :  { %v4220_v47 = vadd.f32 %v4219_v28, %v3965_v39  ;;  %v3969_v39 = vmul.f32 %v8385_v29, %v8385_v29  ;;  %10780 = vst [vmem:[#allocation170_spill] sm:$0xff] %v8409_v37  ;;  %v8415_v29 = vsub.f32 %v10781_v4, %v7707_v24  ;;  %v10787_v4 = vld [vmem:[#allocation174_spill] sm:$0xff] }
 0x543   :  { %v4221_v48 = vadd.f32 %v4220_v47, %v3966_v23  ;;  %v3970_v23 = vmul.f32 %v8391_v38, %v8391_v38  ;;  %10782 = vst [vmem:[#allocation171_spill] sm:$0xff] %v8415_v29  ;;  %v8421_v38 = vsub.f32 %v10783_v17, %v7707_v24  ;;  %v10789_v17 = vld [vmem:[#allocation175_spill] sm:$0xff] }
 0x545   :  { %v4222_v58 = vadd.f32 %v4221_v48, %v3967_v2  ;;  %v3971_v2 = vmul.f32 %v8397_v43, %v8397_v43  ;;  %10784 = vst [vmem:[#allocation172_spill] sm:$0xff] %v8421_v38  ;;  %v8427_v43 = vsub.f32 %v10785_v19, %v7707_v24  ;;  %v10791_v19 = vld [vmem:[#allocation176_spill] sm:$0xff] }
 0x547   :  { %v4223_v28 = vadd.f32 %v4222_v58, %v3968_v57  ;;  %v3972_v57 = vmul.f32 %v8403_v32, %v8403_v32  ;;  %10786 = vst [vmem:[#allocation173_spill] sm:$0xff] %v8427_v43  ;;  %v8433_v32 = vsub.f32 %v10787_v4, %v7707_v24  ;;  %v10793_v4 = vld [vmem:[#allocation177_spill] sm:$0xff] }
 0x549   :  { %v4224_v47 = vadd.f32 %v4223_v28, %v3969_v39  ;;  %v3973_v39 = vmul.f32 %v8409_v37, %v8409_v37  ;;  %10788 = vst [vmem:[#allocation174_spill] sm:$0xff] %v8433_v32  ;;  %v8439_v37 = vsub.f32 %v10789_v17, %v7707_v24  ;;  %v10795_v17 = vld [vmem:[#allocation178_spill] sm:$0xff] }
 0x54b   :  { %v4225_v48 = vadd.f32 %v4224_v47, %v3970_v23  ;;  %v3974_v23 = vmul.f32 %v8415_v29, %v8415_v29  ;;  %10790 = vst [vmem:[#allocation175_spill] sm:$0xff] %v8439_v37  ;;  %v8445_v29 = vsub.f32 %v10791_v19, %v7707_v24  ;;  %v10797_v19 = vld [vmem:[#allocation179_spill] sm:$0xff] }
 0x54d   :  { %v4226_v58 = vadd.f32 %v4225_v48, %v3971_v2  ;;  %v3975_v2 = vmul.f32 %v8421_v38, %v8421_v38  ;;  %10792 = vst [vmem:[#allocation176_spill] sm:$0xff] %v8445_v29  ;;  %v8451_v38 = vsub.f32 %v10793_v4, %v7707_v24  ;;  %v10799_v4 = vld [vmem:[#allocation180_spill] sm:$0xff] }
 0x54f   :  { %v4227_v28 = vadd.f32 %v4226_v58, %v3972_v57  ;;  %v3976_v57 = vmul.f32 %v8427_v43, %v8427_v43  ;;  %10794 = vst [vmem:[#allocation177_spill] sm:$0xff] %v8451_v38  ;;  %v8457_v43 = vsub.f32 %v10795_v17, %v7707_v24  ;;  %v10801_v17 = vld [vmem:[#allocation23_spill] sm:$0xff] }
 0x551   :  { %v4228_v47 = vadd.f32 %v4227_v28, %v3973_v39  ;;  %v3977_v39 = vmul.f32 %v8433_v32, %v8433_v32  ;;  %10796 = vst [vmem:[#allocation178_spill] sm:$0xff] %v8457_v43  ;;  %v8463_v32 = vsub.f32 %v10797_v19, %v7707_v24  ;;  %v10803_v19 = vld [vmem:[#allocation25_spill] sm:$0xff] }
 0x553   :  { %v4229_v48 = vadd.f32 %v4228_v47, %v3974_v23  ;;  %v3978_v23 = vmul.f32 %v8439_v37, %v8439_v37  ;;  %10798 = vst [vmem:[#allocation179_spill] sm:$0xff] %v8463_v32  ;;  %v8469_v37 = vsub.f32 %v10799_v4, %v7707_v24  ;;  %v10805_v4 = vld [vmem:[#allocation27_spill] sm:$0xff] }
 0x555   :  { %v4230_v58 = vadd.f32 %v4229_v48, %v3975_v2  ;;  %v3979_v2 = vmul.f32 %v8445_v29, %v8445_v29  ;;  %10800 = vst [vmem:[#allocation180_spill] sm:$0xff] %v8469_v37  ;;  %v8475_v29 = vsub.f32 %v10801_v17, %v7707_v24  ;;  %v10807_v17 = vld [vmem:[#allocation29_spill] sm:$0xff] }
 0x557   :  { %v4231_v28 = vadd.f32 %v4230_v58, %v3976_v57  ;;  %v3980_v57 = vmul.f32 %v8451_v38, %v8451_v38  ;;  %10802 = vst [vmem:[#allocation23_spill] sm:$0xff] %v8475_v29  ;;  %v8481_v38 = vsub.f32 %v10803_v19, %v7707_v24  ;;  %v10809_v19 = vld [vmem:[#allocation31_spill] sm:$0xff] }
 0x559   :  { %v4232_v47 = vadd.f32 %v4231_v28, %v3977_v39  ;;  %v3981_v39 = vmul.f32 %v8457_v43, %v8457_v43  ;;  %10804 = vst [vmem:[#allocation25_spill] sm:$0xff] %v8481_v38  ;;  %v8487_v43 = vsub.f32 %v10805_v4, %v7707_v24  ;;  %v10811_v4 = vld [vmem:[#allocation33_spill] sm:$0xff] }
 0x55b   :  { %v4233_v48 = vadd.f32 %v4232_v47, %v3978_v23  ;;  %v3982_v23 = vmul.f32 %v8463_v32, %v8463_v32  ;;  %10806 = vst [vmem:[#allocation27_spill] sm:$0xff] %v8487_v43  ;;  %v8493_v32 = vsub.f32 %v10807_v17, %v7707_v24  ;;  %v10813_v17 = vld [vmem:[#allocation35_spill] sm:$0xff] }
 0x55d   :  { %v4234_v58 = vadd.f32 %v4233_v48, %v3979_v2  ;;  %v3983_v2 = vmul.f32 %v8469_v37, %v8469_v37  ;;  %10808 = vst [vmem:[#allocation29_spill] sm:$0xff] %v8493_v32  ;;  %v8499_v37 = vsub.f32 %v10809_v19, %v7707_v24  ;;  %v10815_v19 = vld [vmem:[#allocation37_spill] sm:$0xff] }
 0x55f   :  { %v4235_v28 = vadd.f32 %v4234_v58, %v3980_v57  ;;  %v3984_v57 = vmul.f32 %v8475_v29, %v8475_v29  ;;  %10810 = vst [vmem:[#allocation31_spill] sm:$0xff] %v8499_v37  ;;  %v8505_v29 = vsub.f32 %v10811_v4, %v7707_v24  ;;  %v10817_v4 = vld [vmem:[#allocation39_spill] sm:$0xff] }
 0x561   :  { %v4236_v47 = vadd.f32 %v4235_v28, %v3981_v39  ;;  %v3985_v39 = vmul.f32 %v8481_v38, %v8481_v38  ;;  %10812 = vst [vmem:[#allocation33_spill] sm:$0xff] %v8505_v29  ;;  %v8511_v38 = vsub.f32 %v10813_v17, %v7707_v24  ;;  %v10819_v17 = vld [vmem:[#allocation41_spill] sm:$0xff] }
 0x563   :  { %v4237_v48 = vadd.f32 %v4236_v47, %v3982_v23  ;;  %v3986_v23 = vmul.f32 %v8487_v43, %v8487_v43  ;;  %10814 = vst [vmem:[#allocation35_spill] sm:$0xff] %v8511_v38  ;;  %v8517_v43 = vsub.f32 %v10815_v19, %v7707_v24  ;;  %v10821_v19 = vld [vmem:[#allocation43_spill] sm:$0xff] }
 0x565   :  { %v4238_v58 = vadd.f32 %v4237_v48, %v3983_v2  ;;  %v3987_v2 = vmul.f32 %v8493_v32, %v8493_v32  ;;  %10816 = vst [vmem:[#allocation37_spill] sm:$0xff] %v8517_v43  ;;  %v8523_v32 = vsub.f32 %v10817_v4, %v7707_v24  ;;  %v10823_v4 = vld [vmem:[#allocation45_spill] sm:$0xff] }
 0x567   :  { %v4239_v28 = vadd.f32 %v4238_v58, %v3984_v57  ;;  %v3988_v57 = vmul.f32 %v8499_v37, %v8499_v37  ;;  %10818 = vst [vmem:[#allocation39_spill] sm:$0xff] %v8523_v32  ;;  %v8529_v37 = vsub.f32 %v10819_v17, %v7707_v24  ;;  %v10824_v17 = vld [vmem:[#allocation47_spill] sm:$0xff] }
 0x569   :  { %v4240_v47 = vadd.f32 %v4239_v28, %v3985_v39  ;;  %v3989_v39 = vmul.f32 %v8505_v29, %v8505_v29  ;;  %10820 = vst [vmem:[#allocation41_spill] sm:$0xff] %v8529_v37  ;;  %v8535_v29 = vsub.f32 %v10821_v19, %v7707_v24  ;;  %v10825_v19 = vld [vmem:[#allocation49_spill] sm:$0xff] }
 0x56b   :  { %v4241_v48 = vadd.f32 %v4240_v47, %v3986_v23  ;;  %v3990_v23 = vmul.f32 %v8511_v38, %v8511_v38  ;;  %10822 = vst [vmem:[#allocation43_spill] sm:$0xff] %v8535_v29  ;;  %v8541_v38 = vsub.f32 %v10823_v4, %v7707_v24  ;;  %v10827_v4 = vld [vmem:[#allocation51_spill] sm:$0xff] }
 0x56d   :  { %v4242_v58 = vadd.f32 %v4241_v48, %v3987_v2  ;;  %v3991_v2 = vmul.f32 %v8517_v43, %v8517_v43  ;;  %v8547_v43 = vsub.f32 %v10824_v17, %v7707_v24  ;;  %v10828_v17 = vld [vmem:[#allocation53_spill] sm:$0xff] }
 0x56f   :  { %v4243_v28 = vadd.f32 %v4242_v58, %v3988_v57  ;;  %v3992_v57 = vmul.f32 %v8523_v32, %v8523_v32  ;;  %v8553_v32 = vsub.f32 %v10825_v19, %v7707_v24  ;;  %v8571_v19 = vsub.f32 %v7138_v40, %v7707_v24 }
 0x571   :  { %v4244_v47 = vadd.f32 %v4243_v28, %v3989_v39  ;;  %v3993_v39 = vmul.f32 %v8529_v37, %v8529_v37  ;;  %10826 = vst [vmem:[#allocation45_spill] sm:$0xff] %v8553_v32  ;;  %v8559_v37 = vsub.f32 %v10827_v4, %v7707_v24  ;;  %v8577_v4 = vsub.f32 %v7145_v41, %v7707_v24 }
 0x572   :  { %v4000_v40 = vmul.f32 %v8571_v19, %v8571_v19 }
 0x573   :  { %v4245_v48 = vadd.f32 %v4244_v47, %v3990_v23  ;;  %v3994_v23 = vmul.f32 %v8535_v29, %v8535_v29  ;;  %v8565_v29 = vsub.f32 %v10828_v17, %v7707_v24  ;;  %10829 = vst [vmem:[#allocation47_spill] sm:$0xff] %v8577_v4  ;;  %v10830_v17 = vld [vmem:[#allocation55_spill] sm:$0xff]  ;;  %v4001_v41 = vmul.f32 %v8577_v4, %v8577_v4 }
 0x575   :  { %v4246_v58 = vadd.f32 %v4245_v48, %v3991_v2  ;;  %v3995_v2 = vmul.f32 %v8541_v38, %v8541_v38 }
 0x577   :  { %v4247_v28 = vadd.f32 %v4246_v58, %v3992_v57  ;;  %v3996_v57 = vmul.f32 %v8547_v43, %v8547_v43 }
 0x579   :  { %v4248_v47 = vadd.f32 %v4247_v28, %v3993_v39  ;;  %v3997_v39 = vmul.f32 %v8553_v32, %v8553_v32  ;;  %v8583_v32 = vsub.f32 %v10830_v17, %v7707_v24  ;;  %v8601_v17 = vsub.f32 %v7167_v55, %v7707_v24 }
 0x57b   :  { %v4249_v48 = vadd.f32 %v4248_v47, %v3994_v23  ;;  %v3998_v23 = vmul.f32 %v8559_v37, %v8559_v37  ;;  %10831 = vst [vmem:[#allocation49_spill] sm:$0xff] %v8583_v32  ;;  %v4005_v55 = vmul.f32 %v8601_v17, %v8601_v17 }
 0x57d   :  { %v4250_v58 = vadd.f32 %v4249_v48, %v3995_v2  ;;  %v3999_v2 = vmul.f32 %v8565_v29, %v8565_v29 }
 0x57f   :  { %v4251_v28 = vadd.f32 %v4250_v58, %v3996_v57  ;;  %v8589_v58 = vsub.f32 %v7155_v33, %v7707_v24 }
 0x581   :  { %v4252_v47 = vadd.f32 %v4251_v28, %v3997_v39  ;;  %v8595_v28 = vsub.f32 %v7162_v51, %v7707_v24  ;;  %v4003_v33 = vmul.f32 %v8589_v58, %v8589_v58 }
 0x583   :  { %v4253_v48 = vadd.f32 %v4252_v47, %v3998_v23  ;;  %10832 = vst [vmem:[#allocation51_spill] sm:$0xff] %v8595_v28  ;;  %v4002_v23 = vmul.f32 %v8583_v32, %v8583_v32  ;;  %v4004_v51 = vmul.f32 %v8595_v28, %v8595_v28 }
 0x585   :  { %v4254_v57 = vadd.f32 %v4253_v48, %v3999_v2  ;;  %v10833_v48 = vld [vmem:[#allocation58_spill] sm:$0xff] }
 0x586   :  { %v8607_v4 = vsub.f32 %v10833_v48, %v7707_v24  ;;  %v10836_v48 = vld [vmem:[#allocation64_spill] sm:$0xff] }
 0x587   :  { %v4255_v39 = vadd.f32 %v4254_v57, %v4000_v40  ;;  %v10834_v57 = vld [vmem:[#allocation61_spill] sm:$0xff]  ;;  %v8625_v28 = vsub.f32 %v10836_v48, %v7707_v24  ;;  %v8643_v48 = vsub.f32 %v7208_v45, %v7707_v24 }
 0x588   :  { %v8613_v32 = vsub.f32 %v10834_v57, %v7707_v24  ;;  %v8631_v57 = vsub.f32 %v7196_v31, %v7707_v24 }
 0x589   :  { %v4256_v47 = vadd.f32 %v4255_v39, %v4001_v41  ;;  %v8619_v39 = vsub.f32 %v7184_v21, %v7707_v24  ;;  %10837 = vst [vmem:[#allocation55_spill] sm:$0xff] %v8625_v28  ;;  %v4012_v45 = vmul.f32 %v8643_v48, %v8643_v48 }
 0x58a   :  { %v4010_v31 = vmul.f32 %v8631_v57, %v8631_v57 }
 0x58b   :  { %v4257_v2 = vadd.f32 %v4256_v47, %v4002_v23  ;;  %10835 = vst [vmem:[#allocation53_spill] sm:$0xff] %v8619_v39  ;;  %v4006_v23 = vmul.f32 %v8607_v4, %v8607_v4  ;;  %v4008_v21 = vmul.f32 %v8619_v39, %v8619_v39 }
 0x58d   :  { %v4258_v40 = vadd.f32 %v4257_v2, %v4003_v33  ;;  %v4007_v33 = vmul.f32 %v8613_v32, %v8613_v32 }
 0x58f   :  { %v4259_v41 = vadd.f32 %v4258_v40, %v4004_v51  ;;  %v8637_v40 = vsub.f32 %v7203_v49, %v7707_v24 }
 0x591   :  { %v4260_v47 = vadd.f32 %v4259_v41, %v4005_v55  ;;  %10838 = vst [vmem:[#allocation58_spill] sm:$0xff] %v8637_v40  ;;  %v4009_v55 = vmul.f32 %v8625_v28, %v8625_v28  ;;  %v4011_v49 = vmul.f32 %v8637_v40, %v8637_v40 }
 0x593   :  { %v4261_v2 = vadd.f32 %v4260_v47, %v4006_v23  ;;  %v10839_v47 = vld [vmem:[#allocation67_spill] sm:$0xff] }
 0x594   :  { %v8649_v39 = vsub.f32 %v10839_v47, %v7707_v24  ;;  %v10842_v47 = vld [vmem:[#allocation182_spill] sm:$0xff] }
 0x595   :  { %v4262_v51 = vadd.f32 %v4261_v2, %v4007_v33  ;;  %v10840_v2 = vld [vmem:[#allocation181_spill] sm:$0xff]  ;;  %v8667_v40 = vsub.f32 %v10842_v47, %v7707_v24  ;;  %v10844_v47 = vld [vmem:[#allocation183_spill] sm:$0xff] }
 0x596   :  { %v8655_v28 = vsub.f32 %v10840_v2, %v7707_v24  ;;  %v8673_v2 = vsub.f32 %v7237_v44, %v7707_v24 }
 0x597   :  { %v4263_v41 = vadd.f32 %v4262_v51, %v4008_v21  ;;  %v8661_v51 = vsub.f32 %v7225_v12, %v7707_v24 }
 0x598   :  { %10841 = vst [vmem:[#allocation61_spill] sm:$0xff] %v8655_v28  ;;  %v4017_v44 = vmul.f32 %v8673_v2, %v8673_v2 }
 0x599   :  { %v4264_v23 = vadd.f32 %v4263_v41, %v4009_v55  ;;  %v4013_v55 = vmul.f32 %v8649_v39, %v8649_v39  ;;  %v4015_v12 = vmul.f32 %v8661_v51, %v8661_v51 }
 0x59b   :  { %v4265_v33 = vadd.f32 %v4264_v23, %v4010_v31  ;;  %v4014_v31 = vmul.f32 %v8655_v28, %v8655_v28  ;;  %v8685_v28 = vsub.f32 %v10844_v47, %v7707_v24  ;;  %v8703_v47 = vsub.f32 %v7264_v52, %v7707_v24 }
 0x59d   :  { %v4266_v21 = vadd.f32 %v4265_v33, %v4011_v49  ;;  %v8679_v33 = vsub.f32 %v7242_v5, %v7707_v24  ;;  %v4022_v52 = vmul.f32 %v8703_v47, %v8703_v47 }
 0x59f   :  { %v4267_v41 = vadd.f32 %v4266_v21, %v4012_v45  ;;  %10843 = vst [vmem:[#allocation64_spill] sm:$0xff] %v8679_v33  ;;  %v4016_v45 = vmul.f32 %v8667_v40, %v8667_v40  ;;  %v4018_v5 = vmul.f32 %v8679_v33, %v8679_v33 }
 0x5a1   :  { %v4268_v23 = vadd.f32 %v4267_v41, %v4013_v55  ;;  %v8691_v41 = vsub.f32 %v7252_v3, %v7707_v24 }
 0x5a3   :  { %v4269_v49 = vadd.f32 %v4268_v23, %v4014_v31  ;;  %v8697_v23 = vsub.f32 %v7259_v60, %v7707_v24  ;;  %v4020_v3 = vmul.f32 %v8691_v41, %v8691_v41 }
 0x5a5   :  { %v4270_v21 = vadd.f32 %v4269_v49, %v4015_v12  ;;  %v4019_v12 = vmul.f32 %v8685_v28, %v8685_v28  ;;  %v4021_v60 = vmul.f32 %v8697_v23, %v8697_v23 }
 0x5a7   :  { %v4271_v55 = vadd.f32 %v4270_v21, %v4016_v45  ;;  %v10845_v21 = vld [vmem:[#allocation184_spill] sm:$0xff] }
 0x5a8   :  { %v8709_v33 = vsub.f32 %v10845_v21, %v7707_v24  ;;  %v8727_v21 = vsub.f32 %v7284_v50, %v7707_v24 }
 0x5a9   :  { %v4272_v31 = vadd.f32 %v4271_v55, %v4017_v44  ;;  %v8715_v55 = vsub.f32 %v7274_v63, %v7707_v24 }
 0x5aa   :  { %10846 = vst [vmem:[#allocation67_spill] sm:$0xff] %v8709_v33  ;;  %v4026_v50 = vmul.f32 %v8727_v21, %v8727_v21 }
 0x5ab   :  { %v4273_v49 = vadd.f32 %v4272_v31, %v4018_v5  ;;  %v8721_v31 = vsub.f32 %v7279_v56, %v7707_v24  ;;  %v4024_v63 = vmul.f32 %v8715_v55, %v8715_v55 }
 0x5ad   :  { %v4274_v45 = vadd.f32 %v4273_v49, %v4019_v12  ;;  %v4023_v12 = vmul.f32 %v8709_v33, %v8709_v33  ;;  %v4025_v56 = vmul.f32 %v8721_v31, %v8721_v31 }
 0x5af   :  { %v4275_v44 = vadd.f32 %v4274_v45, %v4020_v3  ;;  %v8733_v45 = vsub.f32 %v7289_v46, %v7707_v24 }
 0x5b1   :  { %v4276_v5 = vadd.f32 %v4275_v44, %v4021_v60  ;;  %v10847_v44 = vld [vmem:[#allocation185_spill] sm:$0xff]  ;;  %v4027_v46 = vmul.f32 %v8733_v45, %v8733_v45 }
 0x5b2   :  { %v8739_v33 = vsub.f32 %v10847_v44, %v7707_v24  ;;  %v8757_v44 = vsub.f32 %v7309_v15, %v7707_v24 }
 0x5b3   :  { %v4277_v49 = vadd.f32 %v4276_v5, %v4022_v52  ;;  %v8745_v5 = vsub.f32 %v7299_v16, %v7707_v24 }
 0x5b4   :  { %v4031_v15 = vmul.f32 %v8757_v44, %v8757_v44 }
 0x5b5   :  { %v4278_v3 = vadd.f32 %v4277_v49, %v4023_v12  ;;  %10848 = vst [vmem:[#allocation181_spill] sm:$0xff] %v8745_v5  ;;  %v8751_v49 = vsub.f32 %v7304_v36, %v7707_v24  ;;  %v4029_v16 = vmul.f32 %v8745_v5, %v8745_v5 }
 0x5b7   :  { %v4279_v60 = vadd.f32 %v4278_v3, %v4024_v63  ;;  %v4028_v63 = vmul.f32 %v8739_v33, %v8739_v33  ;;  %v4030_v36 = vmul.f32 %v8751_v49, %v8751_v49 }
 0x5b9   :  { %v4280_v52 = vadd.f32 %v4279_v60, %v4025_v56  ;;  %v8763_v60 = vsub.f32 %v7315_v53, %v7707_v24 }
 0x5bb   :  { %v4281_v12 = vadd.f32 %v4280_v52, %v4026_v50  ;;  %v8769_v52 = vsub.f32 %v7320_v11, %v7707_v24  ;;  %v4032_v53 = vmul.f32 %v8763_v60, %v8763_v60 }
 0x5bd   :  { %v4282_v3 = vadd.f32 %v4281_v12, %v4027_v46  ;;  %10849 = vst [vmem:[#allocation182_spill] sm:$0xff] %v8769_v52  ;;  %v10850_v12 = vld [vmem:[#allocation186_spill] sm:$0xff]  ;;  %v4033_v11 = vmul.f32 %v8769_v52, %v8769_v52 }
 0x5be   :  { %v8775_v5 = vsub.f32 %v10850_v12, %v7707_v24  ;;  %v8793_v12 = vsub.f32 %v7340_v34, %v7707_v24 }
 0x5bf   :  { %v4283_v56 = vadd.f32 %v4282_v3, %v4028_v63  ;;  %v8781_v3 = vsub.f32 %v7330_v35, %v7707_v24 }
 0x5c0   :  { %10851 = vst [vmem:[#allocation183_spill] sm:$0xff] %v8775_v5  ;;  %v4037_v34 = vmul.f32 %v8793_v12, %v8793_v12 }
 0x5c1   :  { %v4284_v50 = vadd.f32 %v4283_v56, %v4029_v16  ;;  %10852 = vst [vmem:[#allocation184_spill] sm:$0xff] %v8781_v3  ;;  %v8787_v56 = vsub.f32 %v7335_v59, %v7707_v24  ;;  %v4035_v35 = vmul.f32 %v8781_v3, %v8781_v3 }
 0x5c2   :  { %10854 = vst [vmem:[#allocation186_spill] sm:$0xff] %v8793_v12 }
 0x5c3   :  { %v4285_v46 = vadd.f32 %v4284_v50, %v4030_v36  ;;  %10853 = vst [vmem:[#allocation185_spill] sm:$0xff] %v8787_v56  ;;  %v4034_v36 = vmul.f32 %v8775_v5, %v8775_v5  ;;  %v4036_v59 = vmul.f32 %v8787_v56, %v8787_v56 }
 0x5c5   :  { %v4286_v63 = vadd.f32 %v4285_v46, %v4031_v15  ;;  %v10855_v46 = vld [vmem:[#allocation187_spill] sm:$0xff] }
 0x5c6   :  { %v8799_v52 = vsub.f32 %v10855_v46, %v7707_v24  ;;  %v10861_v46 = vld [vmem:[#allocation190_spill] sm:$0xff] }
 0x5c7   :  { %v4287_v16 = vadd.f32 %v4286_v63, %v4032_v53  ;;  %v10857_v63 = vld [vmem:[#allocation188_spill] sm:$0xff]  ;;  %v8817_v56 = vsub.f32 %v10861_v46, %v7707_v24  ;;  %v10867_v46 = vld [vmem:[#allocation193_spill] sm:$0xff] }
 0x5c8   :  { %10856 = vst [vmem:[#allocation187_spill] sm:$0xff] %v8799_v52  ;;  %v8805_v5 = vsub.f32 %v10857_v63, %v7707_v24  ;;  %v10863_v63 = vld [vmem:[#allocation191_spill] sm:$0xff] }
 0x5c9   :  { %v4288_v50 = vadd.f32 %v4287_v16, %v4033_v11  ;;  %v10859_v16 = vld [vmem:[#allocation189_spill] sm:$0xff]  ;;  %10862 = vst [vmem:[#allocation190_spill] sm:$0xff] %v8817_v56  ;;  %v8823_v12 = vsub.f32 %v10863_v63, %v7707_v24  ;;  %v10869_v63 = vld [vmem:[#allocation194_spill] sm:$0xff] }
 0x5ca   :  { %10858 = vst [vmem:[#allocation188_spill] sm:$0xff] %v8805_v5  ;;  %v8811_v3 = vsub.f32 %v10859_v16, %v7707_v24  ;;  %v10865_v16 = vld [vmem:[#allocation192_spill] sm:$0xff] }
 0x5cb   :  { %v4289_v15 = vadd.f32 %v4288_v50, %v4034_v36  ;;  %v4038_v36 = vmul.f32 %v8799_v52, %v8799_v52  ;;  %10864 = vst [vmem:[#allocation191_spill] sm:$0xff] %v8823_v12  ;;  %v8829_v52 = vsub.f32 %v10865_v16, %v7707_v24  ;;  %v10871_v16 = vld [vmem:[#allocation195_spill] sm:$0xff] }
 0x5cc   :  { %10860 = vst [vmem:[#allocation189_spill] sm:$0xff] %v8811_v3 }
 0x5cd   :  { %v4290_v53 = vadd.f32 %v4289_v15, %v4035_v35  ;;  %v4039_v35 = vmul.f32 %v8805_v5, %v8805_v5  ;;  %10866 = vst [vmem:[#allocation192_spill] sm:$0xff] %v8829_v52  ;;  %v8835_v5 = vsub.f32 %v10867_v46, %v7707_v24  ;;  %v10873_v46 = vld [vmem:[#allocation196_spill] sm:$0xff] }
 0x5cf   :  { %v4291_v11 = vadd.f32 %v4290_v53, %v4036_v59  ;;  %v4040_v59 = vmul.f32 %v8811_v3, %v8811_v3  ;;  %10868 = vst [vmem:[#allocation193_spill] sm:$0xff] %v8835_v5  ;;  %v8841_v3 = vsub.f32 %v10869_v63, %v7707_v24  ;;  %v10875_v63 = vld [vmem:[#allocation56_spill] sm:$0xff] }
 0x5d1   :  { %v4292_v50 = vadd.f32 %v4291_v11, %v4037_v34  ;;  %v4041_v34 = vmul.f32 %v8817_v56, %v8817_v56  ;;  %10870 = vst [vmem:[#allocation194_spill] sm:$0xff] %v8841_v3  ;;  %v8847_v56 = vsub.f32 %v10871_v16, %v7707_v24  ;;  %v10877_v16 = vld [vmem:[#allocation59_spill] sm:$0xff] }
 0x5d3   :  { %v4293_v15 = vadd.f32 %v4292_v50, %v4038_v36  ;;  %v4042_v36 = vmul.f32 %v8823_v12, %v8823_v12  ;;  %10872 = vst [vmem:[#allocation195_spill] sm:$0xff] %v8847_v56  ;;  %v8853_v12 = vsub.f32 %v10873_v46, %v7707_v24  ;;  %v10879_v46 = vld [vmem:[#allocation62_spill] sm:$0xff] }
 0x5d5   :  { %v4294_v53 = vadd.f32 %v4293_v15, %v4039_v35  ;;  %v4043_v35 = vmul.f32 %v8829_v52, %v8829_v52  ;;  %10874 = vst [vmem:[#allocation196_spill] sm:$0xff] %v8853_v12  ;;  %v8859_v52 = vsub.f32 %v10875_v63, %v7707_v24  ;;  %v10881_v63 = vld [vmem:[#allocation65_spill] sm:$0xff] }
 0x5d7   :  { %v4295_v11 = vadd.f32 %v4294_v53, %v4040_v59  ;;  %v4044_v59 = vmul.f32 %v8835_v5, %v8835_v5  ;;  %10876 = vst [vmem:[#allocation56_spill] sm:$0xff] %v8859_v52  ;;  %v8865_v5 = vsub.f32 %v10877_v16, %v7707_v24  ;;  %v10883_v16 = vld [vmem:[#allocation68_spill] sm:$0xff] }
 0x5d9   :  { %v4296_v50 = vadd.f32 %v4295_v11, %v4041_v34  ;;  %v4045_v34 = vmul.f32 %v8841_v3, %v8841_v3  ;;  %10878 = vst [vmem:[#allocation59_spill] sm:$0xff] %v8865_v5  ;;  %v8871_v3 = vsub.f32 %v10879_v46, %v7707_v24  ;;  %v10885_v46 = vld [vmem:[#allocation197_spill] sm:$0xff] }
 0x5db   :  { %v4297_v15 = vadd.f32 %v4296_v50, %v4042_v36  ;;  %v4046_v36 = vmul.f32 %v8847_v56, %v8847_v56  ;;  %10880 = vst [vmem:[#allocation62_spill] sm:$0xff] %v8871_v3  ;;  %v8877_v56 = vsub.f32 %v10881_v63, %v7707_v24  ;;  %v10887_v63 = vld [vmem:[#allocation198_spill] sm:$0xff] }
 0x5dd   :  { %v4298_v53 = vadd.f32 %v4297_v15, %v4043_v35  ;;  %v4047_v35 = vmul.f32 %v8853_v12, %v8853_v12  ;;  %10882 = vst [vmem:[#allocation65_spill] sm:$0xff] %v8877_v56  ;;  %v8883_v12 = vsub.f32 %v10883_v16, %v7707_v24  ;;  %v10889_v16 = vld [vmem:[#allocation199_spill] sm:$0xff] }
 0x5df   :  { %v4299_v11 = vadd.f32 %v4298_v53, %v4044_v59  ;;  %v4048_v59 = vmul.f32 %v8859_v52, %v8859_v52  ;;  %10884 = vst [vmem:[#allocation68_spill] sm:$0xff] %v8883_v12  ;;  %v8889_v52 = vsub.f32 %v10885_v46, %v7707_v24  ;;  %v10891_v46 = vld [vmem:[#allocation200_spill] sm:$0xff] }
 0x5e1   :  { %v4300_v50 = vadd.f32 %v4299_v11, %v4045_v34  ;;  %v4049_v34 = vmul.f32 %v8865_v5, %v8865_v5  ;;  %10886 = vst [vmem:[#allocation197_spill] sm:$0xff] %v8889_v52  ;;  %v8895_v5 = vsub.f32 %v10887_v63, %v7707_v24  ;;  %v10893_v63 = vld [vmem:[#allocation90_spill] sm:$0xff] }
 0x5e3   :  { %v4301_v15 = vadd.f32 %v4300_v50, %v4046_v36  ;;  %v4050_v36 = vmul.f32 %v8871_v3, %v8871_v3  ;;  %10888 = vst [vmem:[#allocation198_spill] sm:$0xff] %v8895_v5  ;;  %v8901_v3 = vsub.f32 %v10889_v16, %v7707_v24  ;;  %v10895_v16 = vld [vmem:[#allocation95_spill] sm:$0xff] }
 0x5e5   :  { %v4302_v53 = vadd.f32 %v4301_v15, %v4047_v35  ;;  %v4051_v35 = vmul.f32 %v8877_v56, %v8877_v56  ;;  %10890 = vst [vmem:[#allocation199_spill] sm:$0xff] %v8901_v3  ;;  %v8907_v56 = vsub.f32 %v10891_v46, %v7707_v24  ;;  %v10897_v46 = vld [vmem:[#allocation100_spill] sm:$0xff] }
 0x5e7   :  { %v4303_v11 = vadd.f32 %v4302_v53, %v4048_v59  ;;  %v4052_v59 = vmul.f32 %v8883_v12, %v8883_v12  ;;  %10892 = vst [vmem:[#allocation200_spill] sm:$0xff] %v8907_v56  ;;  %v8913_v12 = vsub.f32 %v10893_v63, %v7707_v24  ;;  %v10899_v63 = vld [vmem:[#allocation105_spill] sm:$0xff] }
 0x5e9   :  { %v4304_v50 = vadd.f32 %v4303_v11, %v4049_v34  ;;  %v4053_v34 = vmul.f32 %v8889_v52, %v8889_v52  ;;  %10894 = vst [vmem:[#allocation90_spill] sm:$0xff] %v8913_v12  ;;  %v8919_v52 = vsub.f32 %v10895_v16, %v7707_v24  ;;  %v10901_v16 = vld [vmem:[#allocation110_spill] sm:$0xff] }
 0x5eb   :  { %v4305_v15 = vadd.f32 %v4304_v50, %v4050_v36  ;;  %v4054_v36 = vmul.f32 %v8895_v5, %v8895_v5  ;;  %10896 = vst [vmem:[#allocation95_spill] sm:$0xff] %v8919_v52  ;;  %v8925_v5 = vsub.f32 %v10897_v46, %v7707_v24  ;;  %v10903_v46 = vld [vmem:[#allocation116_spill] sm:$0xff] }
 0x5ed   :  { %v4306_v53 = vadd.f32 %v4305_v15, %v4051_v35  ;;  %v4055_v35 = vmul.f32 %v8901_v3, %v8901_v3  ;;  %10898 = vst [vmem:[#allocation100_spill] sm:$0xff] %v8925_v5  ;;  %v8931_v3 = vsub.f32 %v10899_v63, %v7707_v24  ;;  %v10905_v63 = vld [vmem:[#allocation122_spill] sm:$0xff] }
 0x5ef   :  { %v4307_v11 = vadd.f32 %v4306_v53, %v4052_v59  ;;  %v4056_v59 = vmul.f32 %v8907_v56, %v8907_v56  ;;  %10900 = vst [vmem:[#allocation105_spill] sm:$0xff] %v8931_v3  ;;  %v8937_v56 = vsub.f32 %v10901_v16, %v7707_v24  ;;  %v10907_v16 = vld [vmem:[#allocation128_spill] sm:$0xff] }
 0x5f1   :  { %v4308_v50 = vadd.f32 %v4307_v11, %v4053_v34  ;;  %v4057_v34 = vmul.f32 %v8913_v12, %v8913_v12  ;;  %10902 = vst [vmem:[#allocation110_spill] sm:$0xff] %v8937_v56  ;;  %v8943_v12 = vsub.f32 %v10903_v46, %v7707_v24  ;;  %v10909_v46 = vld [vmem:[#allocation134_spill] sm:$0xff] }
 0x5f3   :  { %v4309_v15 = vadd.f32 %v4308_v50, %v4054_v36  ;;  %v4058_v36 = vmul.f32 %v8919_v52, %v8919_v52  ;;  %10904 = vst [vmem:[#allocation116_spill] sm:$0xff] %v8943_v12  ;;  %v8949_v52 = vsub.f32 %v10905_v63, %v7707_v24  ;;  %v10911_v63 = vld [vmem:[#allocation140_spill] sm:$0xff] }
 0x5f5   :  { %v4310_v53 = vadd.f32 %v4309_v15, %v4055_v35  ;;  %v4059_v35 = vmul.f32 %v8925_v5, %v8925_v5  ;;  %10906 = vst [vmem:[#allocation122_spill] sm:$0xff] %v8949_v52  ;;  %v8955_v5 = vsub.f32 %v10907_v16, %v7707_v24  ;;  %v10913_v16 = vld [vmem:[#allocation145_spill] sm:$0xff] }
 0x5f7   :  { %v4311_v11 = vadd.f32 %v4310_v53, %v4056_v59  ;;  %v4060_v59 = vmul.f32 %v8931_v3, %v8931_v3  ;;  %10908 = vst [vmem:[#allocation128_spill] sm:$0xff] %v8955_v5  ;;  %v8961_v3 = vsub.f32 %v10909_v46, %v7707_v24  ;;  %v10914_v46 = vld [vmem:[#allocation150_spill] sm:$0xff] }
 0x5f9   :  { %v4312_v50 = vadd.f32 %v4311_v11, %v4057_v34  ;;  %v4061_v34 = vmul.f32 %v8937_v56, %v8937_v56  ;;  %10910 = vst [vmem:[#allocation134_spill] sm:$0xff] %v8961_v3  ;;  %v8967_v56 = vsub.f32 %v10911_v63, %v7707_v24  ;;  %v10916_v63 = vld [vmem:[#allocation151_spill] sm:$0xff] }
 0x5fb   :  { %v4313_v15 = vadd.f32 %v4312_v50, %v4058_v36  ;;  %v4062_v36 = vmul.f32 %v8943_v12, %v8943_v12  ;;  %10912 = vst [vmem:[#allocation140_spill] sm:$0xff] %v8967_v56  ;;  %v8973_v12 = vsub.f32 %v10913_v16, %v7707_v24  ;;  %v10917_v16 = vld [vmem:[#allocation152_spill] sm:$0xff] }
 0x5fd   :  { %v4314_v53 = vadd.f32 %v4313_v15, %v4059_v35  ;;  %v4063_v35 = vmul.f32 %v8949_v52, %v8949_v52  ;;  %v8979_v52 = vsub.f32 %v10914_v46, %v7707_v24  ;;  %v10918_v46 = vld [vmem:[#allocation153_spill] sm:$0xff] }
 0x5ff   :  { %v4315_v11 = vadd.f32 %v4314_v53, %v4060_v59  ;;  %v4064_v59 = vmul.f32 %v8955_v5, %v8955_v5  ;;  %10915 = vst [vmem:[#allocation145_spill] sm:$0xff] %v8979_v52  ;;  %v8985_v5 = vsub.f32 %v10916_v63, %v7707_v24  ;;  %v9003_v63 = vsub.f32 %v7523_v26, %v7707_v24 }
 0x601   :  { %v4316_v50 = vadd.f32 %v4315_v11, %v4061_v34  ;;  %v4065_v34 = vmul.f32 %v8961_v3, %v8961_v3  ;;  %v8991_v3 = vsub.f32 %v10917_v16, %v7707_v24  ;;  %v10920_v16 = vld [vmem:[#allocation154_spill] sm:$0xff]  ;;  %v4072_v26 = vmul.f32 %v9003_v63, %v9003_v63 }
 0x603   :  { %v4317_v15 = vadd.f32 %v4316_v50, %v4062_v36  ;;  %v4066_v36 = vmul.f32 %v8967_v56, %v8967_v56  ;;  %v8997_v56 = vsub.f32 %v10918_v46, %v7707_v24  ;;  %v9015_v46 = vsub.f32 %v7533_v6, %v7707_v24 }
 0x605   :  { %v4318_v53 = vadd.f32 %v4317_v15, %v4063_v35  ;;  %v4067_v35 = vmul.f32 %v8973_v12, %v8973_v12  ;;  %10919 = vst [vmem:[#allocation150_spill] sm:$0xff] %v8997_v56  ;;  %v4074_v6 = vmul.f32 %v9015_v46, %v9015_v46 }
 0x607   :  { %v4319_v11 = vadd.f32 %v4318_v53, %v4064_v59  ;;  %v4068_v59 = vmul.f32 %v8979_v52, %v8979_v52  ;;  %v9009_v52 = vsub.f32 %v10920_v16, %v7707_v24  ;;  %v10922_v16 = vld [vmem:[#allocation155_spill] sm:$0xff] }
 0x609   :  { %v4320_v50 = vadd.f32 %v4319_v11, %v4065_v34  ;;  %v4069_v34 = vmul.f32 %v8985_v5, %v8985_v5  ;;  %10921 = vst [vmem:[#allocation151_spill] sm:$0xff] %v9009_v52 }
 0x60b   :  { %v4321_v15 = vadd.f32 %v4320_v50, %v4066_v36  ;;  %v4070_v36 = vmul.f32 %v8991_v3, %v8991_v3 }
 0x60d   :  { %v4322_v53 = vadd.f32 %v4321_v15, %v4067_v35  ;;  %v4071_v35 = vmul.f32 %v8997_v56, %v8997_v56  ;;  %v9027_v56 = vsub.f32 %v10922_v16, %v7707_v24  ;;  %v9045_v16 = vsub.f32 %v7558_v14, %v7707_v24 }
 0x60f   :  { %v4323_v11 = vadd.f32 %v4322_v53, %v4068_v59  ;;  %v9021_v53 = vsub.f32 %v7538_v25, %v7707_v24  ;;  %10923 = vst [vmem:[#allocation152_spill] sm:$0xff] %v9027_v56  ;;  %v4079_v14 = vmul.f32 %v9045_v16, %v9045_v16 }
 0x611   :  { %v4324_v50 = vadd.f32 %v4323_v11, %v4069_v34  ;;  %v4073_v34 = vmul.f32 %v9009_v52, %v9009_v52  ;;  %v4075_v25 = vmul.f32 %v9021_v53, %v9021_v53 }
 0x613   :  { %v4325_v15 = vadd.f32 %v4324_v50, %v4070_v36  ;;  %v9033_v50 = vsub.f32 %v7548_v10, %v7707_v24 }
 0x615   :  { %v4326_v59 = vadd.f32 %v4325_v15, %v4071_v35  ;;  %v10924_v15 = vld [vmem:[#allocation63_spill] sm:$0xff]  ;;  %v4077_v10 = vmul.f32 %v9033_v50, %v9033_v50 }
 0x616   :  { %v9039_v52 = vsub.f32 %v10924_v15, %v7707_v24  ;;  %v10926_v15 = vld [vmem:[#allocation201_spill] sm:$0xff] }
 0x617   :  { %v4327_v11 = vadd.f32 %v4326_v59, %v4072_v26  ;;  %v4076_v26 = vmul.f32 %v9027_v56, %v9027_v56  ;;  %v9057_v56 = vsub.f32 %v10926_v15, %v7707_v24  ;;  %v9075_v15 = vsub.f32 %v7583_v8, %v7707_v24 }
 0x618   :  { %10925 = vst [vmem:[#allocation153_spill] sm:$0xff] %v9039_v52 }
 0x619   :  { %v4328_v36 = vadd.f32 %v4327_v11, %v4073_v34  ;;  %v9051_v11 = vsub.f32 %v7563_v30, %v7707_v24  ;;  %10927 = vst [vmem:[#allocation154_spill] sm:$0xff] %v9057_v56  ;;  %v4084_v8 = vmul.f32 %v9075_v15, %v9075_v15 }
 0x61b   :  { %v4329_v35 = vadd.f32 %v4328_v36, %v4074_v6  ;;  %v4078_v6 = vmul.f32 %v9039_v52, %v9039_v52  ;;  %v4080_v30 = vmul.f32 %v9051_v11, %v9051_v11 }
 0x61d   :  { %v4330_v59 = vadd.f32 %v4329_v35, %v4075_v25  ;;  %v9063_v35 = vsub.f32 %v7573_v1, %v7707_v24 }
 0x61f   :  { %v4331_v34 = vadd.f32 %v4330_v59, %v4076_v26  ;;  %v10928_v59 = vld [vmem:[#allocation202_spill] sm:$0xff]  ;;  %v4082_v1 = vmul.f32 %v9063_v35, %v9063_v35 }
 0x620   :  { %v9069_v52 = vsub.f32 %v10928_v59, %v7707_v24  ;;  %v10930_v59 = vld [vmem:[#allocation203_spill] sm:$0xff] }
 0x621   :  { %v4332_v36 = vadd.f32 %v4331_v34, %v4077_v10  ;;  %v4081_v10 = vmul.f32 %v9057_v56, %v9057_v56  ;;  %v9087_v56 = vsub.f32 %v10930_v59, %v7707_v24  ;;  %v9105_v59 = vsub.f32 %v7608_v27, %v7707_v24 }
 0x622   :  { %10929 = vst [vmem:[#allocation155_spill] sm:$0xff] %v9069_v52 }
 0x623   :  { %v4333_v25 = vadd.f32 %v4332_v36, %v4078_v6  ;;  %v9081_v36 = vsub.f32 %v7588_v13, %v7707_v24  ;;  %10931 = vst [vmem:[#allocation63_spill] sm:$0xff] %v9087_v56  ;;  %v4089_v27 = vmul.f32 %v9105_v59, %v9105_v59 }
 0x624   :  { %10935 = vst [vmem:[#allocation203_spill] sm:$0xff] %v9105_v59 }
 0x625   :  { %v4334_v26 = vadd.f32 %v4333_v25, %v4079_v14  ;;  %v4083_v14 = vmul.f32 %v9069_v52, %v9069_v52  ;;  %v4085_v13 = vmul.f32 %v9081_v36, %v9081_v36 }
 0x627   :  { %v4335_v34 = vadd.f32 %v4334_v26, %v4080_v30  ;;  %v9093_v26 = vsub.f32 %v7598_v18, %v7707_v24 }
 0x629   :  { %v4336_v6 = vadd.f32 %v4335_v34, %v4081_v10  ;;  %10932 = vst [vmem:[#allocation201_spill] sm:$0xff] %v9093_v26  ;;  %v10933_v34 = vld [vmem:[#allocation204_spill] sm:$0xff]  ;;  %v4087_v18 = vmul.f32 %v9093_v26, %v9093_v26 }
 0x62a   :  { %v9099_v52 = vsub.f32 %v10933_v34, %v7707_v24  ;;  %v10937_v34 = vld [vmem:[#allocation205_spill] sm:$0xff] }
 0x62b   :  { %v4337_v25 = vadd.f32 %v4336_v6, %v4082_v1  ;;  %v4086_v1 = vmul.f32 %v9087_v56, %v9087_v56  ;;  %v9117_v56 = vsub.f32 %v10937_v34, %v7707_v24  ;;  %v9135_v34 = vsub.f32 %v7633_v7, %v7707_v24 }
 0x62c   :  { %10934 = vst [vmem:[#allocation202_spill] sm:$0xff] %v9099_v52 }
 0x62d   :  { %v4338_v30 = vadd.f32 %v4337_v25, %v4083_v14  ;;  %v9111_v25 = vsub.f32 %v7613_v62, %v7707_v24  ;;  %10938 = vst [vmem:[#allocation205_spill] sm:$0xff] %v9117_v56  ;;  %v4094_v7 = vmul.f32 %v9135_v34, %v9135_v34 }
 0x62e   :  { %10943 = vst [vmem:[#allocation221_spill] sm:$0xff] %v9135_v34 }
 0x62f   :  { %v4339_v10 = vadd.f32 %v4338_v30, %v4084_v8  ;;  %10936 = vst [vmem:[#allocation204_spill] sm:$0xff] %v9111_v25  ;;  %v4088_v8 = vmul.f32 %v9099_v52, %v9099_v52  ;;  %v4090_v62 = vmul.f32 %v9111_v25, %v9111_v25 }
 0x631   :  { %v4340_v6 = vadd.f32 %v4339_v10, %v4085_v13  ;;  %v10939_v10 = vld [vmem:[#allocation206_spill] sm:$0xff] }
 0x632   :  { %v9123_v26 = vsub.f32 %v10939_v10, %v7707_v24  ;;  %v10944_v10 = vld [vmem:[#allocation208_spill] sm:$0xff] }
 0x633   :  { %v4341_v14 = vadd.f32 %v4340_v6, %v4086_v1  ;;  %v10941_v6 = vld [vmem:[#allocation207_spill] sm:$0xff]  ;;  %v9141_v25 = vsub.f32 %v10944_v10, %v7707_v24  ;;  %v9159_v10 = vsub.f32 %v7649_v9, %v7707_v24 }
 0x634   :  { %10940 = vst [vmem:[#allocation206_spill] sm:$0xff] %v9123_v26  ;;  %v9129_v52 = vsub.f32 %v10941_v6, %v7707_v24  ;;  %v9147_v6 = vsub.f32 %v7641_v61, %v7707_v24 }
 0x635   :  { %v4342_v30 = vadd.f32 %v4341_v14, %v4087_v18  ;;  %v4091_v18 = vmul.f32 %v9117_v56, %v9117_v56  ;;  %10945 = vst [vmem:[#allocation208_spill] sm:$0xff] %v9141_v25  ;;  %v4098_v9 = vmul.f32 %v9159_v10, %v9159_v10 }
 0x636   :  { %10942 = vst [vmem:[#allocation207_spill] sm:$0xff] %v9129_v52  ;;  %v4096_v61 = vmul.f32 %v9147_v6, %v9147_v6 }
 0x637   :  { %v4343_v13 = vadd.f32 %v4342_v30, %v4088_v8  ;;  %v4092_v8 = vmul.f32 %v9123_v26, %v9123_v26  ;;  %10946 = vst [vmem:[#allocation222_spill] sm:$0xff] %v9147_v6 }
 0x638   :  { %10949 = vst [vmem:[#allocation223_spill] sm:$0xff] %v9159_v10 }
 0x639   :  { %v4344_v1 = vadd.f32 %v4343_v13, %v4089_v27  ;;  %v4093_v27 = vmul.f32 %v9129_v52, %v9129_v52 }
 0x63b   :  { %v4345_v14 = vadd.f32 %v4344_v1, %v4090_v62  ;;  %v10947_v1 = vld [vmem:[#allocation209_spill] sm:$0xff] }
 0x63c   :  { %v9153_v26 = vsub.f32 %v10947_v1, %v7707_v24  ;;  %v10951_v1 = vld [vmem:[#allocation210_spill] sm:$0xff] }
 0x63d   :  { %v4346_v30 = vadd.f32 %v4345_v14, %v4091_v18  ;;  %v4095_v18 = vmul.f32 %v9141_v25, %v9141_v25  ;;  %v9171_v25 = vsub.f32 %v10951_v1, %v7707_v24  ;;  %v10957_v1 = vld [vmem:[#allocation213_spill] sm:$0xff] }
 0x63e   :  { %10948 = vst [vmem:[#allocation209_spill] sm:$0xff] %v9153_v26  ;;  %v9189_v10 = vsub.f32 %v10957_v1, %v7707_v24  ;;  %v10963_v1 = vld [vmem:[#allocation216_spill] sm:$0xff] }
 0x63f   :  { %v4347_v13 = vadd.f32 %v4346_v30, %v4092_v8  ;;  %v9165_v30 = vsub.f32 %v7653_v0, %v7707_v24  ;;  %10952 = vst [vmem:[#allocation210_spill] sm:$0xff] %v9171_v25 }
 0x640   :  { %10958 = vst [vmem:[#allocation213_spill] sm:$0xff] %v9189_v10 }
 0x641   :  { %v4348_v62 = vadd.f32 %v4347_v13, %v4093_v27  ;;  %10950 = vst [vmem:[#allocation224_spill] sm:$0xff] %v9165_v30  ;;  %v4097_v27 = vmul.f32 %v9153_v26, %v9153_v26  ;;  %v4099_v0 = vmul.f32 %v9165_v30, %v9165_v30 }
 0x643   :  { %v4349_v14 = vadd.f32 %v4348_v62, %v4094_v7  ;;  %v10953_v62 = vld [vmem:[#allocation211_spill] sm:$0xff] }
 0x644   :  { %v9177_v6 = vsub.f32 %v10953_v62, %v7707_v24  ;;  %v10959_v62 = vld [vmem:[#allocation214_spill] sm:$0xff] }
 0x645   :  { %v4350_v8 = vadd.f32 %v4349_v14, %v4095_v18  ;;  %v10955_v14 = vld [vmem:[#allocation212_spill] sm:$0xff]  ;;  %v9195_v30 = vsub.f32 %v10959_v62, %v7707_v24  ;;  %v10965_v62 = vld [vmem:[#allocation217_spill] sm:$0xff] }
 0x646   :  { %10954 = vst [vmem:[#allocation211_spill] sm:$0xff] %v9177_v6  ;;  %v9183_v26 = vsub.f32 %v10955_v14, %v7707_v24  ;;  %v10961_v14 = vld [vmem:[#allocation215_spill] sm:$0xff] }
 0x647   :  { %v4351_v13 = vadd.f32 %v4350_v8, %v4096_v61  ;;  %v4100_v61 = vmul.f32 %v9171_v25, %v9171_v25  ;;  %10960 = vst [vmem:[#allocation214_spill] sm:$0xff] %v9195_v30  ;;  %v9201_v25 = vsub.f32 %v10961_v14, %v7707_v24  ;;  %v10967_v14 = vld [vmem:[#allocation218_spill] sm:$0xff] }
 0x648   :  { %10956 = vst [vmem:[#allocation212_spill] sm:$0xff] %v9183_v26 }
 0x649   :  { %v4352_v7 = vadd.f32 %v4351_v13, %v4097_v27  ;;  %v4101_v27 = vmul.f32 %v9177_v6, %v9177_v6  ;;  %10962 = vst [vmem:[#allocation215_spill] sm:$0xff] %v9201_v25  ;;  %v9207_v6 = vsub.f32 %v10963_v1, %v7707_v24  ;;  %v10969_v1 = vld [vmem:[#allocation219_spill] sm:$0xff] }
 0x64b   :  { %v4353_v18 = vadd.f32 %v4352_v7, %v4098_v9  ;;  %v4102_v9 = vmul.f32 %v9183_v26, %v9183_v26  ;;  %10964 = vst [vmem:[#allocation216_spill] sm:$0xff] %v9207_v6  ;;  %v9213_v26 = vsub.f32 %v10965_v62, %v7707_v24  ;;  %v9231_v62 = vsub.f32 %v7697_v20, %v7707_v24 }
 0x64d   :  { %v4354_v8 = vadd.f32 %v4353_v18, %v4099_v0  ;;  %v4103_v0 = vmul.f32 %v9189_v10, %v9189_v10  ;;  %10966 = vst [vmem:[#allocation217_spill] sm:$0xff] %v9213_v26  ;;  %v9219_v10 = vsub.f32 %v10967_v14, %v7707_v24  ;;  %v3855_v14 = vsub.f32 %v7701_v42, %v7707_v24 }
 0x64f   :  { %v4355_v13 = vadd.f32 %v4354_v8, %v4100_v61  ;;  %v4104_v61 = vmul.f32 %v9195_v30, %v9195_v30  ;;  %10968 = vst [vmem:[#allocation218_spill] sm:$0xff] %v9219_v10  ;;  %v9225_v30 = vsub.f32 %v10969_v1, %v7707_v24  ;;  %v4110_v1 = vmul.f32 %v9231_v62, %v9231_v62 }
 0x651   :  { %v4356_v7 = vadd.f32 %v4355_v13, %v4101_v27  ;;  %v4105_v27 = vmul.f32 %v9201_v25, %v9201_v25  ;;  %10970 = vst [vmem:[#allocation219_spill] sm:$0xff] %v9225_v30 }
 0x653   :  { %v4357_v18 = vadd.f32 %v4356_v7, %v4102_v9  ;;  %v4106_v9 = vmul.f32 %v9207_v6, %v9207_v6 }
 0x655   :  { %v4358_v8 = vadd.f32 %v4357_v18, %v4103_v0  ;;  %v4107_v0 = vmul.f32 %v9213_v26, %v9213_v26 }
 0x657   :  { %v4359_v13 = vadd.f32 %v4358_v8, %v4104_v61  ;;  %v4108_v61 = vmul.f32 %v9219_v10, %v9219_v10 }
 0x659   :  { %v4360_v7 = vadd.f32 %v4359_v13, %v4105_v27  ;;  %v4109_v27 = vmul.f32 %v9225_v30, %v9225_v30 }
 0x65b   :  { %v4361_v18 = vadd.f32 %v4360_v7, %v4106_v9  ;;  %v4111_v9 = vmul.f32 %v3855_v14, %v3855_v14 }
 0x65d   :  { %v4362_v8 = vadd.f32 %v4361_v18, %v4107_v0  ;;  %v10971_v18 = vld [vmem:[#allocation220_spill] sm:$0xff] }
 0x65f   :  { %v4363_v13 = vadd.f32 %v4362_v8, %v4108_v61 }
 0x661   :  { %v4364_v26 = vadd.f32 %v4363_v13, %v4109_v27  ;;  %v10974_v13 = vld [vmem:[#allocation71_spill] sm:$0xff] }
 0x663   :  { %v4365_v7 = vadd.f32 %v4364_v26, %v4110_v1  ;;  %v10975_v1 = vld [vmem:[#allocation73_spill] sm:$0xff] }
 0x665   :  { %v4366_v6 = vadd.f32 %v4365_v7, %v4111_v9  ;;  %v10976_v9 = vld [vmem:[#allocation74_spill] sm:$0xff] }
 0x667   :  { %v4367_v20 = vrot.slane %v4366_v6, 4 }
 0x669   :  { %v4368_v25 = vadd.f32 %v4367_v20, %v4366_v6  ;;  %v10977_v20 = vld [vmem:[#allocation75_spill] sm:$0xff] }
 0x66b   :  { %v4369_v34 = vrot.slane %v4368_v25, 2 }
 0x66d   :  { %v4370_v52 = vadd.f32 %v4369_v34, %v4368_v25 }
 0x66f   :  { %v4371_v10 = vrot.slane %v4370_v52, 1 }
 0x671   :  { %v4372_v0 = vadd.f32 %v4371_v10, %v4370_v52  ;;  %v10972_v52 = vld [vmem:[#allocation70_spill] sm:$0xff] }
 0x673   :  { %v4373_v56 = vmul.f32 %v4372_v0, %v10971_v18  ;;  %v10978_v0 = vld [vmem:[#allocation76_spill] sm:$0xff] }
 0x675   :  { %v4374_v42 = vadd.f32 1e-05, %v4373_v56  ;;  %v10973_v56 = vld [vmem:[#allocation69_spill] sm:$0xff] }
 0x677   :  { %5889 = vrsqrt.f32 %v4374_v42  ;;  %vm4381_vm2 = vweird.f32 %v4374_v42 }
 0x67d   :  { %v5890_v24 = vpop.eup %5889 }
 0x67e   :  { %v4376_v30 = vmul.f32 %v5890_v24, %v4374_v42  ;;  %vm4382_vm1 = vweird.f32 %v5890_v24 }
 0x67f   :  { %vm4383_vm3 = vmor %vm4381_vm2, %vm4382_vm1 }
 0x680   :  { %v4377_v61 = vmul.f32 %v5890_v24, %v4376_v30 }
 0x682   :  { %v4378_v8 = vmul.f32 0.5, %v4377_v61 }
 0x684   :  { %v4379_v59 = vsub.f32 1.5, %v4378_v8  ;;  %v10979_v8 = vld [vmem:[#allocation77_spill] sm:$0xff] }
 0x686   :  { %v4380_v27 = vmul.f32 %v5890_v24, %v4379_v59 }
 0x688   :  { %v9242_v26 = vsel %vm4383_vm3, %v5890_v24, %v4380_v27 }
 0x689   :  { %v4640_v6 = vmul.f32 %v9242_v26, %v3855_v14  ;;  %v4385_v34 = vmul.f32 %v9242_v26, %v10972_v52  ;;  %v4386_v10 = vmul.f32 %v9242_v26, %v10973_v56  ;;  %v4387_v30 = vmul.f32 %v9242_v26, %v10974_v13  ;;  %v10981_v13 = vld [vmem:[#allocation79_spill] sm:$0xff] }
 0x68a   :  { %v4388_v59 = vmul.f32 %v9242_v26, %v10975_v1  ;;  %v4389_v7 = vmul.f32 %v9242_v26, %v10976_v9  ;;  %v4390_v14 = vmul.f32 %v9242_v26, %v10977_v20  ;;  %v4391_v18 = vmul.f32 %v9242_v26, %v10978_v0  ;;  %v10982_v20 = vld [vmem:[#allocation80_spill] sm:$0xff] }
 0x68b   :  { %v4896_v25 = vmax.f32 %v4640_v6, 0.0  ;;  %v4641_v42 = vmax.f32 %v4385_v34, 0.0  ;;  %v4642_v24 = vmax.f32 %v4386_v10, 0.0  ;;  %v4643_v61 = vmax.f32 %v4387_v30, 0.0  ;;  %v10983_v10 = vld [vmem:[#allocation81_spill] sm:$0xff] }
 0x68c   :  { %v4392_v27 = vmul.f32 %v9242_v26, %v10979_v8  ;;  %v4644_v6 = vmax.f32 %v4388_v59, 0.0  ;;  %v4645_v56 = vmax.f32 %v4389_v7, 0.0  ;;  %v4394_v1 = vmul.f32 %v9242_v26, %v10981_v13  ;;  %v10984_v59 = vld [vmem:[#allocation82_spill] sm:$0xff] }
 0x68d   :  { %5152 = vst [vmem:[#allocation7 + $0x7f8] sm:$0xff] %v4896_v25  ;;  %v10980_v25 = vld [vmem:[#allocation78_spill] sm:$0xff]  ;;  %v4646_v9 = vmax.f32 %v4390_v14, 0.0  ;;  %v4395_v0 = vmul.f32 %v9242_v26, %v10982_v20  ;;  %v4647_v34 = vmax.f32 %v4391_v18, 0.0  ;;  %v4396_v30 = vmul.f32 %v9242_v26, %v10983_v10 }
 0x68e   :  { %v4393_v52 = vmul.f32 %v9242_v26, %v10980_v25  ;;  %4897 = vst [vmem:[#allocation7] sm:$0xff] %v4641_v42  ;;  %v4648_v8 = vmax.f32 %v4392_v27, 0.0  ;;  %v4397_v25 = vmul.f32 %v9242_v26, %v10984_v59  ;;  %v10985_v42 = vld [vmem:[#allocation83_spill] sm:$0xff]  ;;  %v4650_v14 = vmax.f32 %v4394_v1, 0.0 }
 0x68f   :  { %4898 = vst [vmem:[#allocation7 + $0x8] sm:$0xff] %v4642_v24  ;;  %v4398_v13 = vmul.f32 %v9242_v26, %v10985_v42  ;;  %v10986_v24 = vld [vmem:[#allocation84_spill] sm:$0xff]  ;;  %v4651_v18 = vmax.f32 %v4395_v0, 0.0  ;;  %v4652_v27 = vmax.f32 %v4396_v30, 0.0 }
 0x690   :  { %4899 = vst [vmem:[#allocation7 + $0x10] sm:$0xff] %v4643_v61  ;;  %v4649_v7 = vmax.f32 %v4393_v52, 0.0  ;;  %v4399_v20 = vmul.f32 %v9242_v26, %v10986_v24  ;;  %v10987_v61 = vld [vmem:[#allocation85_spill] sm:$0xff]  ;;  %v4653_v52 = vmax.f32 %v4397_v25, 0.0 }
 0x691   :  { %4900 = vst [vmem:[#allocation7 + $0x18] sm:$0xff] %v4644_v6  ;;  %v4400_v10 = vmul.f32 %v9242_v26, %v10987_v61  ;;  %v10988_v6 = vld [vmem:[#allocation86_spill] sm:$0xff]  ;;  %v4654_v1 = vmax.f32 %v4398_v13, 0.0 }
 0x692   :  { %4901 = vst [vmem:[#allocation7 + $0x20] sm:$0xff] %v4645_v56  ;;  %v4401_v59 = vmul.f32 %v9242_v26, %v10988_v6  ;;  %v10989_v56 = vld [vmem:[#allocation87_spill] sm:$0xff]  ;;  %v4655_v0 = vmax.f32 %v4399_v20, 0.0 }
 0x693   :  { %4902 = vst [vmem:[#allocation7 + $0x28] sm:$0xff] %v4646_v9  ;;  %v4402_v42 = vmul.f32 %v9242_v26, %v10989_v56  ;;  %v10990_v9 = vld [vmem:[#allocation88_spill] sm:$0xff]  ;;  %v4656_v30 = vmax.f32 %v4400_v10, 0.0 }
 0x694   :  { %4903 = vst [vmem:[#allocation7 + $0x30] sm:$0xff] %v4647_v34  ;;  %v4403_v24 = vmul.f32 %v9242_v26, %v10990_v9  ;;  %v10991_v34 = vld [vmem:[#allocation89_spill] sm:$0xff]  ;;  %v4657_v25 = vmax.f32 %v4401_v59, 0.0 }
 0x695   :  { %4904 = vst [vmem:[#allocation7 + $0x38] sm:$0xff] %v4648_v8  ;;  %v4404_v61 = vmul.f32 %v9242_v26, %v10991_v34  ;;  %v10992_v8 = vld [vmem:[#allocation91_spill] sm:$0xff]  ;;  %v4658_v13 = vmax.f32 %v4402_v42, 0.0 }
 0x696   :  { %4905 = vst [vmem:[#allocation7 + $0x40] sm:$0xff] %v4649_v7  ;;  %v4405_v6 = vmul.f32 %v9242_v26, %v10992_v8  ;;  %v10993_v7 = vld [vmem:[#allocation92_spill] sm:$0xff]  ;;  %v4659_v20 = vmax.f32 %v4403_v24, 0.0 }
 0x697   :  { %4906 = vst [vmem:[#allocation7 + $0x48] sm:$0xff] %v4650_v14  ;;  %v4406_v56 = vmul.f32 %v9242_v26, %v10993_v7  ;;  %v10994_v14 = vld [vmem:[#allocation93_spill] sm:$0xff]  ;;  %v4660_v10 = vmax.f32 %v4404_v61, 0.0 }
 0x698   :  { %4907 = vst [vmem:[#allocation7 + $0x50] sm:$0xff] %v4651_v18  ;;  %v4407_v9 = vmul.f32 %v9242_v26, %v10994_v14  ;;  %v10995_v18 = vld [vmem:[#allocation94_spill] sm:$0xff]  ;;  %v4661_v59 = vmax.f32 %v4405_v6, 0.0 }
 0x699   :  { %4908 = vst [vmem:[#allocation7 + $0x58] sm:$0xff] %v4652_v27  ;;  %v4408_v34 = vmul.f32 %v9242_v26, %v10995_v18  ;;  %v10996_v27 = vld [vmem:[#allocation96_spill] sm:$0xff]  ;;  %v4662_v42 = vmax.f32 %v4406_v56, 0.0 }
 0x69a   :  { %4909 = vst [vmem:[#allocation7 + $0x60] sm:$0xff] %v4653_v52  ;;  %v4409_v8 = vmul.f32 %v9242_v26, %v10996_v27  ;;  %v10997_v52 = vld [vmem:[#allocation97_spill] sm:$0xff]  ;;  %v4663_v24 = vmax.f32 %v4407_v9, 0.0 }
 0x69b   :  { %4910 = vst [vmem:[#allocation7 + $0x68] sm:$0xff] %v4654_v1  ;;  %v4410_v7 = vmul.f32 %v9242_v26, %v10997_v52  ;;  %v10998_v1 = vld [vmem:[#allocation98_spill] sm:$0xff]  ;;  %v4664_v61 = vmax.f32 %v4408_v34, 0.0 }
 0x69c   :  { %4911 = vst [vmem:[#allocation7 + $0x70] sm:$0xff] %v4655_v0  ;;  %v4411_v14 = vmul.f32 %v9242_v26, %v10998_v1  ;;  %v10999_v0 = vld [vmem:[#allocation99_spill] sm:$0xff]  ;;  %v4665_v6 = vmax.f32 %v4409_v8, 0.0 }
 0x69d   :  { %4912 = vst [vmem:[#allocation7 + $0x78] sm:$0xff] %v4656_v30  ;;  %v4412_v18 = vmul.f32 %v9242_v26, %v10999_v0  ;;  %v11000_v30 = vld [vmem:[#allocation101_spill] sm:$0xff]  ;;  %v4666_v56 = vmax.f32 %v4410_v7, 0.0 }
 0x69e   :  { %4913 = vst [vmem:[#allocation7 + $0x80] sm:$0xff] %v4657_v25  ;;  %v4413_v27 = vmul.f32 %v9242_v26, %v11000_v30  ;;  %v11001_v25 = vld [vmem:[#allocation102_spill] sm:$0xff]  ;;  %v4667_v9 = vmax.f32 %v4411_v14, 0.0 }
 0x69f   :  { %4914 = vst [vmem:[#allocation7 + $0x88] sm:$0xff] %v4658_v13  ;;  %v4414_v52 = vmul.f32 %v9242_v26, %v11001_v25  ;;  %v11002_v13 = vld [vmem:[#allocation103_spill] sm:$0xff]  ;;  %v4668_v34 = vmax.f32 %v4412_v18, 0.0 }
 0x6a0   :  { %4915 = vst [vmem:[#allocation7 + $0x90] sm:$0xff] %v4659_v20  ;;  %v4415_v1 = vmul.f32 %v9242_v26, %v11002_v13  ;;  %v11003_v20 = vld [vmem:[#allocation104_spill] sm:$0xff]  ;;  %v4669_v8 = vmax.f32 %v4413_v27, 0.0 }
 0x6a1   :  { %4916 = vst [vmem:[#allocation7 + $0x98] sm:$0xff] %v4660_v10  ;;  %v4416_v0 = vmul.f32 %v9242_v26, %v11003_v20  ;;  %v11004_v10 = vld [vmem:[#allocation106_spill] sm:$0xff]  ;;  %v4670_v7 = vmax.f32 %v4414_v52, 0.0 }
 0x6a2   :  { %4917 = vst [vmem:[#allocation7 + $0xa0] sm:$0xff] %v4661_v59  ;;  %v4417_v30 = vmul.f32 %v9242_v26, %v11004_v10  ;;  %v11005_v59 = vld [vmem:[#allocation107_spill] sm:$0xff]  ;;  %v4671_v14 = vmax.f32 %v4415_v1, 0.0 }
 0x6a3   :  { %4918 = vst [vmem:[#allocation7 + $0xa8] sm:$0xff] %v4662_v42  ;;  %v4418_v25 = vmul.f32 %v9242_v26, %v11005_v59  ;;  %v11006_v42 = vld [vmem:[#allocation108_spill] sm:$0xff]  ;;  %v4672_v18 = vmax.f32 %v4416_v0, 0.0 }
 0x6a4   :  { %4919 = vst [vmem:[#allocation7 + $0xb0] sm:$0xff] %v4663_v24  ;;  %v4419_v13 = vmul.f32 %v9242_v26, %v11006_v42  ;;  %v11007_v24 = vld [vmem:[#allocation109_spill] sm:$0xff]  ;;  %v4673_v27 = vmax.f32 %v4417_v30, 0.0 }
 0x6a5   :  { %4920 = vst [vmem:[#allocation7 + $0xb8] sm:$0xff] %v4664_v61  ;;  %v4420_v20 = vmul.f32 %v9242_v26, %v11007_v24  ;;  %v11008_v61 = vld [vmem:[#allocation111_spill] sm:$0xff]  ;;  %v4674_v52 = vmax.f32 %v4418_v25, 0.0 }
 0x6a6   :  { %4921 = vst [vmem:[#allocation7 + $0xc0] sm:$0xff] %v4665_v6  ;;  %v4421_v10 = vmul.f32 %v9242_v26, %v11008_v61  ;;  %v11009_v6 = vld [vmem:[#allocation112_spill] sm:$0xff]  ;;  %v4675_v1 = vmax.f32 %v4419_v13, 0.0 }
 0x6a7   :  { %4922 = vst [vmem:[#allocation7 + $0xc8] sm:$0xff] %v4666_v56  ;;  %v4422_v59 = vmul.f32 %v9242_v26, %v11009_v6  ;;  %v11010_v56 = vld [vmem:[#allocation113_spill] sm:$0xff]  ;;  %v4676_v0 = vmax.f32 %v4420_v20, 0.0 }
 0x6a8   :  { %4923 = vst [vmem:[#allocation7 + $0xd0] sm:$0xff] %v4667_v9  ;;  %v4423_v42 = vmul.f32 %v9242_v26, %v11010_v56  ;;  %v11011_v9 = vld [vmem:[#allocation114_spill] sm:$0xff]  ;;  %v4677_v30 = vmax.f32 %v4421_v10, 0.0 }
 0x6a9   :  { %4924 = vst [vmem:[#allocation7 + $0xd8] sm:$0xff] %v4668_v34  ;;  %v4424_v24 = vmul.f32 %v9242_v26, %v11011_v9  ;;  %v11012_v34 = vld [vmem:[#allocation115_spill] sm:$0xff]  ;;  %v4678_v25 = vmax.f32 %v4422_v59, 0.0 }
 0x6aa   :  { %4925 = vst [vmem:[#allocation7 + $0xe0] sm:$0xff] %v4669_v8  ;;  %v4425_v61 = vmul.f32 %v9242_v26, %v11012_v34  ;;  %v11013_v8 = vld [vmem:[#allocation117_spill] sm:$0xff]  ;;  %v4679_v13 = vmax.f32 %v4423_v42, 0.0 }
 0x6ab   :  { %4926 = vst [vmem:[#allocation7 + $0xe8] sm:$0xff] %v4670_v7  ;;  %v4426_v6 = vmul.f32 %v9242_v26, %v11013_v8  ;;  %v11014_v7 = vld [vmem:[#allocation118_spill] sm:$0xff]  ;;  %v4680_v20 = vmax.f32 %v4424_v24, 0.0 }
 0x6ac   :  { %4927 = vst [vmem:[#allocation7 + $0xf0] sm:$0xff] %v4671_v14  ;;  %v4427_v56 = vmul.f32 %v9242_v26, %v11014_v7  ;;  %v11015_v14 = vld [vmem:[#allocation119_spill] sm:$0xff]  ;;  %v4681_v10 = vmax.f32 %v4425_v61, 0.0 }
 0x6ad   :  { %4928 = vst [vmem:[#allocation7 + $0xf8] sm:$0xff] %v4672_v18  ;;  %v4428_v9 = vmul.f32 %v9242_v26, %v11015_v14  ;;  %v11016_v18 = vld [vmem:[#allocation120_spill] sm:$0xff]  ;;  %v4682_v59 = vmax.f32 %v4426_v6, 0.0 }
 0x6ae   :  { %4929 = vst [vmem:[#allocation7 + $0x100] sm:$0xff] %v4673_v27  ;;  %v4429_v34 = vmul.f32 %v9242_v26, %v11016_v18  ;;  %v11017_v27 = vld [vmem:[#allocation121_spill] sm:$0xff]  ;;  %v4683_v42 = vmax.f32 %v4427_v56, 0.0 }
 0x6af   :  { %4930 = vst [vmem:[#allocation7 + $0x108] sm:$0xff] %v4674_v52  ;;  %v4430_v8 = vmul.f32 %v9242_v26, %v11017_v27  ;;  %v11018_v52 = vld [vmem:[#allocation123_spill] sm:$0xff]  ;;  %v4684_v24 = vmax.f32 %v4428_v9, 0.0 }
 0x6b0   :  { %4931 = vst [vmem:[#allocation7 + $0x110] sm:$0xff] %v4675_v1  ;;  %v4431_v7 = vmul.f32 %v9242_v26, %v11018_v52  ;;  %v11019_v1 = vld [vmem:[#allocation124_spill] sm:$0xff]  ;;  %v4685_v61 = vmax.f32 %v4429_v34, 0.0 }
 0x6b1   :  { %4932 = vst [vmem:[#allocation7 + $0x118] sm:$0xff] %v4676_v0  ;;  %v4432_v14 = vmul.f32 %v9242_v26, %v11019_v1  ;;  %v11020_v0 = vld [vmem:[#allocation125_spill] sm:$0xff]  ;;  %v4686_v6 = vmax.f32 %v4430_v8, 0.0 }
 0x6b2   :  { %4933 = vst [vmem:[#allocation7 + $0x120] sm:$0xff] %v4677_v30  ;;  %v4433_v18 = vmul.f32 %v9242_v26, %v11020_v0  ;;  %v11021_v30 = vld [vmem:[#allocation126_spill] sm:$0xff]  ;;  %v4687_v56 = vmax.f32 %v4431_v7, 0.0 }
 0x6b3   :  { %4934 = vst [vmem:[#allocation7 + $0x128] sm:$0xff] %v4678_v25  ;;  %v4434_v27 = vmul.f32 %v9242_v26, %v11021_v30  ;;  %v11022_v25 = vld [vmem:[#allocation127_spill] sm:$0xff]  ;;  %v4688_v9 = vmax.f32 %v4432_v14, 0.0 }
 0x6b4   :  { %4935 = vst [vmem:[#allocation7 + $0x130] sm:$0xff] %v4679_v13  ;;  %v4435_v52 = vmul.f32 %v9242_v26, %v11022_v25  ;;  %v11023_v13 = vld [vmem:[#allocation129_spill] sm:$0xff]  ;;  %v4689_v34 = vmax.f32 %v4433_v18, 0.0 }
 0x6b5   :  { %4936 = vst [vmem:[#allocation7 + $0x138] sm:$0xff] %v4680_v20  ;;  %v4436_v1 = vmul.f32 %v9242_v26, %v11023_v13  ;;  %v11024_v20 = vld [vmem:[#allocation130_spill] sm:$0xff]  ;;  %v4690_v8 = vmax.f32 %v4434_v27, 0.0 }
 0x6b6   :  { %4937 = vst [vmem:[#allocation7 + $0x140] sm:$0xff] %v4681_v10  ;;  %v4437_v0 = vmul.f32 %v9242_v26, %v11024_v20  ;;  %v11025_v10 = vld [vmem:[#allocation131_spill] sm:$0xff]  ;;  %v4691_v7 = vmax.f32 %v4435_v52, 0.0 }
 0x6b7   :  { %4938 = vst [vmem:[#allocation7 + $0x148] sm:$0xff] %v4682_v59  ;;  %v4438_v30 = vmul.f32 %v9242_v26, %v11025_v10  ;;  %v11026_v59 = vld [vmem:[#allocation132_spill] sm:$0xff]  ;;  %v4692_v14 = vmax.f32 %v4436_v1, 0.0 }
 0x6b8   :  { %4939 = vst [vmem:[#allocation7 + $0x150] sm:$0xff] %v4683_v42  ;;  %v4439_v25 = vmul.f32 %v9242_v26, %v11026_v59  ;;  %v11027_v42 = vld [vmem:[#allocation133_spill] sm:$0xff]  ;;  %v4693_v18 = vmax.f32 %v4437_v0, 0.0 }
 0x6b9   :  { %4940 = vst [vmem:[#allocation7 + $0x158] sm:$0xff] %v4684_v24  ;;  %v4440_v13 = vmul.f32 %v9242_v26, %v11027_v42  ;;  %v11028_v24 = vld [vmem:[#allocation135_spill] sm:$0xff]  ;;  %v4694_v27 = vmax.f32 %v4438_v30, 0.0 }
 0x6ba   :  { %4941 = vst [vmem:[#allocation7 + $0x160] sm:$0xff] %v4685_v61  ;;  %v4441_v20 = vmul.f32 %v9242_v26, %v11028_v24  ;;  %v11029_v61 = vld [vmem:[#allocation136_spill] sm:$0xff]  ;;  %v4695_v52 = vmax.f32 %v4439_v25, 0.0 }
 0x6bb   :  { %4942 = vst [vmem:[#allocation7 + $0x168] sm:$0xff] %v4686_v6  ;;  %v4442_v10 = vmul.f32 %v9242_v26, %v11029_v61  ;;  %v11030_v6 = vld [vmem:[#allocation137_spill] sm:$0xff]  ;;  %v4696_v1 = vmax.f32 %v4440_v13, 0.0 }
 0x6bc   :  { %4943 = vst [vmem:[#allocation7 + $0x170] sm:$0xff] %v4687_v56  ;;  %v4443_v59 = vmul.f32 %v9242_v26, %v11030_v6  ;;  %v11031_v56 = vld [vmem:[#allocation138_spill] sm:$0xff]  ;;  %v4697_v0 = vmax.f32 %v4441_v20, 0.0 }
 0x6bd   :  { %4944 = vst [vmem:[#allocation7 + $0x178] sm:$0xff] %v4688_v9  ;;  %v4444_v42 = vmul.f32 %v9242_v26, %v11031_v56  ;;  %v11032_v9 = vld [vmem:[#allocation139_spill] sm:$0xff]  ;;  %v4698_v30 = vmax.f32 %v4442_v10, 0.0 }
 0x6be   :  { %4945 = vst [vmem:[#allocation7 + $0x180] sm:$0xff] %v4689_v34  ;;  %v4445_v24 = vmul.f32 %v9242_v26, %v11032_v9  ;;  %v11033_v34 = vld [vmem:[#allocation141_spill] sm:$0xff]  ;;  %v4699_v25 = vmax.f32 %v4443_v59, 0.0 }
 0x6bf   :  { %4946 = vst [vmem:[#allocation7 + $0x188] sm:$0xff] %v4690_v8  ;;  %v4446_v61 = vmul.f32 %v9242_v26, %v11033_v34  ;;  %v11034_v8 = vld [vmem:[#allocation142_spill] sm:$0xff]  ;;  %v4700_v13 = vmax.f32 %v4444_v42, 0.0 }
 0x6c0   :  { %4947 = vst [vmem:[#allocation7 + $0x190] sm:$0xff] %v4691_v7  ;;  %v4447_v6 = vmul.f32 %v9242_v26, %v11034_v8  ;;  %v11035_v7 = vld [vmem:[#allocation143_spill] sm:$0xff]  ;;  %v4701_v20 = vmax.f32 %v4445_v24, 0.0 }
 0x6c1   :  { %4948 = vst [vmem:[#allocation7 + $0x198] sm:$0xff] %v4692_v14  ;;  %v4448_v56 = vmul.f32 %v9242_v26, %v11035_v7  ;;  %v11036_v14 = vld [vmem:[#allocation144_spill] sm:$0xff]  ;;  %v4702_v10 = vmax.f32 %v4446_v61, 0.0 }
 0x6c2   :  { %4949 = vst [vmem:[#allocation7 + $0x1a0] sm:$0xff] %v4693_v18  ;;  %v4449_v9 = vmul.f32 %v9242_v26, %v11036_v14  ;;  %v11037_v18 = vld [vmem:[#allocation146_spill] sm:$0xff]  ;;  %v4703_v59 = vmax.f32 %v4447_v6, 0.0 }
 0x6c3   :  { %4950 = vst [vmem:[#allocation7 + $0x1a8] sm:$0xff] %v4694_v27  ;;  %v4450_v34 = vmul.f32 %v9242_v26, %v11037_v18  ;;  %v11038_v27 = vld [vmem:[#allocation147_spill] sm:$0xff]  ;;  %v4704_v42 = vmax.f32 %v4448_v56, 0.0 }
 0x6c4   :  { %4951 = vst [vmem:[#allocation7 + $0x1b0] sm:$0xff] %v4695_v52  ;;  %v4451_v8 = vmul.f32 %v9242_v26, %v11038_v27  ;;  %v11039_v52 = vld [vmem:[#allocation148_spill] sm:$0xff]  ;;  %v4705_v24 = vmax.f32 %v4449_v9, 0.0 }
 0x6c5   :  { %4952 = vst [vmem:[#allocation7 + $0x1b8] sm:$0xff] %v4696_v1  ;;  %v4452_v7 = vmul.f32 %v9242_v26, %v11039_v52  ;;  %v11040_v1 = vld [vmem:[#allocation149_spill] sm:$0xff]  ;;  %v4706_v61 = vmax.f32 %v4450_v34, 0.0 }
 0x6c6   :  { %4953 = vst [vmem:[#allocation7 + $0x1c0] sm:$0xff] %v4697_v0  ;;  %v4453_v14 = vmul.f32 %v9242_v26, %v11040_v1  ;;  %v11041_v0 = vld [vmem:[#allocation11_spill] sm:$0xff]  ;;  %v4707_v6 = vmax.f32 %v4451_v8, 0.0 }
 0x6c7   :  { %4954 = vst [vmem:[#allocation7 + $0x1c8] sm:$0xff] %v4698_v30  ;;  %v4454_v18 = vmul.f32 %v9242_v26, %v11041_v0  ;;  %v11042_v30 = vld [vmem:[#allocation12_spill] sm:$0xff]  ;;  %v4708_v56 = vmax.f32 %v4452_v7, 0.0 }
 0x6c8   :  { %4955 = vst [vmem:[#allocation7 + $0x1d0] sm:$0xff] %v4699_v25  ;;  %v4455_v27 = vmul.f32 %v9242_v26, %v11042_v30  ;;  %v11043_v25 = vld [vmem:[#allocation13_spill] sm:$0xff]  ;;  %v4709_v9 = vmax.f32 %v4453_v14, 0.0 }
 0x6c9   :  { %4956 = vst [vmem:[#allocation7 + $0x1d8] sm:$0xff] %v4700_v13  ;;  %v4456_v52 = vmul.f32 %v9242_v26, %v11043_v25  ;;  %v11044_v13 = vld [vmem:[#allocation14_spill] sm:$0xff]  ;;  %v4710_v34 = vmax.f32 %v4454_v18, 0.0 }
 0x6ca   :  { %4957 = vst [vmem:[#allocation7 + $0x1e0] sm:$0xff] %v4701_v20  ;;  %v4457_v1 = vmul.f32 %v9242_v26, %v11044_v13  ;;  %v11045_v20 = vld [vmem:[#allocation15_spill] sm:$0xff]  ;;  %v4711_v8 = vmax.f32 %v4455_v27, 0.0 }
 0x6cb   :  { %4958 = vst [vmem:[#allocation7 + $0x1e8] sm:$0xff] %v4702_v10  ;;  %v4458_v0 = vmul.f32 %v9242_v26, %v11045_v20  ;;  %v11046_v10 = vld [vmem:[#allocation16_spill] sm:$0xff]  ;;  %v4712_v7 = vmax.f32 %v4456_v52, 0.0 }
 0x6cc   :  { %4959 = vst [vmem:[#allocation7 + $0x1f0] sm:$0xff] %v4703_v59  ;;  %v4459_v30 = vmul.f32 %v9242_v26, %v11046_v10  ;;  %v11047_v59 = vld [vmem:[#allocation17_spill] sm:$0xff]  ;;  %v4713_v14 = vmax.f32 %v4457_v1, 0.0 }
 0x6cd   :  { %4960 = vst [vmem:[#allocation7 + $0x1f8] sm:$0xff] %v4704_v42  ;;  %v4460_v25 = vmul.f32 %v9242_v26, %v11047_v59  ;;  %v11048_v42 = vld [vmem:[#allocation18_spill] sm:$0xff]  ;;  %v4714_v18 = vmax.f32 %v4458_v0, 0.0 }
 0x6ce   :  { %4961 = vst [vmem:[#allocation7 + $0x200] sm:$0xff] %v4705_v24  ;;  %v4461_v13 = vmul.f32 %v9242_v26, %v11048_v42  ;;  %v11049_v24 = vld [vmem:[#allocation19_spill] sm:$0xff]  ;;  %v4715_v27 = vmax.f32 %v4459_v30, 0.0 }
 0x6cf   :  { %4962 = vst [vmem:[#allocation7 + $0x208] sm:$0xff] %v4706_v61  ;;  %v4462_v20 = vmul.f32 %v9242_v26, %v11049_v24  ;;  %v11050_v61 = vld [vmem:[#allocation20_spill] sm:$0xff]  ;;  %v4716_v52 = vmax.f32 %v4460_v25, 0.0 }
 0x6d0   :  { %4963 = vst [vmem:[#allocation7 + $0x210] sm:$0xff] %v4707_v6  ;;  %v4463_v10 = vmul.f32 %v9242_v26, %v11050_v61  ;;  %v11051_v6 = vld [vmem:[#allocation21_spill] sm:$0xff]  ;;  %v4717_v1 = vmax.f32 %v4461_v13, 0.0 }
 0x6d1   :  { %4964 = vst [vmem:[#allocation7 + $0x218] sm:$0xff] %v4708_v56  ;;  %v4464_v59 = vmul.f32 %v9242_v26, %v11051_v6  ;;  %v11052_v56 = vld [vmem:[#allocation22_spill] sm:$0xff]  ;;  %v4718_v0 = vmax.f32 %v4462_v20, 0.0 }
 0x6d2   :  { %4965 = vst [vmem:[#allocation7 + $0x220] sm:$0xff] %v4709_v9  ;;  %v4465_v42 = vmul.f32 %v9242_v26, %v11052_v56  ;;  %v11053_v9 = vld [vmem:[#allocation24_spill] sm:$0xff]  ;;  %v4719_v30 = vmax.f32 %v4463_v10, 0.0 }
 0x6d3   :  { %4966 = vst [vmem:[#allocation7 + $0x228] sm:$0xff] %v4710_v34  ;;  %v4466_v24 = vmul.f32 %v9242_v26, %v11053_v9  ;;  %v11054_v34 = vld [vmem:[#allocation26_spill] sm:$0xff]  ;;  %v4720_v25 = vmax.f32 %v4464_v59, 0.0 }
 0x6d4   :  { %4967 = vst [vmem:[#allocation7 + $0x230] sm:$0xff] %v4711_v8  ;;  %v4467_v61 = vmul.f32 %v9242_v26, %v11054_v34  ;;  %v11055_v8 = vld [vmem:[#allocation28_spill] sm:$0xff]  ;;  %v4721_v13 = vmax.f32 %v4465_v42, 0.0 }
 0x6d5   :  { %4968 = vst [vmem:[#allocation7 + $0x238] sm:$0xff] %v4712_v7  ;;  %v4468_v6 = vmul.f32 %v9242_v26, %v11055_v8  ;;  %v11056_v7 = vld [vmem:[#allocation30_spill] sm:$0xff]  ;;  %v4722_v20 = vmax.f32 %v4466_v24, 0.0 }
 0x6d6   :  { %4969 = vst [vmem:[#allocation7 + $0x240] sm:$0xff] %v4713_v14  ;;  %v4469_v56 = vmul.f32 %v9242_v26, %v11056_v7  ;;  %v11057_v14 = vld [vmem:[#allocation32_spill] sm:$0xff]  ;;  %v4723_v10 = vmax.f32 %v4467_v61, 0.0 }
 0x6d7   :  { %4970 = vst [vmem:[#allocation7 + $0x248] sm:$0xff] %v4714_v18  ;;  %v4470_v9 = vmul.f32 %v9242_v26, %v11057_v14  ;;  %v11058_v18 = vld [vmem:[#allocation34_spill] sm:$0xff]  ;;  %v4724_v59 = vmax.f32 %v4468_v6, 0.0 }
 0x6d8   :  { %4971 = vst [vmem:[#allocation7 + $0x250] sm:$0xff] %v4715_v27  ;;  %v4471_v34 = vmul.f32 %v9242_v26, %v11058_v18  ;;  %v11059_v27 = vld [vmem:[#allocation36_spill] sm:$0xff]  ;;  %v4725_v42 = vmax.f32 %v4469_v56, 0.0 }
 0x6d9   :  { %4972 = vst [vmem:[#allocation7 + $0x258] sm:$0xff] %v4716_v52  ;;  %v4472_v8 = vmul.f32 %v9242_v26, %v11059_v27  ;;  %v11060_v52 = vld [vmem:[#allocation38_spill] sm:$0xff]  ;;  %v4726_v24 = vmax.f32 %v4470_v9, 0.0 }
 0x6da   :  { %4973 = vst [vmem:[#allocation7 + $0x260] sm:$0xff] %v4717_v1  ;;  %v4473_v7 = vmul.f32 %v9242_v26, %v11060_v52  ;;  %v11061_v1 = vld [vmem:[#allocation40_spill] sm:$0xff]  ;;  %v4727_v61 = vmax.f32 %v4471_v34, 0.0 }
 0x6db   :  { %4974 = vst [vmem:[#allocation7 + $0x268] sm:$0xff] %v4718_v0  ;;  %v4474_v14 = vmul.f32 %v9242_v26, %v11061_v1  ;;  %v11062_v0 = vld [vmem:[#allocation42_spill] sm:$0xff]  ;;  %v4728_v6 = vmax.f32 %v4472_v8, 0.0 }
 0x6dc   :  { %4975 = vst [vmem:[#allocation7 + $0x270] sm:$0xff] %v4719_v30  ;;  %v4475_v18 = vmul.f32 %v9242_v26, %v11062_v0  ;;  %v11063_v30 = vld [vmem:[#allocation44_spill] sm:$0xff]  ;;  %v4729_v56 = vmax.f32 %v4473_v7, 0.0 }
 0x6dd   :  { %4976 = vst [vmem:[#allocation7 + $0x278] sm:$0xff] %v4720_v25  ;;  %v4476_v27 = vmul.f32 %v9242_v26, %v11063_v30  ;;  %v11064_v25 = vld [vmem:[#allocation46_spill] sm:$0xff]  ;;  %v4730_v9 = vmax.f32 %v4474_v14, 0.0 }
 0x6de   :  { %4977 = vst [vmem:[#allocation7 + $0x280] sm:$0xff] %v4721_v13  ;;  %v4477_v52 = vmul.f32 %v9242_v26, %v11064_v25  ;;  %v11065_v13 = vld [vmem:[#allocation48_spill] sm:$0xff]  ;;  %v4731_v34 = vmax.f32 %v4475_v18, 0.0 }
 0x6df   :  { %4978 = vst [vmem:[#allocation7 + $0x288] sm:$0xff] %v4722_v20  ;;  %v4478_v1 = vmul.f32 %v9242_v26, %v11065_v13  ;;  %v4479_v20 = vmul.f32 %v9242_v26, %v8271_v54  ;;  %v4732_v8 = vmax.f32 %v4476_v27, 0.0 }
 0x6e0   :  { %4979 = vst [vmem:[#allocation7 + $0x290] sm:$0xff] %v4723_v10  ;;  %v4480_v10 = vmul.f32 %v9242_v26, %v8277_v22  ;;  %v4733_v7 = vmax.f32 %v4477_v52, 0.0 }
 0x6e1   :  { %4980 = vst [vmem:[#allocation7 + $0x298] sm:$0xff] %v4724_v59  ;;  %v11066_v59 = vld [vmem:[#allocation50_spill] sm:$0xff]  ;;  %v4734_v14 = vmax.f32 %v4478_v1, 0.0  ;;  %v4735_v18 = vmax.f32 %v4479_v20, 0.0 }
 0x6e2   :  { %4981 = vst [vmem:[#allocation7 + $0x2a0] sm:$0xff] %v4725_v42  ;;  %v4481_v0 = vmul.f32 %v9242_v26, %v11066_v59  ;;  %v11067_v42 = vld [vmem:[#allocation52_spill] sm:$0xff]  ;;  %v4736_v27 = vmax.f32 %v4480_v10, 0.0 }
 0x6e3   :  { %4982 = vst [vmem:[#allocation7 + $0x2a8] sm:$0xff] %v4726_v24  ;;  %v4482_v30 = vmul.f32 %v9242_v26, %v11067_v42  ;;  %v11068_v24 = vld [vmem:[#allocation54_spill] sm:$0xff] }
 0x6e4   :  { %4983 = vst [vmem:[#allocation7 + $0x2b0] sm:$0xff] %v4727_v61  ;;  %v4483_v54 = vmul.f32 %v9242_v26, %v11068_v24  ;;  %v11069_v61 = vld [vmem:[#allocation57_spill] sm:$0xff]  ;;  %v4737_v52 = vmax.f32 %v4481_v0, 0.0 }
 0x6e5   :  { %4984 = vst [vmem:[#allocation7 + $0x2b8] sm:$0xff] %v4728_v6  ;;  %v4484_v22 = vmul.f32 %v9242_v26, %v11069_v61  ;;  %v11070_v6 = vld [vmem:[#allocation60_spill] sm:$0xff]  ;;  %v4738_v1 = vmax.f32 %v4482_v30, 0.0 }
 0x6e6   :  { %4985 = vst [vmem:[#allocation7 + $0x2c0] sm:$0xff] %v4729_v56  ;;  %v4485_v25 = vmul.f32 %v9242_v26, %v11070_v6  ;;  %v11071_v56 = vld [vmem:[#allocation66_spill] sm:$0xff]  ;;  %v4739_v20 = vmax.f32 %v4483_v54, 0.0 }
 0x6e7   :  { %4986 = vst [vmem:[#allocation7 + $0x2c8] sm:$0xff] %v4730_v9  ;;  %v4486_v13 = vmul.f32 %v9242_v26, %v11071_v56  ;;  %v11072_v9 = vld [vmem:[#allocation72_spill] sm:$0xff]  ;;  %v4740_v10 = vmax.f32 %v4484_v22, 0.0 }
 0x6e8   :  { %4987 = vst [vmem:[#allocation7 + $0x2d0] sm:$0xff] %v4731_v34  ;;  %v4487_v59 = vmul.f32 %v9242_v26, %v11072_v9  ;;  %v11073_v34 = vld [vmem:[#allocation156_spill] sm:$0xff]  ;;  %v4741_v0 = vmax.f32 %v4485_v25, 0.0 }
 0x6e9   :  { %4988 = vst [vmem:[#allocation7 + $0x2d8] sm:$0xff] %v4732_v8  ;;  %v4488_v42 = vmul.f32 %v9242_v26, %v11073_v34  ;;  %v11074_v8 = vld [vmem:[#allocation157_spill] sm:$0xff]  ;;  %v4742_v30 = vmax.f32 %v4486_v13, 0.0 }
 0x6ea   :  { %4989 = vst [vmem:[#allocation7 + $0x2e0] sm:$0xff] %v4733_v7  ;;  %v4489_v24 = vmul.f32 %v9242_v26, %v11074_v8  ;;  %v11075_v7 = vld [vmem:[#allocation158_spill] sm:$0xff]  ;;  %v4743_v54 = vmax.f32 %v4487_v59, 0.0 }
 0x6eb   :  { %4990 = vst [vmem:[#allocation7 + $0x2e8] sm:$0xff] %v4734_v14  ;;  %v4490_v61 = vmul.f32 %v9242_v26, %v11075_v7  ;;  %v11076_v14 = vld [vmem:[#allocation159_spill] sm:$0xff]  ;;  %v4744_v22 = vmax.f32 %v4488_v42, 0.0 }
 0x6ec   :  { %4991 = vst [vmem:[#allocation7 + $0x2f0] sm:$0xff] %v4735_v18  ;;  %v4491_v6 = vmul.f32 %v9242_v26, %v11076_v14  ;;  %v11077_v18 = vld [vmem:[#allocation160_spill] sm:$0xff]  ;;  %v4745_v25 = vmax.f32 %v4489_v24, 0.0 }
 0x6ed   :  { %4992 = vst [vmem:[#allocation7 + $0x2f8] sm:$0xff] %v4736_v27  ;;  %v4492_v56 = vmul.f32 %v9242_v26, %v11077_v18  ;;  %v11078_v27 = vld [vmem:[#allocation161_spill] sm:$0xff]  ;;  %v4746_v13 = vmax.f32 %v4490_v61, 0.0 }
 0x6ee   :  { %4993 = vst [vmem:[#allocation7 + $0x300] sm:$0xff] %v4737_v52  ;;  %v4493_v9 = vmul.f32 %v9242_v26, %v11078_v27  ;;  %v11079_v52 = vld [vmem:[#allocation162_spill] sm:$0xff]  ;;  %v4747_v59 = vmax.f32 %v4491_v6, 0.0 }
 0x6ef   :  { %4994 = vst [vmem:[#allocation7 + $0x308] sm:$0xff] %v4738_v1  ;;  %v4494_v34 = vmul.f32 %v9242_v26, %v11079_v52  ;;  %v11080_v1 = vld [vmem:[#allocation163_spill] sm:$0xff]  ;;  %v4748_v42 = vmax.f32 %v4492_v56, 0.0 }
 0x6f0   :  { %4995 = vst [vmem:[#allocation7 + $0x310] sm:$0xff] %v4739_v20  ;;  %v4495_v8 = vmul.f32 %v9242_v26, %v11080_v1  ;;  %v11081_v20 = vld [vmem:[#allocation164_spill] sm:$0xff]  ;;  %v4749_v24 = vmax.f32 %v4493_v9, 0.0 }
 0x6f1   :  { %4996 = vst [vmem:[#allocation7 + $0x318] sm:$0xff] %v4740_v10  ;;  %v4496_v7 = vmul.f32 %v9242_v26, %v11081_v20  ;;  %v11082_v10 = vld [vmem:[#allocation165_spill] sm:$0xff]  ;;  %v4750_v61 = vmax.f32 %v4494_v34, 0.0 }
 0x6f2   :  { %4997 = vst [vmem:[#allocation7 + $0x320] sm:$0xff] %v4741_v0  ;;  %v4497_v14 = vmul.f32 %v9242_v26, %v11082_v10  ;;  %v11083_v0 = vld [vmem:[#allocation166_spill] sm:$0xff]  ;;  %v4751_v6 = vmax.f32 %v4495_v8, 0.0 }
 0x6f3   :  { %4998 = vst [vmem:[#allocation7 + $0x328] sm:$0xff] %v4742_v30  ;;  %v4498_v18 = vmul.f32 %v9242_v26, %v11083_v0  ;;  %v11084_v30 = vld [vmem:[#allocation167_spill] sm:$0xff]  ;;  %v4752_v56 = vmax.f32 %v4496_v7, 0.0 }
 0x6f4   :  { %4999 = vst [vmem:[#allocation7 + $0x330] sm:$0xff] %v4743_v54  ;;  %v4499_v27 = vmul.f32 %v9242_v26, %v11084_v30  ;;  %v11085_v54 = vld [vmem:[#allocation168_spill] sm:$0xff]  ;;  %v4753_v9 = vmax.f32 %v4497_v14, 0.0 }
 0x6f5   :  { %5000 = vst [vmem:[#allocation7 + $0x338] sm:$0xff] %v4744_v22  ;;  %v4500_v52 = vmul.f32 %v9242_v26, %v11085_v54  ;;  %v11086_v22 = vld [vmem:[#allocation169_spill] sm:$0xff]  ;;  %v4754_v34 = vmax.f32 %v4498_v18, 0.0 }
 0x6f6   :  { %5001 = vst [vmem:[#allocation7 + $0x340] sm:$0xff] %v4745_v25  ;;  %v4501_v1 = vmul.f32 %v9242_v26, %v11086_v22  ;;  %v11087_v25 = vld [vmem:[#allocation170_spill] sm:$0xff]  ;;  %v4755_v8 = vmax.f32 %v4499_v27, 0.0 }
 0x6f7   :  { %5002 = vst [vmem:[#allocation7 + $0x348] sm:$0xff] %v4746_v13  ;;  %v4502_v20 = vmul.f32 %v9242_v26, %v11087_v25  ;;  %v11088_v13 = vld [vmem:[#allocation171_spill] sm:$0xff]  ;;  %v4756_v7 = vmax.f32 %v4500_v52, 0.0 }
 0x6f8   :  { %5003 = vst [vmem:[#allocation7 + $0x350] sm:$0xff] %v4747_v59  ;;  %v4503_v10 = vmul.f32 %v9242_v26, %v11088_v13  ;;  %v11089_v59 = vld [vmem:[#allocation172_spill] sm:$0xff]  ;;  %v4757_v14 = vmax.f32 %v4501_v1, 0.0 }
 0x6f9   :  { %5004 = vst [vmem:[#allocation7 + $0x358] sm:$0xff] %v4748_v42  ;;  %v4504_v0 = vmul.f32 %v9242_v26, %v11089_v59  ;;  %v11090_v42 = vld [vmem:[#allocation173_spill] sm:$0xff]  ;;  %v4758_v18 = vmax.f32 %v4502_v20, 0.0 }
 0x6fa   :  { %5005 = vst [vmem:[#allocation7 + $0x360] sm:$0xff] %v4749_v24  ;;  %v4505_v30 = vmul.f32 %v9242_v26, %v11090_v42  ;;  %v11091_v24 = vld [vmem:[#allocation174_spill] sm:$0xff]  ;;  %v4759_v27 = vmax.f32 %v4503_v10, 0.0 }
 0x6fb   :  { %5006 = vst [vmem:[#allocation7 + $0x368] sm:$0xff] %v4750_v61  ;;  %v4506_v54 = vmul.f32 %v9242_v26, %v11091_v24  ;;  %v11092_v61 = vld [vmem:[#allocation175_spill] sm:$0xff]  ;;  %v4760_v52 = vmax.f32 %v4504_v0, 0.0 }
 0x6fc   :  { %5007 = vst [vmem:[#allocation7 + $0x370] sm:$0xff] %v4751_v6  ;;  %v4507_v22 = vmul.f32 %v9242_v26, %v11092_v61  ;;  %v11093_v6 = vld [vmem:[#allocation176_spill] sm:$0xff]  ;;  %v4761_v1 = vmax.f32 %v4505_v30, 0.0 }
 0x6fd   :  { %5008 = vst [vmem:[#allocation7 + $0x378] sm:$0xff] %v4752_v56  ;;  %v4508_v25 = vmul.f32 %v9242_v26, %v11093_v6  ;;  %v11094_v56 = vld [vmem:[#allocation177_spill] sm:$0xff]  ;;  %v4762_v20 = vmax.f32 %v4506_v54, 0.0 }
 0x6fe   :  { %5009 = vst [vmem:[#allocation7 + $0x380] sm:$0xff] %v4753_v9  ;;  %v4509_v13 = vmul.f32 %v9242_v26, %v11094_v56  ;;  %v11095_v9 = vld [vmem:[#allocation178_spill] sm:$0xff]  ;;  %v4763_v10 = vmax.f32 %v4507_v22, 0.0 }
 0x6ff   :  { %5010 = vst [vmem:[#allocation7 + $0x388] sm:$0xff] %v4754_v34  ;;  %v4510_v59 = vmul.f32 %v9242_v26, %v11095_v9  ;;  %v11096_v34 = vld [vmem:[#allocation179_spill] sm:$0xff]  ;;  %v4764_v0 = vmax.f32 %v4508_v25, 0.0 }
 0x700   :  { %5011 = vst [vmem:[#allocation7 + $0x390] sm:$0xff] %v4755_v8  ;;  %v4511_v42 = vmul.f32 %v9242_v26, %v11096_v34  ;;  %v11097_v8 = vld [vmem:[#allocation180_spill] sm:$0xff]  ;;  %v4765_v30 = vmax.f32 %v4509_v13, 0.0 }
 0x701   :  { %5012 = vst [vmem:[#allocation7 + $0x398] sm:$0xff] %v4756_v7  ;;  %v4512_v24 = vmul.f32 %v9242_v26, %v11097_v8  ;;  %v11098_v7 = vld [vmem:[#allocation23_spill] sm:$0xff]  ;;  %v4766_v54 = vmax.f32 %v4510_v59, 0.0 }
 0x702   :  { %5013 = vst [vmem:[#allocation7 + $0x3a0] sm:$0xff] %v4757_v14  ;;  %v4513_v61 = vmul.f32 %v9242_v26, %v11098_v7  ;;  %v11099_v14 = vld [vmem:[#allocation25_spill] sm:$0xff]  ;;  %v4767_v22 = vmax.f32 %v4511_v42, 0.0 }
 0x703   :  { %5014 = vst [vmem:[#allocation7 + $0x3a8] sm:$0xff] %v4758_v18  ;;  %v4514_v6 = vmul.f32 %v9242_v26, %v11099_v14  ;;  %v11100_v18 = vld [vmem:[#allocation27_spill] sm:$0xff]  ;;  %v4768_v25 = vmax.f32 %v4512_v24, 0.0 }
 0x704   :  { %5015 = vst [vmem:[#allocation7 + $0x3b0] sm:$0xff] %v4759_v27  ;;  %v4515_v56 = vmul.f32 %v9242_v26, %v11100_v18  ;;  %v11101_v27 = vld [vmem:[#allocation29_spill] sm:$0xff]  ;;  %v4769_v13 = vmax.f32 %v4513_v61, 0.0 }
 0x705   :  { %5016 = vst [vmem:[#allocation7 + $0x3b8] sm:$0xff] %v4760_v52  ;;  %v4516_v9 = vmul.f32 %v9242_v26, %v11101_v27  ;;  %v11102_v52 = vld [vmem:[#allocation31_spill] sm:$0xff]  ;;  %v4770_v59 = vmax.f32 %v4514_v6, 0.0 }
 0x706   :  { %5017 = vst [vmem:[#allocation7 + $0x3c0] sm:$0xff] %v4761_v1  ;;  %v4517_v34 = vmul.f32 %v9242_v26, %v11102_v52  ;;  %v11103_v1 = vld [vmem:[#allocation33_spill] sm:$0xff]  ;;  %v4771_v42 = vmax.f32 %v4515_v56, 0.0 }
 0x707   :  { %5018 = vst [vmem:[#allocation7 + $0x3c8] sm:$0xff] %v4762_v20  ;;  %v4518_v8 = vmul.f32 %v9242_v26, %v11103_v1  ;;  %v11104_v20 = vld [vmem:[#allocation35_spill] sm:$0xff]  ;;  %v4772_v24 = vmax.f32 %v4516_v9, 0.0 }
 0x708   :  { %5019 = vst [vmem:[#allocation7 + $0x3d0] sm:$0xff] %v4763_v10  ;;  %v4519_v7 = vmul.f32 %v9242_v26, %v11104_v20  ;;  %v11105_v10 = vld [vmem:[#allocation37_spill] sm:$0xff]  ;;  %v4773_v61 = vmax.f32 %v4517_v34, 0.0 }
 0x709   :  { %5020 = vst [vmem:[#allocation7 + $0x3d8] sm:$0xff] %v4764_v0  ;;  %v4520_v14 = vmul.f32 %v9242_v26, %v11105_v10  ;;  %v11106_v0 = vld [vmem:[#allocation39_spill] sm:$0xff]  ;;  %v4774_v6 = vmax.f32 %v4518_v8, 0.0 }
 0x70a   :  { %5021 = vst [vmem:[#allocation7 + $0x3e0] sm:$0xff] %v4765_v30  ;;  %v4521_v18 = vmul.f32 %v9242_v26, %v11106_v0  ;;  %v11107_v30 = vld [vmem:[#allocation41_spill] sm:$0xff]  ;;  %v4775_v56 = vmax.f32 %v4519_v7, 0.0  ;;  %v11110_v10 = vld [vmem:[#allocation47_spill] sm:$0xff] }
 0x70b   :  { %5022 = vst [vmem:[#allocation7 + $0x3e8] sm:$0xff] %v4766_v54  ;;  %v4522_v27 = vmul.f32 %v9242_v26, %v11107_v30  ;;  %v11108_v54 = vld [vmem:[#allocation43_spill] sm:$0xff]  ;;  %v4776_v9 = vmax.f32 %v4520_v14, 0.0  ;;  %v4530_v14 = vmul.f32 %v9242_v26, %v11110_v10  ;;  %v11111_v0 = vld [vmem:[#allocation49_spill] sm:$0xff] }
 0x70c   :  { %5023 = vst [vmem:[#allocation7 + $0x3f0] sm:$0xff] %v4767_v22  ;;  %v4523_v52 = vmul.f32 %v9242_v26, %v11108_v54  ;;  %v4524_v22 = vmul.f32 %v9242_v26, %v8541_v38  ;;  %v4777_v34 = vmax.f32 %v4521_v18, 0.0  ;;  %v4528_v38 = vmul.f32 %v9242_v26, %v8565_v29  ;;  %v11112_v30 = vld [vmem:[#allocation51_spill] sm:$0xff]  ;;  %v11116_v10 = vld [vmem:[#allocation61_spill] sm:$0xff] }
 0x70d   :  { %5024 = vst [vmem:[#allocation7 + $0x3f8] sm:$0xff] %v4768_v25  ;;  %v4525_v25 = vmul.f32 %v9242_v26, %v8547_v43  ;;  %v4778_v8 = vmax.f32 %v4522_v27, 0.0  ;;  %v4529_v43 = vmul.f32 %v9242_v26, %v8571_v19  ;;  %v4532_v29 = vmul.f32 %v9242_v26, %v8589_v58 }
 0x70e   :  { %5025 = vst [vmem:[#allocation7 + $0x400] sm:$0xff] %v4769_v13  ;;  %v11109_v13 = vld [vmem:[#allocation45_spill] sm:$0xff]  ;;  %v4779_v20 = vmax.f32 %v4523_v52, 0.0  ;;  %v4780_v7 = vmax.f32 %v4524_v22, 0.0  ;;  %v4533_v19 = vmul.f32 %v9242_v26, %v11112_v30  ;;  %v4786_v54 = vmax.f32 %v4530_v14, 0.0 }
 0x70f   :  { %5026 = vst [vmem:[#allocation7 + $0x408] sm:$0xff] %v4770_v59  ;;  %v4526_v1 = vmul.f32 %v9242_v26, %v11109_v13  ;;  %v4527_v59 = vmul.f32 %v9242_v26, %v8559_v37  ;;  %v4531_v37 = vmul.f32 %v9242_v26, %v11111_v0  ;;  %v4785_v27 = vmax.f32 %v4529_v43, 0.0  ;;  %v11114_v13 = vld [vmem:[#allocation55_spill] sm:$0xff] }
 0x710   :  { %5027 = vst [vmem:[#allocation7 + $0x410] sm:$0xff] %v4771_v42  ;;  %v4781_v42 = vmax.f32 %v4525_v25, 0.0  ;;  %v4535_v52 = vmul.f32 %v9242_v26, %v8607_v4  ;;  %v4536_v58 = vmul.f32 %v9242_v26, %v8613_v32  ;;  %v4788_v22 = vmax.f32 %v4532_v29, 0.0  ;;  %v11117_v29 = vld [vmem:[#allocation64_spill] sm:$0xff] }
 0x711   :  { %5028 = vst [vmem:[#allocation7 + $0x418] sm:$0xff] %v4772_v24  ;;  %v4782_v24 = vmax.f32 %v4526_v1, 0.0  ;;  %v4783_v18 = vmax.f32 %v4527_v59, 0.0  ;;  %v4539_v4 = vmul.f32 %v9242_v26, %v8631_v57  ;;  %v11115_v59 = vld [vmem:[#allocation58_spill] sm:$0xff]  ;;  %v4542_v43 = vmul.f32 %v9242_v26, %v8649_v39 }
 0x712   :  { %5029 = vst [vmem:[#allocation7 + $0x420] sm:$0xff] %v4773_v61  ;;  %v4784_v61 = vmax.f32 %v4528_v38, 0.0  ;;  %v4540_v32 = vmul.f32 %v9242_v26, %v11115_v59  ;;  %v4541_v38 = vmul.f32 %v9242_v26, %v8643_v48  ;;  %v4543_v57 = vmul.f32 %v9242_v26, %v11116_v10  ;;  %v11122_v10 = vld [vmem:[#allocation184_spill] sm:$0xff] }
 0x713   :  { %5030 = vst [vmem:[#allocation7 + $0x428] sm:$0xff] %v4774_v6  ;;  %v4534_v6 = vmul.f32 %v9242_v26, %v8601_v17  ;;  %v4538_v17 = vmul.f32 %v9242_v26, %v11114_v13  ;;  %v4795_v14 = vmax.f32 %v4539_v4, 0.0  ;;  %v4545_v48 = vmul.f32 %v9242_v26, %v8667_v40 }
 0x714   :  { %5031 = vst [vmem:[#allocation7 + $0x430] sm:$0xff] %v4775_v56  ;;  %v4787_v56 = vmax.f32 %v4531_v37, 0.0  ;;  %v4796_v0 = vmax.f32 %v4540_v32, 0.0  ;;  %v4797_v37 = vmax.f32 %v4541_v38, 0.0  ;;  %v4546_v39 = vmul.f32 %v9242_v26, %v8673_v2 }
 0x715   :  { %5032 = vst [vmem:[#allocation7 + $0x438] sm:$0xff] %v4776_v9  ;;  %v11113_v9 = vld [vmem:[#allocation53_spill] sm:$0xff]  ;;  %v4790_v1 = vmax.f32 %v4534_v6, 0.0  ;;  %v4799_v30 = vmax.f32 %v4543_v57, 0.0  ;;  %v4549_v40 = vmul.f32 %v9242_v26, %v8691_v41  ;;  %v4550_v2 = vmul.f32 %v9242_v26, %v8697_v23 }
 0x716   :  { %5033 = vst [vmem:[#allocation7 + $0x440] sm:$0xff] %v4777_v34  ;;  %v4537_v25 = vmul.f32 %v9242_v26, %v11113_v9  ;;  %v4789_v34 = vmax.f32 %v4533_v19, 0.0  ;;  %v4802_v6 = vmax.f32 %v4546_v39, 0.0  ;;  %v4553_v41 = vmul.f32 %v9242_v26, %v8715_v55  ;;  %v11125_v39 = vld [vmem:[#allocation187_spill] sm:$0xff] }
 0x717   :  { %5034 = vst [vmem:[#allocation7 + $0x448] sm:$0xff] %v4778_v8  ;;  %v4791_v8 = vmax.f32 %v4535_v52, 0.0  ;;  %v4554_v23 = vmul.f32 %v9242_v26, %v8721_v31  ;;  %v4806_v9 = vmax.f32 %v4550_v2, 0.0  ;;  %v4557_v55 = vmul.f32 %v9242_v26, %v8739_v33  ;;  %v11128_v2 = vld [vmem:[#allocation190_spill] sm:$0xff] }
 0x718   :  { %5035 = vst [vmem:[#allocation7 + $0x450] sm:$0xff] %v4779_v20  ;;  %v4792_v20 = vmax.f32 %v4536_v58, 0.0  ;;  %v4561_v33 = vmul.f32 %v9242_v26, %v8763_v60 }
 0x719   :  { %5036 = vst [vmem:[#allocation7 + $0x458] sm:$0xff] %v4780_v7  ;;  %v4793_v7 = vmax.f32 %v4537_v25, 0.0  ;;  %v4810_v4 = vmax.f32 %v4554_v23, 0.0  ;;  %v4813_v32 = vmax.f32 %v4557_v55, 0.0  ;;  %v11131_v23 = vld [vmem:[#allocation193_spill] sm:$0xff]  ;;  %v11133_v55 = vld [vmem:[#allocation195_spill] sm:$0xff] }
 0x71a   :  { %5037 = vst [vmem:[#allocation7 + $0x460] sm:$0xff] %v4781_v42  ;;  %v4794_v42 = vmax.f32 %v4538_v17, 0.0  ;;  %v4809_v17 = vmax.f32 %v4553_v41, 0.0 }
 0x71b   :  { %5038 = vst [vmem:[#allocation7 + $0x468] sm:$0xff] %v4782_v24  ;;  %v4544_v24 = vmul.f32 %v9242_v26, %v8661_v51  ;;  %v4548_v51 = vmul.f32 %v9242_v26, %v8685_v28 }
 0x71c   :  { %5039 = vst [vmem:[#allocation7 + $0x470] sm:$0xff] %v4783_v18  ;;  %v4798_v18 = vmax.f32 %v4542_v43, 0.0  ;;  %v11121_v43 = vld [vmem:[#allocation183_spill] sm:$0xff] }
 0x71d   :  { %5040 = vst [vmem:[#allocation7 + $0x478] sm:$0xff] %v4784_v61  ;;  %v4547_v61 = vmul.f32 %v9242_v26, %v11117_v29  ;;  %v4800_v19 = vmax.f32 %v4544_v24, 0.0  ;;  %v4804_v58 = vmax.f32 %v4548_v51, 0.0  ;;  %v4817_v24 = vmax.f32 %v4561_v33, 0.0  ;;  %v11136_v33 = vld [vmem:[#allocation59_spill] sm:$0xff] }
 0x71e   :  { %5041 = vst [vmem:[#allocation7 + $0x480] sm:$0xff] %v4785_v27  ;;  %v4801_v27 = vmax.f32 %v4545_v48, 0.0 }
 0x71f   :  { %5042 = vst [vmem:[#allocation7 + $0x488] sm:$0xff] %v4786_v54  ;;  %v4551_v54 = vmul.f32 %v9242_v26, %v8703_v47  ;;  %v4803_v52 = vmax.f32 %v4547_v61, 0.0  ;;  %v4555_v47 = vmul.f32 %v9242_v26, %v8727_v21  ;;  %v4559_v21 = vmul.f32 %v9242_v26, %v8751_v49  ;;  %v11126_v61 = vld [vmem:[#allocation188_spill] sm:$0xff] }
 0x720   :  { %5043 = vst [vmem:[#allocation7 + $0x490] sm:$0xff] %v4787_v56  ;;  %v11118_v56 = vld [vmem:[#allocation67_spill] sm:$0xff]  ;;  %v4563_v49 = vmul.f32 %v9242_v26, %v11121_v43 }
 0x721   :  { %5044 = vst [vmem:[#allocation7 + $0x498] sm:$0xff] %v4788_v22  ;;  %v4552_v28 = vmul.f32 %v9242_v26, %v11118_v56  ;;  %v4805_v22 = vmax.f32 %v4549_v40, 0.0  ;;  %v4807_v25 = vmax.f32 %v4551_v54, 0.0 }
 0x722   :  { %5045 = vst [vmem:[#allocation7 + $0x4a0] sm:$0xff] %v4789_v34  ;;  %v4556_v34 = vmul.f32 %v9242_v26, %v8733_v45  ;;  %v4560_v45 = vmul.f32 %v9242_v26, %v8757_v44  ;;  %v4564_v44 = vmul.f32 %v9242_v26, %v11122_v10  ;;  %v4819_v29 = vmax.f32 %v4563_v49, 0.0  ;;  %v11138_v49 = vld [vmem:[#allocation65_spill] sm:$0xff] }
 0x723   :  { %5046 = vst [vmem:[#allocation7 + $0x4a8] sm:$0xff] %v4790_v1  ;;  %v4808_v13 = vmax.f32 %v4552_v28, 0.0  ;;  %v11119_v1 = vld [vmem:[#allocation181_spill] sm:$0xff] }
 0x724   :  { %5047 = vst [vmem:[#allocation7 + $0x4b0] sm:$0xff] %v4791_v8  ;;  %v4558_v31 = vmul.f32 %v9242_v26, %v11119_v1  ;;  %v4811_v8 = vmax.f32 %v4555_v47, 0.0  ;;  %v4812_v59 = vmax.f32 %v4556_v34, 0.0  ;;  %v4816_v57 = vmax.f32 %v4560_v45, 0.0 }
 0x725   :  { %5048 = vst [vmem:[#allocation7 + $0x4b8] sm:$0xff] %v4792_v20  ;;  %v11120_v20 = vld [vmem:[#allocation182_spill] sm:$0xff]  ;;  %v4820_v51 = vmax.f32 %v4564_v44, 0.0  ;;  %v11139_v44 = vld [vmem:[#allocation68_spill] sm:$0xff] }
 0x726   :  { %5049 = vst [vmem:[#allocation7 + $0x4c0] sm:$0xff] %v4793_v7  ;;  %v4562_v38 = vmul.f32 %v9242_v26, %v11120_v20  ;;  %v4814_v7 = vmax.f32 %v4558_v31, 0.0  ;;  %v11134_v31 = vld [vmem:[#allocation196_spill] sm:$0xff] }
 0x727   :  { %5050 = vst [vmem:[#allocation7 + $0x4c8] sm:$0xff] %v4794_v42  ;;  %v4815_v42 = vmax.f32 %v4559_v21, 0.0 }
 0x728   :  { %5051 = vst [vmem:[#allocation7 + $0x4d0] sm:$0xff] %v4795_v14  ;;  %v11123_v14 = vld [vmem:[#allocation185_spill] sm:$0xff] }
 0x729   :  { %5052 = vst [vmem:[#allocation7 + $0x4d8] sm:$0xff] %v4796_v0  ;;  %v4565_v60 = vmul.f32 %v9242_v26, %v11123_v14  ;;  %v11124_v0 = vld [vmem:[#allocation186_spill] sm:$0xff] }
 0x72a   :  { %5053 = vst [vmem:[#allocation7 + $0x4e0] sm:$0xff] %v4797_v37  ;;  %v4566_v48 = vmul.f32 %v9242_v26, %v11124_v0  ;;  %v4818_v37 = vmax.f32 %v4562_v38, 0.0  ;;  %v11137_v38 = vld [vmem:[#allocation62_spill] sm:$0xff] }
 0x72b   :  { %5054 = vst [vmem:[#allocation7 + $0x4e8] sm:$0xff] %v4798_v18  ;;  %v4567_v18 = vmul.f32 %v9242_v26, %v11125_v39 }
 0x72c   :  { %5055 = vst [vmem:[#allocation7 + $0x4f0] sm:$0xff] %v4799_v30  ;;  %v4568_v30 = vmul.f32 %v9242_v26, %v11126_v61  ;;  %v4822_v54 = vmax.f32 %v4566_v48, 0.0  ;;  %v11141_v48 = vld [vmem:[#allocation198_spill] sm:$0xff] }
 0x72d   :  { %5056 = vst [vmem:[#allocation7 + $0x4f8] sm:$0xff] %v4800_v19  ;;  %v11127_v19 = vld [vmem:[#allocation189_spill] sm:$0xff]  ;;  %v4823_v28 = vmax.f32 %v4567_v18, 0.0  ;;  %v11142_v18 = vld [vmem:[#allocation199_spill] sm:$0xff] }
 0x72e   :  { %5057 = vst [vmem:[#allocation7 + $0x500] sm:$0xff] %v4801_v27  ;;  %v4569_v40 = vmul.f32 %v9242_v26, %v11127_v19  ;;  %v4821_v27 = vmax.f32 %v4565_v60, 0.0  ;;  %v11140_v60 = vld [vmem:[#allocation197_spill] sm:$0xff] }
 0x72f   :  { %5058 = vst [vmem:[#allocation7 + $0x508] sm:$0xff] %v4802_v6  ;;  %v4570_v6 = vmul.f32 %v9242_v26, %v11128_v2 }
 0x730   :  { %5059 = vst [vmem:[#allocation7 + $0x510] sm:$0xff] %v4803_v52  ;;  %v11129_v52 = vld [vmem:[#allocation191_spill] sm:$0xff]  ;;  %v4825_v47 = vmax.f32 %v4569_v40, 0.0  ;;  %v11144_v40 = vld [vmem:[#allocation90_spill] sm:$0xff] }
 0x731   :  { %5060 = vst [vmem:[#allocation7 + $0x518] sm:$0xff] %v4804_v58  ;;  %v4571_v56 = vmul.f32 %v9242_v26, %v11129_v52  ;;  %v11130_v58 = vld [vmem:[#allocation192_spill] sm:$0xff] }
 0x732   :  { %5061 = vst [vmem:[#allocation7 + $0x520] sm:$0xff] %v4805_v22  ;;  %v4572_v41 = vmul.f32 %v9242_v26, %v11130_v58  ;;  %v4824_v22 = vmax.f32 %v4568_v30, 0.0  ;;  %v11143_v30 = vld [vmem:[#allocation200_spill] sm:$0xff] }
 0x733   :  { %5062 = vst [vmem:[#allocation7 + $0x528] sm:$0xff] %v4806_v9  ;;  %v4573_v9 = vmul.f32 %v9242_v26, %v11131_v23  ;;  %v4827_v1 = vmax.f32 %v4571_v56, 0.0  ;;  %v11146_v56 = vld [vmem:[#allocation100_spill] sm:$0xff] }
 0x734   :  { %5063 = vst [vmem:[#allocation7 + $0x530] sm:$0xff] %v4807_v25  ;;  %v11132_v25 = vld [vmem:[#allocation194_spill] sm:$0xff]  ;;  %v4828_v21 = vmax.f32 %v4572_v41, 0.0  ;;  %v11147_v41 = vld [vmem:[#allocation105_spill] sm:$0xff] }
 0x735   :  { %5064 = vst [vmem:[#allocation7 + $0x538] sm:$0xff] %v4808_v13  ;;  %v4574_v34 = vmul.f32 %v9242_v26, %v11132_v25  ;;  %v4826_v13 = vmax.f32 %v4570_v6, 0.0  ;;  %v11145_v6 = vld [vmem:[#allocation95_spill] sm:$0xff] }
 0x736   :  { %5065 = vst [vmem:[#allocation7 + $0x540] sm:$0xff] %v4809_v17  ;;  %v4575_v17 = vmul.f32 %v9242_v26, %v11133_v55 }
 0x737   :  { %5066 = vst [vmem:[#allocation7 + $0x548] sm:$0xff] %v4810_v4  ;;  %v4576_v4 = vmul.f32 %v9242_v26, %v11134_v31  ;;  %v4830_v20 = vmax.f32 %v4574_v34, 0.0  ;;  %v11149_v34 = vld [vmem:[#allocation116_spill] sm:$0xff] }
 0x738   :  { %5067 = vst [vmem:[#allocation7 + $0x550] sm:$0xff] %v4811_v8  ;;  %v11135_v8 = vld [vmem:[#allocation56_spill] sm:$0xff]  ;;  %v4831_v43 = vmax.f32 %v4575_v17, 0.0  ;;  %v11150_v17 = vld [vmem:[#allocation122_spill] sm:$0xff] }
 0x739   :  { %5068 = vst [vmem:[#allocation7 + $0x558] sm:$0xff] %v4812_v59  ;;  %v4577_v45 = vmul.f32 %v9242_v26, %v11135_v8  ;;  %v4829_v59 = vmax.f32 %v4573_v9, 0.0  ;;  %v4832_v10 = vmax.f32 %v4576_v4, 0.0  ;;  %v11148_v9 = vld [vmem:[#allocation110_spill] sm:$0xff]  ;;  %v11151_v4 = vld [vmem:[#allocation128_spill] sm:$0xff] }
 0x73a   :  { %5069 = vst [vmem:[#allocation7 + $0x560] sm:$0xff] %v4813_v32  ;;  %v4578_v32 = vmul.f32 %v9242_v26, %v11136_v33 }
 0x73b   :  { %5070 = vst [vmem:[#allocation7 + $0x568] sm:$0xff] %v4814_v7  ;;  %v4579_v7 = vmul.f32 %v9242_v26, %v11137_v38  ;;  %v4833_v14 = vmax.f32 %v4577_v45, 0.0  ;;  %v11152_v45 = vld [vmem:[#allocation134_spill] sm:$0xff] }
 0x73c   :  { %5071 = vst [vmem:[#allocation7 + $0x570] sm:$0xff] %v4815_v42  ;;  %v4580_v42 = vmul.f32 %v9242_v26, %v11138_v49  ;;  %v4834_v0 = vmax.f32 %v4578_v32, 0.0  ;;  %v11153_v32 = vld [vmem:[#allocation140_spill] sm:$0xff]  ;;  %v11154_v49 = vld [vmem:[#allocation145_spill] sm:$0xff] }
 0x73d   :  { %5072 = vst [vmem:[#allocation7 + $0x578] sm:$0xff] %v4816_v57  ;;  %v4581_v57 = vmul.f32 %v9242_v26, %v11139_v44  ;;  %v4835_v39 = vmax.f32 %v4579_v7, 0.0  ;;  %v4596_v7 = vmul.f32 %v9242_v26, %v8973_v12  ;;  %v4598_v44 = vmul.f32 %v9242_v26, %v8985_v5 }
 0x73e   :  { %5073 = vst [vmem:[#allocation7 + $0x580] sm:$0xff] %v4817_v24  ;;  %v4582_v24 = vmul.f32 %v9242_v26, %v11140_v60  ;;  %v4836_v61 = vmax.f32 %v4580_v42, 0.0  ;;  %v4597_v42 = vmul.f32 %v9242_v26, %v11154_v49 }
 0x73f   :  { %5074 = vst [vmem:[#allocation7 + $0x588] sm:$0xff] %v4818_v37  ;;  %v4583_v37 = vmul.f32 %v9242_v26, %v11141_v48  ;;  %v4837_v19 = vmax.f32 %v4581_v57, 0.0  ;;  %v4601_v48 = vmul.f32 %v9242_v26, %v9003_v63 }
 0x740   :  { %5075 = vst [vmem:[#allocation7 + $0x590] sm:$0xff] %v4819_v29  ;;  %v4584_v29 = vmul.f32 %v9242_v26, %v11142_v18  ;;  %v4838_v2 = vmax.f32 %v4582_v24, 0.0  ;;  %v11155_v24 = vld [vmem:[#allocation150_spill] sm:$0xff]  ;;  %v4854_v18 = vmax.f32 %v4598_v44, 0.0 }
 0x741   :  { %5076 = vst [vmem:[#allocation7 + $0x598] sm:$0xff] %v4820_v51  ;;  %v4585_v51 = vmul.f32 %v9242_v26, %v11143_v30  ;;  %v4839_v52 = vmax.f32 %v4583_v37, 0.0  ;;  %v4600_v12 = vmul.f32 %v9242_v26, %v11155_v24  ;;  %v4853_v37 = vmax.f32 %v4597_v42, 0.0 }
 0x742   :  { %5077 = vst [vmem:[#allocation7 + $0x5a0] sm:$0xff] %v4821_v27  ;;  %v4586_v27 = vmul.f32 %v9242_v26, %v11144_v40  ;;  %v4840_v58 = vmax.f32 %v4584_v29, 0.0  ;;  %v4606_v40 = vmul.f32 %v9242_v26, %v9033_v50 }
 0x743   :  { %5078 = vst [vmem:[#allocation7 + $0x5a8] sm:$0xff] %v4822_v54  ;;  %v4587_v54 = vmul.f32 %v9242_v26, %v11145_v6  ;;  %v4841_v23 = vmax.f32 %v4585_v51, 0.0  ;;  %v4856_v30 = vmax.f32 %v4600_v12, 0.0  ;;  %v11157_v51 = vld [vmem:[#allocation152_spill] sm:$0xff] }
 0x744   :  { %5079 = vst [vmem:[#allocation7 + $0x5b0] sm:$0xff] %v4823_v28  ;;  %v4588_v28 = vmul.f32 %v9242_v26, %v11146_v56  ;;  %v4842_v25 = vmax.f32 %v4586_v27, 0.0  ;;  %v4605_v63 = vmul.f32 %v9242_v26, %v11157_v51  ;;  %v11170_v12 = vld [vmem:[#allocation208_spill] sm:$0xff] }
 0x745   :  { %5080 = vst [vmem:[#allocation7 + $0x5b8] sm:$0xff] %v4824_v22  ;;  %v4589_v22 = vmul.f32 %v9242_v26, %v11147_v41  ;;  %v4843_v55 = vmax.f32 %v4587_v54, 0.0  ;;  %v4611_v41 = vmul.f32 %v9242_v26, %v9063_v35 }
 0x746   :  { %5081 = vst [vmem:[#allocation7 + $0x5c0] sm:$0xff] %v4825_v47  ;;  %v4590_v47 = vmul.f32 %v9242_v26, %v11148_v9  ;;  %v4844_v31 = vmax.f32 %v4588_v28, 0.0  ;;  %v4861_v56 = vmax.f32 %v4605_v63, 0.0  ;;  %v11159_v28 = vld [vmem:[#allocation154_spill] sm:$0xff]  ;;  %v11174_v63 = vld [vmem:[#allocation224_spill] sm:$0xff] }
 0x747   :  { %5082 = vst [vmem:[#allocation7 + $0x5c8] sm:$0xff] %v4826_v13  ;;  %v4591_v13 = vmul.f32 %v9242_v26, %v11149_v34  ;;  %v4845_v8 = vmax.f32 %v4589_v22, 0.0  ;;  %v4610_v50 = vmul.f32 %v9242_v26, %v11159_v28 }
 0x748   :  { %5083 = vst [vmem:[#allocation7 + $0x5d0] sm:$0xff] %v4827_v1  ;;  %v4592_v1 = vmul.f32 %v9242_v26, %v11150_v17  ;;  %v4846_v33 = vmax.f32 %v4590_v47, 0.0  ;;  %v11162_v17 = vld [vmem:[#allocation201_spill] sm:$0xff] }
 0x749   :  { %5084 = vst [vmem:[#allocation7 + $0x5d8] sm:$0xff] %v4828_v21  ;;  %v4593_v21 = vmul.f32 %v9242_v26, %v11151_v4  ;;  %v4847_v38 = vmax.f32 %v4591_v13, 0.0  ;;  %v4866_v34 = vmax.f32 %v4610_v50, 0.0  ;;  %v11161_v13 = vld [vmem:[#allocation63_spill] sm:$0xff]  ;;  %v11163_v4 = vld [vmem:[#allocation202_spill] sm:$0xff]  ;;  %v11178_v50 = vld [vmem:[#allocation213_spill] sm:$0xff] }
 0x74a   :  { %5085 = vst [vmem:[#allocation7 + $0x5e0] sm:$0xff] %v4829_v59  ;;  %v4594_v59 = vmul.f32 %v9242_v26, %v11152_v45  ;;  %v4615_v35 = vmul.f32 %v9242_v26, %v11161_v13 }
 0x74b   :  { %5086 = vst [vmem:[#allocation7 + $0x5e8] sm:$0xff] %v4830_v20  ;;  %v4595_v20 = vmul.f32 %v9242_v26, %v11153_v32 }
 0x74c   :  { %5087 = vst [vmem:[#allocation7 + $0x5f0] sm:$0xff] %v4831_v43  ;;  %v4848_v43 = vmax.f32 %v4592_v1, 0.0  ;;  %v4850_v57 = vmax.f32 %v4594_v59, 0.0  ;;  %v4616_v1 = vmul.f32 %v9242_v26, %v11162_v17  ;;  %v11165_v59 = vld [vmem:[#allocation204_spill] sm:$0xff]  ;;  %v4871_v32 = vmax.f32 %v4615_v35, 0.0  ;;  %v11182_v35 = vld [vmem:[#allocation217_spill] sm:$0xff] }
 0x74d   :  { %5088 = vst [vmem:[#allocation7 + $0x5f8] sm:$0xff] %v4832_v10  ;;  %v4849_v10 = vmax.f32 %v4593_v21, 0.0  ;;  %v4851_v60 = vmax.f32 %v4595_v20, 0.0  ;;  %v11166_v20 = vld [vmem:[#allocation205_spill] sm:$0xff] }
 0x74e   :  { %5089 = vst [vmem:[#allocation7 + $0x600] sm:$0xff] %v4833_v14  ;;  %v4599_v14 = vmul.f32 %v9242_v26, %v8991_v3  ;;  %v4603_v3 = vmul.f32 %v9242_v26, %v9015_v46 }
 0x74f   :  { %5090 = vst [vmem:[#allocation7 + $0x608] sm:$0xff] %v4834_v0  ;;  %v4852_v0 = vmax.f32 %v4596_v7, 0.0  ;;  %v4872_v7 = vmax.f32 %v4616_v1, 0.0  ;;  %v11183_v1 = vld [vmem:[#allocation218_spill] sm:$0xff] }
 0x750   :  { %5091 = vst [vmem:[#allocation7 + $0x610] sm:$0xff] %v4835_v39  ;;  %v11156_v39 = vld [vmem:[#allocation151_spill] sm:$0xff]  ;;  %v4855_v29 = vmax.f32 %v4599_v14, 0.0  ;;  %v4859_v6 = vmax.f32 %v4603_v3, 0.0  ;;  %v11169_v14 = vld [vmem:[#allocation221_spill] sm:$0xff] }
 0x751   :  { %5092 = vst [vmem:[#allocation7 + $0x618] sm:$0xff] %v4836_v61  ;;  %v4602_v5 = vmul.f32 %v9242_v26, %v11156_v39  ;;  %v4604_v61 = vmul.f32 %v9242_v26, %v9021_v53  ;;  %v4608_v53 = vmul.f32 %v9242_v26, %v9045_v16 }
 0x752   :  { %5093 = vst [vmem:[#allocation7 + $0x620] sm:$0xff] %v4837_v19  ;;  %v4857_v19 = vmax.f32 %v4601_v48, 0.0 }
 0x753   :  { %5094 = vst [vmem:[#allocation7 + $0x628] sm:$0xff] %v4838_v2  ;;  %v4858_v27 = vmax.f32 %v4602_v5, 0.0  ;;  %v11158_v2 = vld [vmem:[#allocation153_spill] sm:$0xff]  ;;  %v4860_v54 = vmax.f32 %v4604_v61, 0.0  ;;  %v4864_v9 = vmax.f32 %v4608_v53, 0.0  ;;  %v11173_v61 = vld [vmem:[#allocation223_spill] sm:$0xff] }
 0x754   :  { %5095 = vst [vmem:[#allocation7 + $0x630] sm:$0xff] %v4839_v52  ;;  %v4607_v46 = vmul.f32 %v9242_v26, %v11158_v2  ;;  %v4609_v52 = vmul.f32 %v9242_v26, %v9051_v11  ;;  %v4613_v11 = vmul.f32 %v9242_v26, %v9075_v15  ;;  %v4617_v15 = vmul.f32 %v9242_v26, %v11163_v4 }
 0x755   :  { %5096 = vst [vmem:[#allocation7 + $0x638] sm:$0xff] %v4840_v58  ;;  %v4862_v58 = vmax.f32 %v4606_v40, 0.0 }
 0x756   :  { %5097 = vst [vmem:[#allocation7 + $0x640] sm:$0xff] %v4841_v23  ;;  %v4863_v22 = vmax.f32 %v4607_v46, 0.0  ;;  %v11160_v23 = vld [vmem:[#allocation155_spill] sm:$0xff]  ;;  %v4865_v47 = vmax.f32 %v4609_v52, 0.0  ;;  %v4869_v21 = vmax.f32 %v4613_v11, 0.0  ;;  %v4873_v42 = vmax.f32 %v4617_v15, 0.0 }
 0x757   :  { %5098 = vst [vmem:[#allocation7 + $0x648] sm:$0xff] %v4842_v25  ;;  %v4612_v16 = vmul.f32 %v9242_v26, %v11160_v23  ;;  %v4614_v25 = vmul.f32 %v9242_v26, %v9081_v36  ;;  %v11177_v52 = vld [vmem:[#allocation212_spill] sm:$0xff]  ;;  %v11184_v15 = vld [vmem:[#allocation219_spill] sm:$0xff] }
 0x758   :  { %5099 = vst [vmem:[#allocation7 + $0x650] sm:$0xff] %v4843_v55  ;;  %v4867_v55 = vmax.f32 %v4611_v41, 0.0 }
 0x759   :  { %5100 = vst [vmem:[#allocation7 + $0x658] sm:$0xff] %v4844_v31  ;;  %v4868_v31 = vmax.f32 %v4612_v16, 0.0  ;;  %v4870_v45 = vmax.f32 %v4614_v25, 0.0  ;;  %v11181_v25 = vld [vmem:[#allocation216_spill] sm:$0xff] }
 0x75a   :  { %5101 = vst [vmem:[#allocation7 + $0x660] sm:$0xff] %v4845_v8  ;;  %v11164_v8 = vld [vmem:[#allocation203_spill] sm:$0xff] }
 0x75b   :  { %5102 = vst [vmem:[#allocation7 + $0x668] sm:$0xff] %v4846_v33  ;;  %v4618_v36 = vmul.f32 %v9242_v26, %v11164_v8  ;;  %v4619_v33 = vmul.f32 %v9242_v26, %v11165_v59 }
 0x75c   :  { %5103 = vst [vmem:[#allocation7 + $0x670] sm:$0xff] %v4847_v38  ;;  %v4620_v38 = vmul.f32 %v9242_v26, %v11166_v20 }
 0x75d   :  { %5104 = vst [vmem:[#allocation7 + $0x678] sm:$0xff] %v4848_v43  ;;  %v11167_v43 = vld [vmem:[#allocation206_spill] sm:$0xff]  ;;  %v4875_v24 = vmax.f32 %v4619_v33, 0.0 }
 0x75e   :  { %5105 = vst [vmem:[#allocation7 + $0x680] sm:$0xff] %v4849_v10  ;;  %v4621_v49 = vmul.f32 %v9242_v26, %v11167_v43  ;;  %v11168_v10 = vld [vmem:[#allocation207_spill] sm:$0xff]  ;;  %v4876_v48 = vmax.f32 %v4620_v38, 0.0 }
 0x75f   :  { %5106 = vst [vmem:[#allocation7 + $0x688] sm:$0xff] %v4850_v57  ;;  %v4622_v44 = vmul.f32 %v9242_v26, %v11168_v10  ;;  %v4874_v57 = vmax.f32 %v4618_v36, 0.0  ;;  %v4639_v36 = vmul.f32 %v9242_v26, %v9231_v62 }
 0x760   :  { %5107 = vst [vmem:[#allocation7 + $0x690] sm:$0xff] %v4851_v60  ;;  %v4623_v60 = vmul.f32 %v9242_v26, %v11169_v14  ;;  %v4877_v5 = vmax.f32 %v4621_v49, 0.0 }
 0x761   :  { %5108 = vst [vmem:[#allocation7 + $0x698] sm:$0xff] %v4852_v0  ;;  %v4624_v0 = vmul.f32 %v9242_v26, %v11170_v12  ;;  %v4895_v20 = vmax.f32 %v4639_v36, 0.0 }
 0x762   :  { %5109 = vst [vmem:[#allocation7 + $0x6a0] sm:$0xff] %v4853_v37  ;;  %v11171_v37 = vld [vmem:[#allocation222_spill] sm:$0xff]  ;;  %v4879_v51 = vmax.f32 %v4623_v60, 0.0 }
 0x763   :  { %5110 = vst [vmem:[#allocation7 + $0x6a8] sm:$0xff] %v4854_v18  ;;  %v4625_v39 = vmul.f32 %v9242_v26, %v11171_v37  ;;  %v11172_v18 = vld [vmem:[#allocation209_spill] sm:$0xff]  ;;  %v4880_v40 = vmax.f32 %v4624_v0, 0.0 }
 0x764   :  { %5111 = vst [vmem:[#allocation7 + $0x6b0] sm:$0xff] %v4855_v29  ;;  %v4626_v3 = vmul.f32 %v9242_v26, %v11172_v18  ;;  %v4878_v29 = vmax.f32 %v4622_v44, 0.0 }
 0x765   :  { %5112 = vst [vmem:[#allocation7 + $0x6b8] sm:$0xff] %v4856_v30  ;;  %v4627_v30 = vmul.f32 %v9242_v26, %v11173_v61  ;;  %v4881_v46 = vmax.f32 %v4625_v39, 0.0 }
 0x766   :  { %5113 = vst [vmem:[#allocation7 + $0x6c0] sm:$0xff] %v4857_v19  ;;  %v4628_v19 = vmul.f32 %v9242_v26, %v11174_v63 }
 0x767   :  { %5114 = vst [vmem:[#allocation7 + $0x6c8] sm:$0xff] %v4858_v27  ;;  %v11175_v27 = vld [vmem:[#allocation210_spill] sm:$0xff]  ;;  %v4883_v28 = vmax.f32 %v4627_v30, 0.0 }
 0x768   :  { %5115 = vst [vmem:[#allocation7 + $0x6d0] sm:$0xff] %v4859_v6  ;;  %v4629_v2 = vmul.f32 %v9242_v26, %v11175_v27  ;;  %v11176_v6 = vld [vmem:[#allocation211_spill] sm:$0xff]  ;;  %v4884_v41 = vmax.f32 %v4628_v19, 0.0 }
 0x769   :  { %5116 = vst [vmem:[#allocation7 + $0x6d8] sm:$0xff] %v4860_v54  ;;  %v4630_v53 = vmul.f32 %v9242_v26, %v11176_v6  ;;  %v4882_v54 = vmax.f32 %v4626_v3, 0.0 }
 0x76a   :  { %5117 = vst [vmem:[#allocation7 + $0x6e0] sm:$0xff] %v4861_v56  ;;  %v4631_v56 = vmul.f32 %v9242_v26, %v11177_v52  ;;  %v4885_v16 = vmax.f32 %v4629_v2, 0.0 }
 0x76b   :  { %5118 = vst [vmem:[#allocation7 + $0x6e8] sm:$0xff] %v4862_v58  ;;  %v4632_v58 = vmul.f32 %v9242_v26, %v11178_v50 }
 0x76c   :  { %5119 = vst [vmem:[#allocation7 + $0x6f0] sm:$0xff] %v4863_v22  ;;  %v11179_v22 = vld [vmem:[#allocation214_spill] sm:$0xff]  ;;  %v4887_v13 = vmax.f32 %v4631_v56, 0.0 }
 0x76d   :  { %5120 = vst [vmem:[#allocation7 + $0x6f8] sm:$0xff] %v4864_v9  ;;  %v4633_v23 = vmul.f32 %v9242_v26, %v11179_v22  ;;  %v11180_v9 = vld [vmem:[#allocation215_spill] sm:$0xff]  ;;  %v4888_v17 = vmax.f32 %v4632_v58, 0.0 }
 0x76e   :  { %5121 = vst [vmem:[#allocation7 + $0x700] sm:$0xff] %v4865_v47  ;;  %v4634_v11 = vmul.f32 %v9242_v26, %v11180_v9  ;;  %v4886_v47 = vmax.f32 %v4630_v53, 0.0 }
 0x76f   :  { %5122 = vst [vmem:[#allocation7 + $0x708] sm:$0xff] %v4866_v34  ;;  %v4635_v34 = vmul.f32 %v9242_v26, %v11181_v25  ;;  %v4889_v4 = vmax.f32 %v4633_v23, 0.0 }
 0x770   :  { %5123 = vst [vmem:[#allocation7 + $0x710] sm:$0xff] %v4867_v55  ;;  %v4636_v55 = vmul.f32 %v9242_v26, %v11182_v35  ;;  %v4890_v8 = vmax.f32 %v4634_v11, 0.0 }
 0x771   :  { %5124 = vst [vmem:[#allocation7 + $0x718] sm:$0xff] %v4868_v31  ;;  %v4637_v31 = vmul.f32 %v9242_v26, %v11183_v1 }
 0x772   :  { %5125 = vst [vmem:[#allocation7 + $0x720] sm:$0xff] %v4869_v21  ;;  %v4638_v21 = vmul.f32 %v9242_v26, %v11184_v15  ;;  %v4892_v59 = vmax.f32 %v4636_v55, 0.0 }
 0x773   :  { %5126 = vst [vmem:[#allocation7 + $0x728] sm:$0xff] %v4870_v45  ;;  %v4891_v45 = vmax.f32 %v4635_v34, 0.0  ;;  %v4893_v33 = vmax.f32 %v4637_v31, 0.0 }
 0x774   :  { %5127 = vst [vmem:[#allocation7 + $0x730] sm:$0xff] %v4871_v32  ;;  %v4894_v32 = vmax.f32 %v4638_v21, 0.0 }
 0x775   :  { %5128 = vst [vmem:[#allocation7 + $0x738] sm:$0xff] %v4872_v7 }
 0x776   :  { %5129 = vst [vmem:[#allocation7 + $0x740] sm:$0xff] %v4873_v42 }
 0x777   :  { %5130 = vst [vmem:[#allocation7 + $0x748] sm:$0xff] %v4874_v57 }
 0x778   :  { %5131 = vst [vmem:[#allocation7 + $0x750] sm:$0xff] %v4875_v24 }
 0x779   :  { %5132 = vst [vmem:[#allocation7 + $0x758] sm:$0xff] %v4876_v48 }
 0x77a   :  { %5133 = vst [vmem:[#allocation7 + $0x760] sm:$0xff] %v4877_v5 }
 0x77b   :  { %5134 = vst [vmem:[#allocation7 + $0x768] sm:$0xff] %v4878_v29 }
 0x77c   :  { %5135 = vst [vmem:[#allocation7 + $0x770] sm:$0xff] %v4879_v51 }
 0x77d   :  { %5136 = vst [vmem:[#allocation7 + $0x778] sm:$0xff] %v4880_v40 }
 0x77e   :  { %5137 = vst [vmem:[#allocation7 + $0x780] sm:$0xff] %v4881_v46 }
 0x77f   :  { %5138 = vst [vmem:[#allocation7 + $0x788] sm:$0xff] %v4882_v54 }
 0x780   :  { %5139 = vst [vmem:[#allocation7 + $0x790] sm:$0xff] %v4883_v28 }
 0x781   :  { %5140 = vst [vmem:[#allocation7 + $0x798] sm:$0xff] %v4884_v41 }
 0x782   :  { %5141 = vst [vmem:[#allocation7 + $0x7a0] sm:$0xff] %v4885_v16 }
 0x783   :  { %5142 = vst [vmem:[#allocation7 + $0x7a8] sm:$0xff] %v4886_v47 }
 0x784   :  { %5143 = vst [vmem:[#allocation7 + $0x7b0] sm:$0xff] %v4887_v13 }
 0x785   :  { %5144 = vst [vmem:[#allocation7 + $0x7b8] sm:$0xff] %v4888_v17 }
 0x786   :  { %5145 = vst [vmem:[#allocation7 + $0x7c0] sm:$0xff] %v4889_v4 }
 0x787   :  { %5146 = vst [vmem:[#allocation7 + $0x7c8] sm:$0xff] %v4890_v8 }
 0x788   :  { %5147 = vst [vmem:[#allocation7 + $0x7d0] sm:$0xff] %v4891_v45 }
 0x789   :  { %5148 = vst [vmem:[#allocation7 + $0x7d8] sm:$0xff] %v4892_v59 }
 0x78a   :  { %5149 = vst [vmem:[#allocation7 + $0x7e0] sm:$0xff] %v4893_v33 }
 0x78b   :  { %5150 = vst [vmem:[#allocation7 + $0x7e8] sm:$0xff] %v4894_v32 }
 0x78c   :  { %5151 = vst [vmem:[#allocation7 + $0x7f0] sm:$0xff] %v4895_v20 }
 0x78d   :  { %5165 = dma.vmem_to_hbm [thread:$0]  %s5158_s26, 32768, %s5160_s29, [#allocation4], %s5976_s30, %s5976_s30, %s5977_s4  }
 0x78e   :  { %5968 = dma.done.wait [#allocation4], 32768  }
 0x78f   :  { %5969 = vsyncadd [#allocation4], 4294934528 }
 0x790   :  { %5170 = vsyncpa [#allocation3], 1 }
 0x791   :  { %5171 = vsyncpa [#allocation6], 1 }
 0x792   :  { %5172 = vsyncpa [#allocation4], 1 }

</bundles_post_ra>
